<compile_context>
chip_gen: v5e
topology: v5e:2x2
jax: 0.10.0
libtpu: 0.0.40
codegen_flags: <defaults>
</compile_context>

<pallas_src>
import functools

import jax
import jax.numpy as jnp
from jax.experimental import pallas as pl
from jax.experimental.pallas import tpu as pltpu

LN_EPS = 1e-5  # PyTorch nn.LayerNorm default


# ----------------------------------------------------------------------------
# Hardware-aware sizing helpers
# ----------------------------------------------------------------------------
@functools.lru_cache(maxsize=None)
def _tpu_vmem_capacity():
    try:
        return int(pltpu.get_tpu_info().vmem_capacity_bytes)
    except Exception:
        return 128 * 1024 * 1024  # assume v5e/v6e-class VMEM if query unavailable


def _vmem_limit():
    # ~100 MB on 128-MiB parts (v5e/v6e), ~53 MB on 64-MiB parts (v7x).
    return min(int(_tpu_vmem_capacity() * 0.8), 100 * 1024 * 1024)


def _row_tile_target():
    # 512-row tiles hit ~85% of HBM roofline on v5e/v6e; cap at 256 under v7x's 64 MiB VMEM.
    return 256 if _tpu_vmem_capacity() <= 64 * 1024 * 1024 else 512


def _row_tile(m, target):
    """Row tile for cdiv-padded grids: `target` rows, or M rounded up to 8 if smaller."""
    if m >= target:
        return target
    return ((m + 7) // 8) * 8


def _divisor_tile(n, target):
    """Largest multiple-of-8 divisor of n that is <= target (else n itself)."""
    t = (min(target, n) // 8) * 8
    while t >= 8:
        if n % t == 0:
            return t
        t -= 8
    return n


def _const_spec(shape, grid_ndim):
    """Weight/bias/LN block: identical every grid step -> single-buffered in VMEM."""
    zeros = (0,) * len(shape)
    index_map = (lambda i: zeros) if grid_ndim == 1 else (lambda b, i: zeros)
    return pl.BlockSpec(shape, index_map, pipeline_mode=pl.Buffered(1))


def _cparams(*semantics):
    return pltpu.CompilerParams(dimension_semantics=semantics,
                                vmem_limit_bytes=_vmem_limit())


# ----------------------------------------------------------------------------
# Kernel bodies
# ----------------------------------------------------------------------------
def _layer_norm(y, g, b):
    mu = jnp.mean(y, axis=-1, keepdims=True)
    yc = y - mu
    var = jnp.mean(yc * yc, axis=-1, keepdims=True)
    return yc * jax.lax.rsqrt(var + LN_EPS) * g + b


def _mha_residual_ln(xq, kv, wq_ref, bq_ref, wkv_ref, bkv_ref, wo_ref, bo_ref,
                     g_ref, b_ref, o_ref, o_scr, *, n_heads):
    """LN(xq + MHA(xq, kv)) -> o_ref[0].  Matmul operands in weight dtype, math in f32."""
    cdt = wq_ref.dtype                       # bf16 (production) or f32 (verification)
    use_approx = cdt != jnp.float32
    D = xq.shape[-1]
    dk = D // n_heads

    # Q and fused K|V projections (1/sqrt(dk) pre-folded into wq/bq at fuse time).
    q = jnp.dot(xq.astype(cdt), wq_ref[...],
                preferred_element_type=jnp.float32) + bq_ref[...]            # [TQ, D]
    kvp = jnp.dot(kv.astype(cdt), wkv_ref[...],
                  preferred_element_type=jnp.float32) + bkv_ref[...]         # [Lk, 2D]
    k = kvp[:, :D]
    v = kvp[:, D:]

    # Per-head softmax attention; per-head results written to a lane-offset scratch so
    # the output projection is a single K=D matmul (no per-head Wo matmuls / concat).
    for h in range(n_heads):
        lo, hi = h * dk, (h + 1) * dk
        s = jax.lax.dot_general(q[:, lo:hi].astype(cdt), k[:, lo:hi].astype(cdt),
                                (((1,), (1,)), ((), ())),
                                preferred_element_type=jnp.float32)          # [TQ, Lk]
        m = jnp.max(s, axis=-1, keepdims=True)
        p = jnp.exp(s - m)
        denom = jnp.sum(p, axis=-1, keepdims=True)
        p = p * pl.reciprocal(denom, approx=use_approx)
        o_scr[:, lo:hi] = jnp.dot(p.astype(cdt), v[:, lo:hi].astype(cdt),
                                  preferred_element_type=jnp.float32)

    out = jnp.dot(o_scr[...].astype(cdt), wo_ref[...],
                  preferred_element_type=jnp.float32) + bo_ref[...]          # [TQ, D]

    # Residual + LayerNorm epilogue (biased variance, eps=1e-5, all f32).
    o_ref[0] = _layer_norm(xq + out, g_ref[...], b_ref[...]).astype(o_ref.dtype)


def _self_attn_kernel(x_ref, wq_ref, bq_ref, wkv_ref, bkv_ref, wo_ref, bo_ref,
                      g_ref, b_ref, o_ref, o_scr, *, n_heads, tq):
    """Self-attention block: x fetched once; Q tile sliced in-kernel from the full block."""
    i = pl.program_id(1)
    x_full = x_ref[0].astype(jnp.float32)                 # [Lq, D] — keys/values source
    start = i * tq
    if tq % 8 == 0:
        start = pl.multiple_of(start, 8)
    xq = x_ref[0, pl.ds(start, tq), :].astype(jnp.float32)  # [TQ, D] — queries / residual
    _mha_residual_ln(xq, x_full, wq_ref, bq_ref, wkv_ref, bkv_ref, wo_ref, bo_ref,
                     g_ref, b_ref, o_ref, o_scr, n_heads=n_heads)


def _cross_attn_kernel(x_ref, kv_ref, wq_ref, bq_ref, wkv_ref, bkv_ref, wo_ref, bo_ref,
                       g_ref, b_ref, o_ref, o_scr, *, n_heads):
    xq = x_ref[0].astype(jnp.float32)                     # [TQ, D]
    kv = kv_ref[0].astype(jnp.float32)                    # [Lk, D]
    _mha_residual_ln(xq, kv, wq_ref, bq_ref, wkv_ref, bkv_ref, wo_ref, bo_ref,
                     g_ref, b_ref, o_ref, o_scr, n_heads=n_heads)


def _ffn_ln_kernel(x_ref, w1_ref, b1_ref, w2_ref, b2_ref, g_ref, b_ref, o_ref):
    """LN(x + conv2(relu(conv1(x)))) on a row tile; conv1d(k=1) == per-token linear."""
    cdt = w1_ref.dtype
    x = x_ref[...].astype(jnp.float32)                    # [TM, D]
    h = jnp.dot(x.astype(cdt), w1_ref[...], preferred_element_type=jnp.float32) + b1_ref[...]
    h = jnp.maximum(h, 0.0)
    y = x + jnp.dot(h.astype(cdt), w2_ref[...], preferred_element_type=jnp.float32) + b2_ref[...]
    o_ref[...] = _layer_norm(y, g_ref[...], b_ref[...]).astype(o_ref.dtype)


def _ln_proj_kernel(x_ref, wp_ref, bp_ref, o_ref):
    """Final LayerNorm + projection; LN gamma/beta are pre-folded into wp/bp."""
    x = x_ref[...].astype(jnp.float32)                    # [TM, D]
    mu = jnp.mean(x, axis=-1, keepdims=True)
    xc = x - mu
    var = jnp.mean(xc * xc, axis=-1, keepdims=True)
    z = xc * jax.lax.rsqrt(var + LN_EPS)
    o_ref[...] = (jnp.dot(z.astype(wp_ref.dtype), wp_ref[...],
                          preferred_element_type=jnp.float32) + bp_ref[...]).astype(o_ref.dtype)


# ----------------------------------------------------------------------------
# pallas_call wrappers
# ----------------------------------------------------------------------------
def self_attention_block(x, ap, gamma, beta, n_heads, tq_target=256):
    B, L, D = x.shape
    TQ = _divisor_tile(L, tq_target)
    grid = (B, L // TQ)
    kern = functools.partial(_self_attn_kernel, n_heads=n_heads, tq=TQ)
    return pl.pallas_call(
        kern,
        out_shape=jax.ShapeDtypeStruct((B, L, D), x.dtype),
        grid=grid,
        in_specs=[
            pl.BlockSpec((1, L, D), lambda b, i: (b, 0, 0)),   # x (single fetch: Q & K/V roles)
            _const_spec((D, D), 2), _const_spec((1, D), 2),          # wq, bq (scale folded)
            _const_spec((D, 2 * D), 2), _const_spec((1, 2 * D), 2),  # wkv, bkv
            _const_spec((D, D), 2), _const_spec((1, D), 2),          # wo, bo
            _const_spec((1, D), 2), _const_spec((1, D), 2),          # LN gamma, beta
        ],
        out_specs=pl.BlockSpec((1, TQ, D), lambda b, i: (b, i, 0)),
        scratch_shapes=[pltpu.VMEM((TQ, D), jnp.float32)],
        compiler_params=_cparams("parallel", "parallel"),
    )(x, ap["wq"], ap["bq"], ap["wkv"], ap["bkv"], ap["wo"], ap["bo"], gamma, beta)


def cross_attention_block(x, cross, ap, gamma, beta, n_heads, tq_target=256):
    B, L, D = x.shape
    Lk = cross.shape[1]
    TQ = _divisor_tile(L, tq_target)
    grid = (B, L // TQ)
    kern = functools.partial(_cross_attn_kernel, n_heads=n_heads)
    return pl.pallas_call(
        kern,
        out_shape=jax.ShapeDtypeStruct((B, L, D), x.dtype),
        grid=grid,
        in_specs=[
            pl.BlockSpec((1, TQ, D), lambda b, i: (b, i, 0)),  # query tile / residual
            pl.BlockSpec((1, Lk, D), lambda b, i: (b, 0, 0)),  # encoder output (K/V source)
            _const_spec((D, D), 2), _const_spec((1, D), 2),
            _const_spec((D, 2 * D), 2), _const_spec((1, 2 * D), 2),
            _const_spec((D, D), 2), _const_spec((1, D), 2),
            _const_spec((1, D), 2), _const_spec((1, D), 2),
        ],
        out_specs=pl.BlockSpec((1, TQ, D), lambda b, i: (b, i, 0)),
        scratch_shapes=[pltpu.VMEM((TQ, D), jnp.float32)],
        compiler_params=_cparams("parallel", "parallel"),
    )(x, cross, ap["wq"], ap["bq"], ap["wkv"], ap["bkv"], ap["wo"], ap["bo"], gamma, beta)


def ffn_block(x, w1, b1, w2, b2, gamma, beta):
    B, L, D = x.shape
    F = w1.shape[1]
    M = B * L
    TM = _row_tile(M, _row_tile_target())
    n_tiles = pl.cdiv(M, TM)
    Mpad = n_tiles * TM
    x2 = x.reshape(M, D)
    if Mpad != M:
        x2 = jnp.pad(x2, ((0, Mpad - M), (0, 0)))
    out = pl.pallas_call(
        _ffn_ln_kernel,
        out_shape=jax.ShapeDtypeStruct((Mpad, D), x.dtype),
        grid=(n_tiles,),
        in_specs=[
            pl.BlockSpec((TM, D), lambda i: (i, 0)),
            _const_spec((D, F), 1), _const_spec((1, F), 1),
            _const_spec((F, D), 1), _const_spec((1, D), 1),
            _const_spec((1, D), 1), _const_spec((1, D), 1),
        ],
        out_specs=pl.BlockSpec((TM, D), lambda i: (i, 0)),
        compiler_params=_cparams("parallel"),
    )(x2, w1, b1, w2, b2, gamma, beta)
    return out[:M].reshape(B, L, D)


def norm_project(x, wp_pad, bp_pad, c_out):
    B, L, D = x.shape
    M = B * L
    N = wp_pad.shape[1]
    TM = _row_tile(M, _row_tile_target())
    n_tiles = pl.cdiv(M, TM)
    Mpad = n_tiles * TM
    x2 = x.reshape(M, D)
    if Mpad != M:
        x2 = jnp.pad(x2, ((0, Mpad - M), (0, 0)))
    out = pl.pallas_call(
        _ln_proj_kernel,
        out_shape=jax.ShapeDtypeStruct((Mpad, N), x.dtype),
        grid=(n_tiles,),
        in_specs=[
            pl.BlockSpec((TM, D), lambda i: (i, 0)),
            _const_spec((D, N), 1), _const_spec((1, N), 1),
        ],
        out_specs=pl.BlockSpec((TM, N), lambda i: (i, 0)),
        compiler_params=_cparams("parallel"),
    )(x2, wp_pad, bp_pad)
    return out[:M, :c_out].reshape(B, L, c_out)


def decoder_forward(x, cross, params, *, n_heads, c_out):
    """Decoder.forward(x, cross, x_mask=None, cross_mask=None, tau=None, delta=None)."""
    for p in params["layers"]:
        x = self_attention_block(x, p["self_attn"], p["norm1_g"], p["norm1_b"], n_heads)
        x = cross_attention_block(x, cross, p["cross_attn"], p["norm2_g"], p["norm2_b"], n_heads)
        x = ffn_block(x, p["w1"], p["b1"], p["w2"], p["b2"], p["norm3_g"], p["norm3_b"])
    return norm_project(x, params["wp"], params["bp"], c_out)


# ----------------------------------------------------------------------------
# One-time parameter preparation (fusion, constant folding, dtype, lane padding)
# ----------------------------------------------------------------------------
def fuse_params(layer_params, norm_params, proj_params, c_out, n_heads,
                matmul_dtype=jnp.bfloat16):
    wdt = matmul_dtype
    d_model = layer_params[0]["w1"].shape[0]
    scale = 1.0 / ((d_model // n_heads) ** 0.5)

    def fuse_attn(a):
        return {
            "wq": (a["wq"] * scale).astype(wdt),          # 1/sqrt(dk) folded into Wq, bq
            "bq": (a["bq"] * scale).astype(jnp.float32),
            "wkv": jnp.concatenate([a["wk"], a["wv"]], axis=1).astype(wdt),
            "bkv": jnp.concatenate([a["bk"], a["bv"]], axis=1).astype(jnp.float32),
            "wo": a["wo"].astype(wdt),
            "bo": a["bo"].astype(jnp.float32),
        }

    layers = []
    for p in layer_params:
        layers.append({
            "self_attn": fuse_attn(p["self_attn"]),
            "cross_attn": fuse_attn(p["cross_attn"]),
            "w1": p["w1"].astype(wdt), "b1": p["b1"].astype(jnp.float32),
            "w2": p["w2"].astype(wdt), "b2": p["b2"].astype(jnp.float32),
            "norm1_g": p["norm1_g"], "norm1_b": p["norm1_b"],
            "norm2_g": p["norm2_g"], "norm2_b": p["norm2_b"],
            "norm3_g": p["norm3_g"], "norm3_b": p["norm3_b"],
        })

    # Fold final-LN affine into the projection:  (z*g + b) @ Wp + bp == z @ (g^T*Wp) + (b@Wp + bp)
    wp, bp = proj_params
    g, b = norm_params
    wp_fold = wp * g.reshape(-1, 1)
    bp_fold = bp + b @ wp
    n_pad = ((c_out + 127) // 128) * 128                  # lane-dense output slab
    wp_pad = jnp.zeros((d_model, n_pad), jnp.float32).at[:, :c_out].set(wp_fold).astype(wdt)
    bp_pad = jnp.zeros((1, n_pad), jnp.float32).at[:, :c_out].set(bp_fold)
    return {"layers": layers, "wp": wp_pad, "bp": bp_pad}


# ----------------------------------------------------------------------------
# Pure-JAX reference (mirrors the PyTorch math) for the correctness check
# ----------------------------------------------------------------------------
def _ref_ln(x, g, b):
    mu = x.mean(-1, keepdims=True)
    var = ((x - mu) ** 2).mean(-1, keepdims=True)
    return (x - mu) / jnp.sqrt(var + LN_EPS) * g + b


def _ref_mha(q_in, kv_in, p, n_heads):
    B, Lq, D = q_in.shape
    Lk = kv_in.shape[1]
    dk = D // n_heads
    q = (q_in @ p["wq"] + p["bq"]).reshape(B, Lq, n_heads, dk).transpose(0, 2, 1, 3)
    k = (kv_in @ p["wk"] + p["bk"]).reshape(B, Lk, n_heads, dk).transpose(0, 2, 1, 3)
    v = (kv_in @ p["wv"] + p["bv"]).reshape(B, Lk, n_heads, dk).transpose(0, 2, 1, 3)
    s = jnp.einsum("bhqd,bhkd->bhqk", q, k) / (dk ** 0.5)
    a = jax.nn.softmax(s, axis=-1)
    o = jnp.einsum("bhqk,bhkd->bhqd", a, v).transpose(0, 2, 1, 3).reshape(B, Lq, D)
    return o @ p["wo"] + p["bo"]


def _ref_decoder(x, cross, layer_params, norm_params, proj_params, n_heads):
    for p in layer_params:
        x = _ref_ln(x + _ref_mha(x, x, p["self_attn"], n_heads), p["norm1_g"], p["norm1_b"])
        x = _ref_ln(x + _ref_mha(x, cross, p["cross_attn"], n_heads), p["norm2_g"], p["norm2_b"])
        y = jnp.maximum(x @ p["w1"] + p["b1"], 0.0) @ p["w2"] + p["b2"]
        x = _ref_ln(x + y, p["norm3_g"], p["norm3_b"])
    x = _ref_ln(x, norm_params[0], norm_params[1])
    return x @ proj_params[0] + proj_params[1]


# ----------------------------------------------------------------------------
# Deterministic parameter construction
# ----------------------------------------------------------------------------
def _init_params(key, num_layers, d_model, d_ff, c_out):
    def nrm(k, shape, s=0.05):
        return (s * jax.random.normal(k, shape)).astype(jnp.float32)

    layer_params = []
    for _ in range(num_layers):
        keys = jax.random.split(key, 27)
        key = keys[-1]

        def attn_p(ks):
            return {
                "wq": nrm(ks[0], (d_model, d_model)), "bq": nrm(ks[1], (1, d_model), 0.02),
                "wk": nrm(ks[2], (d_model, d_model)), "bk": nrm(ks[3], (1, d_model), 0.02),
                "wv": nrm(ks[4], (d_model, d_model)), "bv": nrm(ks[5], (1, d_model), 0.02),
                "wo": nrm(ks[6], (d_model, d_model)), "bo": nrm(ks[7], (1, d_model), 0.02),
            }

        layer_params.append({
            "self_attn": attn_p(keys[0:8]),
            "cross_attn": attn_p(keys[8:16]),
            # Conv1d(d_model, d_ff, 1) weight [d_ff, d_model, 1] stored as [d_model, d_ff]
            "w1": nrm(keys[16], (d_model, d_ff)), "b1": nrm(keys[17], (1, d_ff), 0.02),
            "w2": nrm(keys[18], (d_ff, d_model)), "b2": nrm(keys[19], (1, d_model), 0.02),
            "norm1_g": 1.0 + nrm(keys[20], (1, d_model), 0.02),
            "norm1_b": nrm(keys[21], (1, d_model), 0.02),
            "norm2_g": 1.0 + nrm(keys[22], (1, d_model), 0.02),
            "norm2_b": nrm(keys[23], (1, d_model), 0.02),
            "norm3_g": 1.0 + nrm(keys[24], (1, d_model), 0.02),
            "norm3_b": nrm(keys[25], (1, d_model), 0.02),
        })

    kw, kb, kg, kbb, key = jax.random.split(key, 5)
    norm_params = (1.0 + nrm(kg, (1, d_model), 0.02), nrm(kbb, (1, d_model), 0.02))
    proj_params = (nrm(kw, (d_model, c_out)), nrm(kb, (1, c_out), 0.02))
    return layer_params, norm_params, proj_params


# ----------------------------------------------------------------------------
if __name__ == "__main__":
    B, L_DEC, L_ENC = 2, 8, 16
    D_MODEL, N_HEADS, D_FF, C_OUT = 32, 4, 64, 8
    NUM_LAYERS = 2

    root = jax.random.PRNGKey(0)
    kx, kc, kp = jax.random.split(root, 3)
    x = jax.random.normal(kx, (B, L_DEC, D_MODEL), dtype=jnp.float32)
    cross = jax.random.normal(kc, (B, L_ENC, D_MODEL), dtype=jnp.float32)

    layer_params, norm_params, proj_params = _init_params(kp, NUM_LAYERS, D_MODEL, D_FF, C_OUT)

    with jax.default_matmul_precision("highest"):
        ref = _ref_decoder(x, cross, layer_params, norm_params, proj_params, N_HEADS)

    fwd = jax.jit(functools.partial(decoder_forward, n_heads=N_HEADS, c_out=C_OUT))

    # 1) f32 matmul-operand mode: tight check of the kernel math against the reference.
    fused_f32 = fuse_params(layer_params, norm_params, proj_params, C_OUT, N_HEADS,
                            matmul_dtype=jnp.float32)
    out_f32 = jax.block_until_ready(fwd(x, cross, fused_f32))
    assert out_f32.shape == (B, L_DEC, C_OUT), out_f32.shape
    assert jnp.allclose(out_f32, ref, rtol=1e-3, atol=1e-3), \
        float(jnp.max(jnp.abs(out_f32 - ref)))

    # 2) bf16 matmul-operand mode (production path on v6e/v7x): looser numeric budget.
    fused_bf16 = fuse_params(layer_params, norm_params, proj_params, C_OUT, N_HEADS,
                             matmul_dtype=jnp.bfloat16)
    out_bf16 = jax.block_until_ready(fwd(x, cross, fused_bf16))
    assert out_bf16.shape == (B, L_DEC, C_OUT), out_bf16.shape
    assert jnp.allclose(out_bf16, ref, rtol=5e-2, atol=5e-2), \
        float(jnp.max(jnp.abs(out_bf16 - ref)))

    print("KERNEL_OK")
</pallas_src>

<mosaic_0001>
module attributes {stable_mosaic.version = 11 : i64} {
  func.func @_ffn_ln_kernel(%arg0: i32, %arg1: memref<16x32xf32, #tpu.memory_space<vmem>>, %arg2: memref<32x64xf32, #tpu.memory_space<vmem>>, %arg3: memref<1x64xf32, #tpu.memory_space<vmem>>, %arg4: memref<64x32xf32, #tpu.memory_space<vmem>>, %arg5: memref<1x32xf32, #tpu.memory_space<vmem>>, %arg6: memref<1x32xf32, #tpu.memory_space<vmem>>, %arg7: memref<1x32xf32, #tpu.memory_space<vmem>>, %arg8: memref<16x32xf32, #tpu.memory_space<vmem>>) attributes {dimension_semantics = [#tpu.dimension_semantics<parallel>], iteration_bounds = array<i64: 1>, scalar_prefetch = 0 : i64, scratch_operands = 0 : i64, tpu.core_type = #tpu.core_type<tc>, window_params = [{transform_indices = @transform_0, window_bounds = array<i64: 16, 32>}, {pipeline_mode = #tpu.pipeline_mode<synchronous>, transform_indices = @transform_1, window_bounds = array<i64: 32, 64>}, {pipeline_mode = #tpu.pipeline_mode<synchronous>, transform_indices = @transform_2, window_bounds = array<i64: 1, 64>}, {pipeline_mode = #tpu.pipeline_mode<synchronous>, transform_indices = @transform_3, window_bounds = array<i64: 64, 32>}, {pipeline_mode = #tpu.pipeline_mode<synchronous>, transform_indices = @transform_4, window_bounds = array<i64: 1, 32>}, {pipeline_mode = #tpu.pipeline_mode<synchronous>, transform_indices = @transform_5, window_bounds = array<i64: 1, 32>}, {pipeline_mode = #tpu.pipeline_mode<synchronous>, transform_indices = @transform_6, window_bounds = array<i64: 1, 32>}, {transform_indices = @transform_7, window_bounds = array<i64: 16, 32>}]} {
    %c0 = arith.constant 0 : index
    %c0_0 = arith.constant 0 : index
    %0 = vector.load %arg1[%c0, %c0_0] : memref<16x32xf32, #tpu.memory_space<vmem>>, vector<16x32xf32>
    %c0_1 = arith.constant 0 : index
    %c0_2 = arith.constant 0 : index
    %1 = vector.load %arg2[%c0_1, %c0_2] : memref<32x64xf32, #tpu.memory_space<vmem>>, vector<32x64xf32>
    %cst = arith.constant dense<0.000000e+00> : vector<16x64xf32>
    %2 = tpu.matmul %0, %1, %cst {dimension_numbers = #tpu.dot_dimension_numbers<[1], [0], [0], [1], [0, 0, 1, 1], [], []>} : vector<16x32xf32>, vector<32x64xf32>, vector<16x64xf32> -> vector<16x64xf32>
    %c0_3 = arith.constant 0 : index
    %c0_4 = arith.constant 0 : index
    %3 = vector.load %arg3[%c0_3, %c0_4] : memref<1x64xf32, #tpu.memory_space<vmem>>, vector<1x64xf32>
    %4 = vector.broadcast %3 : vector<1x64xf32> to vector<16x64xf32>
    %5 = arith.addf %2, %4 : vector<16x64xf32>
    %cst_5 = arith.constant 0.000000e+00 : f32
    %6 = vector.broadcast %cst_5 : f32 to vector<16x64xf32>
    %7 = arith.maximumf %5, %6 : vector<16x64xf32>
    %c0_6 = arith.constant 0 : index
    %c0_7 = arith.constant 0 : index
    %8 = vector.load %arg4[%c0_6, %c0_7] : memref<64x32xf32, #tpu.memory_space<vmem>>, vector<64x32xf32>
    %cst_8 = arith.constant dense<0.000000e+00> : vector<16x32xf32>
    %9 = tpu.matmul %7, %8, %cst_8 {dimension_numbers = #tpu.dot_dimension_numbers<[1], [0], [0], [1], [0, 0, 1, 1], [], []>} : vector<16x64xf32>, vector<64x32xf32>, vector<16x32xf32> -> vector<16x32xf32>
    %10 = arith.addf %0, %9 : vector<16x32xf32>
    %c0_9 = arith.constant 0 : index
    %c0_10 = arith.constant 0 : index
    %11 = vector.load %arg5[%c0_9, %c0_10] : memref<1x32xf32, #tpu.memory_space<vmem>>, vector<1x32xf32>
    %12 = vector.broadcast %11 : vector<1x32xf32> to vector<16x32xf32>
    %13 = arith.addf %10, %12 : vector<16x32xf32>
    %c0_11 = arith.constant 0 : index
    %c0_12 = arith.constant 0 : index
    %14 = vector.load %arg6[%c0_11, %c0_12] : memref<1x32xf32, #tpu.memory_space<vmem>>, vector<1x32xf32>
    %c0_13 = arith.constant 0 : index
    %c0_14 = arith.constant 0 : index
    %15 = vector.load %arg7[%c0_13, %c0_14] : memref<1x32xf32, #tpu.memory_space<vmem>>, vector<1x32xf32>
    %cst_15 = arith.constant dense<0.000000e+00> : vector<16xf32>
    %16 = vector.multi_reduction <add>, %13, %cst_15 [1] : vector<16x32xf32> to vector<16xf32>
    %17 = vector.shape_cast %16 : vector<16xf32> to vector<16x1xf32>
    %cst_16 = arith.constant 3.200000e+01 : f32
    %18 = vector.broadcast %cst_16 : f32 to vector<16x1xf32>
    %19 = arith.divf %17, %18 : vector<16x1xf32>
    %20 = vector.broadcast %19 : vector<16x1xf32> to vector<16x32xf32>
    %21 = arith.subf %13, %20 : vector<16x32xf32>
    %22 = arith.mulf %21, %21 : vector<16x32xf32>
    %cst_17 = arith.constant dense<0.000000e+00> : vector<16xf32>
    %23 = vector.multi_reduction <add>, %22, %cst_17 [1] : vector<16x32xf32> to vector<16xf32>
    %24 = vector.shape_cast %23 : vector<16xf32> to vector<16x1xf32>
    %cst_18 = arith.constant 3.200000e+01 : f32
    %25 = vector.broadcast %cst_18 : f32 to vector<16x1xf32>
    %26 = arith.divf %24, %25 : vector<16x1xf32>
    %cst_19 = arith.constant 9.99999974E-6 : f32
    %27 = vector.broadcast %cst_19 : f32 to vector<16x1xf32>
    %28 = arith.addf %26, %27 : vector<16x1xf32>
    %29 = math.rsqrt %28 : vector<16x1xf32>
    %30 = vector.broadcast %29 : vector<16x1xf32> to vector<16x32xf32>
    %31 = arith.mulf %21, %30 : vector<16x32xf32>
    %32 = vector.broadcast %14 : vector<1x32xf32> to vector<16x32xf32>
    %33 = arith.mulf %31, %32 : vector<16x32xf32>
    %34 = vector.broadcast %15 : vector<1x32xf32> to vector<16x32xf32>
    %35 = arith.addf %33, %34 : vector<16x32xf32>
    %c0_20 = arith.constant 0 : index
    %c0_21 = arith.constant 0 : index
    %36 = vector.load %arg8[%c0_20, %c0_21] : memref<16x32xf32, #tpu.memory_space<vmem>>, vector<16x32xf32>
    tpu.vector_store %arg8[%c0_20, %c0_21], %35 {strides = array<i32>} : memref<16x32xf32, #tpu.memory_space<vmem>>, vector<16x32xf32>,
    return
  }
  func.func @transform_0(%arg0: i32) -> (i32, i32) {
    %c0_i32 = arith.constant 0 : i32
    %c0_i32_0 = arith.constant 0 : i32
    return %arg0, %c0_i32 : i32, i32
  }
  func.func @transform_1(%arg0: i32) -> (i32, i32) {
    %c0_i32 = arith.constant 0 : i32
    %c0_i32_0 = arith.constant 0 : i32
    %c0_i32_1 = arith.constant 0 : i32
    return %c0_i32, %c0_i32_0 : i32, i32
  }
  func.func @transform_2(%arg0: i32) -> (i32, i32) {
    %c0_i32 = arith.constant 0 : i32
    %c0_i32_0 = arith.constant 0 : i32
    %c0_i32_1 = arith.constant 0 : i32
    return %c0_i32, %c0_i32_0 : i32, i32
  }
  func.func @transform_3(%arg0: i32) -> (i32, i32) {
    %c0_i32 = arith.constant 0 : i32
    %c0_i32_0 = arith.constant 0 : i32
    %c0_i32_1 = arith.constant 0 : i32
    return %c0_i32, %c0_i32_0 : i32, i32
  }
  func.func @transform_4(%arg0: i32) -> (i32, i32) {
    %c0_i32 = arith.constant 0 : i32
    %c0_i32_0 = arith.constant 0 : i32
    %c0_i32_1 = arith.constant 0 : i32
    return %c0_i32, %c0_i32_0 : i32, i32
  }
  func.func @transform_5(%arg0: i32) -> (i32, i32) {
    %c0_i32 = arith.constant 0 : i32
    %c0_i32_0 = arith.constant 0 : i32
    %c0_i32_1 = arith.constant 0 : i32
    return %c0_i32, %c0_i32_0 : i32, i32
  }
  func.func @transform_6(%arg0: i32) -> (i32, i32) {
    %c0_i32 = arith.constant 0 : i32
    %c0_i32_0 = arith.constant 0 : i32
    %c0_i32_1 = arith.constant 0 : i32
    return %c0_i32, %c0_i32_0 : i32, i32
  }
  func.func @transform_7(%arg0: i32) -> (i32, i32) {
    %c0_i32 = arith.constant 0 : i32
    %c0_i32_0 = arith.constant 0 : i32
    return %arg0, %c0_i32 : i32, i32
  }
}

module attributes {stable_mosaic.version = 11 : i64} {
  func.func @_cross_attn_kernel(%arg0: i32, %arg1: i32, %arg2: memref<1x8x32xf32, #tpu.memory_space<vmem>>, %arg3: memref<1x16x32xf32, #tpu.memory_space<vmem>>, %arg4: memref<32x32xf32, #tpu.memory_space<vmem>>, %arg5: memref<1x32xf32, #tpu.memory_space<vmem>>, %arg6: memref<32x64xf32, #tpu.memory_space<vmem>>, %arg7: memref<1x64xf32, #tpu.memory_space<vmem>>, %arg8: memref<32x32xf32, #tpu.memory_space<vmem>>, %arg9: memref<1x32xf32, #tpu.memory_space<vmem>>, %arg10: memref<1x32xf32, #tpu.memory_space<vmem>>, %arg11: memref<1x32xf32, #tpu.memory_space<vmem>>, %arg12: memref<1x8x32xf32, #tpu.memory_space<vmem>>, %arg13: memref<8x32xf32, #tpu.memory_space<vmem>>) attributes {dimension_semantics = [#tpu.dimension_semantics<parallel>, #tpu.dimension_semantics<parallel>], iteration_bounds = array<i64: 2, 1>, scalar_prefetch = 0 : i64, scratch_operands = 1 : i64, tpu.core_type = #tpu.core_type<tc>, window_params = [{transform_indices = @transform_0, window_bounds = array<i64: 1, 8, 32>}, {transform_indices = @transform_1, window_bounds = array<i64: 1, 16, 32>}, {pipeline_mode = #tpu.pipeline_mode<synchronous>, transform_indices = @transform_2, window_bounds = array<i64: 32, 32>}, {pipeline_mode = #tpu.pipeline_mode<synchronous>, transform_indices = @transform_3, window_bounds = array<i64: 1, 32>}, {pipeline_mode = #tpu.pipeline_mode<synchronous>, transform_indices = @transform_4, window_bounds = array<i64: 32, 64>}, {pipeline_mode = #tpu.pipeline_mode<synchronous>, transform_indices = @transform_5, window_bounds = array<i64: 1, 64>}, {pipeline_mode = #tpu.pipeline_mode<synchronous>, transform_indices = @transform_6, window_bounds = array<i64: 32, 32>}, {pipeline_mode = #tpu.pipeline_mode<synchronous>, transform_indices = @transform_7, window_bounds = array<i64: 1, 32>}, {pipeline_mode = #tpu.pipeline_mode<synchronous>, transform_indices = @transform_8, window_bounds = array<i64: 1, 32>}, {pipeline_mode = #tpu.pipeline_mode<synchronous>, transform_indices = @transform_9, window_bounds = array<i64: 1, 32>}, {transform_indices = @transform_10, window_bounds = array<i64: 1, 8, 32>}]} {
    %c0 = arith.constant 0 : index
    %c0_0 = arith.constant 0 : index
    %c0_1 = arith.constant 0 : index
    %0 = vector.load %arg2[%c0, %c0_0, %c0_1] : memref<1x8x32xf32, #tpu.memory_space<vmem>>, vector<1x8x32xf32>
    %1 = vector.shape_cast %0 : vector<1x8x32xf32> to vector<8x32xf32>
    %c0_2 = arith.constant 0 : index
    %c0_3 = arith.constant 0 : index
    %c0_4 = arith.constant 0 : index
    %2 = vector.load %arg3[%c0_2, %c0_3, %c0_4] : memref<1x16x32xf32, #tpu.memory_space<vmem>>, vector<1x16x32xf32>
    %3 = vector.shape_cast %2 : vector<1x16x32xf32> to vector<16x32xf32>
    %c0_5 = arith.constant 0 : index
    %c0_6 = arith.constant 0 : index
    %4 = vector.load %arg4[%c0_5, %c0_6] : memref<32x32xf32, #tpu.memory_space<vmem>>, vector<32x32xf32>
    %cst = arith.constant dense<0.000000e+00> : vector<8x32xf32>
    %5 = tpu.matmul %1, %4, %cst {dimension_numbers = #tpu.dot_dimension_numbers<[1], [0], [0], [1], [0, 0, 1, 1], [], []>} : vector<8x32xf32>, vector<32x32xf32>, vector<8x32xf32> -> vector<8x32xf32>
    %c0_7 = arith.constant 0 : index
    %c0_8 = arith.constant 0 : index
    %6 = vector.load %arg5[%c0_7, %c0_8] : memref<1x32xf32, #tpu.memory_space<vmem>>, vector<1x32xf32>
    %7 = vector.broadcast %6 : vector<1x32xf32> to vector<8x32xf32>
    %8 = arith.addf %5, %7 : vector<8x32xf32>
    %c0_9 = arith.constant 0 : index
    %c0_10 = arith.constant 0 : index
    %9 = vector.load %arg6[%c0_9, %c0_10] : memref<32x64xf32, #tpu.memory_space<vmem>>, vector<32x64xf32>
    %cst_11 = arith.constant dense<0.000000e+00> : vector<16x64xf32>
    %10 = tpu.matmul %3, %9, %cst_11 {dimension_numbers = #tpu.dot_dimension_numbers<[1], [0], [0], [1], [0, 0, 1, 1], [], []>} : vector<16x32xf32>, vector<32x64xf32>, vector<16x64xf32> -> vector<16x64xf32>
    %c0_12 = arith.constant 0 : index
    %c0_13 = arith.constant 0 : index
    %11 = vector.load %arg7[%c0_12, %c0_13] : memref<1x64xf32, #tpu.memory_space<vmem>>, vector<1x64xf32>
    %12 = vector.broadcast %11 : vector<1x64xf32> to vector<16x64xf32>
    %13 = arith.addf %10, %12 : vector<16x64xf32>
    %14 = vector.extract_strided_slice %13 {offsets = [0, 0], sizes = [16, 32], strides = [1, 1]} : vector<16x64xf32> to vector<16x32xf32>
    %15 = vector.extract_strided_slice %13 {offsets = [0, 32], sizes = [16, 32], strides = [1, 1]} : vector<16x64xf32> to vector<16x32xf32>
    %16 = vector.extract_strided_slice %8 {offsets = [0, 0], sizes = [8, 8], strides = [1, 1]} : vector<8x32xf32> to vector<8x8xf32>
    %17 = vector.extract_strided_slice %14 {offsets = [0, 0], sizes = [16, 8], strides = [1, 1]} : vector<16x32xf32> to vector<16x8xf32>
    %cst_14 = arith.constant dense<0.000000e+00> : vector<8x16xf32>
    %18 = tpu.matmul %16, %17, %cst_14 {dimension_numbers = #tpu.dot_dimension_numbers<[1], [1], [0], [0], [0, 0, 1, 0], [], []>} : vector<8x8xf32>, vector<16x8xf32>, vector<8x16xf32> -> vector<8x16xf32>
    %cst_15 = arith.constant dense<0xFF800000> : vector<8xf32>
    %19 = vector.multi_reduction <maximumf>, %18, %cst_15 [1] : vector<8x16xf32> to vector<8xf32>
    %20 = vector.shape_cast %19 : vector<8xf32> to vector<8x1xf32>
    %21 = vector.broadcast %20 : vector<8x1xf32> to vector<8x16xf32>
    %22 = arith.subf %18, %21 : vector<8x16xf32>
    %23 = math.exp %22 : vector<8x16xf32>
    %cst_16 = arith.constant dense<0.000000e+00> : vector<8xf32>
    %24 = vector.multi_reduction <add>, %23, %cst_16 [1] : vector<8x16xf32> to vector<8xf32>
    %25 = vector.shape_cast %24 : vector<8xf32> to vector<8x1xf32>
    %26 = tpu.reciprocal %25 : vector<8x1xf32> -> vector<8x1xf32>
    %27 = vector.broadcast %26 : vector<8x1xf32> to vector<8x16xf32>
    %28 = arith.mulf %23, %27 : vector<8x16xf32>
    %29 = vector.extract_strided_slice %15 {offsets = [0, 0], sizes = [16, 8], strides = [1, 1]} : vector<16x32xf32> to vector<16x8xf32>
    %cst_17 = arith.constant dense<0.000000e+00> : vector<8x8xf32>
    %30 = tpu.matmul %28, %29, %cst_17 {dimension_numbers = #tpu.dot_dimension_numbers<[1], [0], [0], [1], [0, 0, 1, 1], [], []>} : vector<8x16xf32>, vector<16x8xf32>, vector<8x8xf32> -> vector<8x8xf32>
    %c0_18 = arith.constant 0 : index
    %c0_19 = arith.constant 0 : index
    %31 = vector.load %arg13[%c0_18, %c0_19] : memref<8x32xf32, #tpu.memory_space<vmem>>, vector<8x8xf32>
    tpu.vector_store %arg13[%c0_18, %c0_19], %30 {strides = array<i32>} : memref<8x32xf32, #tpu.memory_space<vmem>>, vector<8x8xf32>,
    %32 = vector.extract_strided_slice %8 {offsets = [0, 8], sizes = [8, 8], strides = [1, 1]} : vector<8x32xf32> to vector<8x8xf32>
    %33 = vector.extract_strided_slice %14 {offsets = [0, 8], sizes = [16, 8], strides = [1, 1]} : vector<16x32xf32> to vector<16x8xf32>
    %cst_20 = arith.constant dense<0.000000e+00> : vector<8x16xf32>
    %34 = tpu.matmul %32, %33, %cst_20 {dimension_numbers = #tpu.dot_dimension_numbers<[1], [1], [0], [0], [0, 0, 1, 0], [], []>} : vector<8x8xf32>, vector<16x8xf32>, vector<8x16xf32> -> vector<8x16xf32>
    %cst_21 = arith.constant dense<0xFF800000> : vector<8xf32>
    %35 = vector.multi_reduction <maximumf>, %34, %cst_21 [1] : vector<8x16xf32> to vector<8xf32>
    %36 = vector.shape_cast %35 : vector<8xf32> to vector<8x1xf32>
    %37 = vector.broadcast %36 : vector<8x1xf32> to vector<8x16xf32>
    %38 = arith.subf %34, %37 : vector<8x16xf32>
    %39 = math.exp %38 : vector<8x16xf32>
    %cst_22 = arith.constant dense<0.000000e+00> : vector<8xf32>
    %40 = vector.multi_reduction <add>, %39, %cst_22 [1] : vector<8x16xf32> to vector<8xf32>
    %41 = vector.shape_cast %40 : vector<8xf32> to vector<8x1xf32>
    %42 = tpu.reciprocal %41 : vector<8x1xf32> -> vector<8x1xf32>
    %43 = vector.broadcast %42 : vector<8x1xf32> to vector<8x16xf32>
    %44 = arith.mulf %39, %43 : vector<8x16xf32>
    %45 = vector.extract_strided_slice %15 {offsets = [0, 8], sizes = [16, 8], strides = [1, 1]} : vector<16x32xf32> to vector<16x8xf32>
    %cst_23 = arith.constant dense<0.000000e+00> : vector<8x8xf32>
    %46 = tpu.matmul %44, %45, %cst_23 {dimension_numbers = #tpu.dot_dimension_numbers<[1], [0], [0], [1], [0, 0, 1, 1], [], []>} : vector<8x16xf32>, vector<16x8xf32>, vector<8x8xf32> -> vector<8x8xf32>
    %c0_24 = arith.constant 0 : index
    %c8 = arith.constant 8 : index
    %47 = vector.load %arg13[%c0_24, %c8] : memref<8x32xf32, #tpu.memory_space<vmem>>, vector<8x8xf32>
    tpu.vector_store %arg13[%c0_24, %c8], %46 {strides = array<i32>} : memref<8x32xf32, #tpu.memory_space<vmem>>, vector<8x8xf32>,
    %48 = vector.extract_strided_slice %8 {offsets = [0, 16], sizes = [8, 8], strides = [1, 1]} : vector<8x32xf32> to vector<8x8xf32>
    %49 = vector.extract_strided_slice %14 {offsets = [0, 16], sizes = [16, 8], strides = [1, 1]} : vector<16x32xf32> to vector<16x8xf32>
    %cst_25 = arith.constant dense<0.000000e+00> : vector<8x16xf32>
    %50 = tpu.matmul %48, %49, %cst_25 {dimension_numbers = #tpu.dot_dimension_numbers<[1], [1], [0], [0], [0, 0, 1, 0], [], []>} : vector<8x8xf32>, vector<16x8xf32>, vector<8x16xf32> -> vector<8x16xf32>
    %cst_26 = arith.constant dense<0xFF800000> : vector<8xf32>
    %51 = vector.multi_reduction <maximumf>, %50, %cst_26 [1] : vector<8x16xf32> to vector<8xf32>
    %52 = vector.shape_cast %51 : vector<8xf32> to vector<8x1xf32>
    %53 = vector.broadcast %52 : vector<8x1xf32> to vector<8x16xf32>
    %54 = arith.subf %50, %53 : vector<8x16xf32>
    %55 = math.exp %54 : vector<8x16xf32>
    %cst_27 = arith.constant dense<0.000000e+00> : vector<8xf32>
    %56 = vector.multi_reduction <add>, %55, %cst_27 [1] : vector<8x16xf32> to vector<8xf32>
    %57 = vector.shape_cast %56 : vector<8xf32> to vector<8x1xf32>
    %58 = tpu.reciprocal %57 : vector<8x1xf32> -> vector<8x1xf32>
    %59 = vector.broadcast %58 : vector<8x1xf32> to vector<8x16xf32>
    %60 = arith.mulf %55, %59 : vector<8x16xf32>
    %61 = vector.extract_strided_slice %15 {offsets = [0, 16], sizes = [16, 8], strides = [1, 1]} : vector<16x32xf32> to vector<16x8xf32>
    %cst_28 = arith.constant dense<0.000000e+00> : vector<8x8xf32>
    %62 = tpu.matmul %60, %61, %cst_28 {dimension_numbers = #tpu.dot_dimension_numbers<[1], [0], [0], [1], [0, 0, 1, 1], [], []>} : vector<8x16xf32>, vector<16x8xf32>, vector<8x8xf32> -> vector<8x8xf32>
    %c0_29 = arith.constant 0 : index
    %c16 = arith.constant 16 : index
    %63 = vector.load %arg13[%c0_29, %c16] : memref<8x32xf32, #tpu.memory_space<vmem>>, vector<8x8xf32>
    tpu.vector_store %arg13[%c0_29, %c16], %62 {strides = array<i32>} : memref<8x32xf32, #tpu.memory_space<vmem>>, vector<8x8xf32>,
    %64 = vector.extract_strided_slice %8 {offsets = [0, 24], sizes = [8, 8], strides = [1, 1]} : vector<8x32xf32> to vector<8x8xf32>
    %65 = vector.extract_strided_slice %14 {offsets = [0, 24], sizes = [16, 8], strides = [1, 1]} : vector<16x32xf32> to vector<16x8xf32>
    %cst_30 = arith.constant dense<0.000000e+00> : vector<8x16xf32>
    %66 = tpu.matmul %64, %65, %cst_30 {dimension_numbers = #tpu.dot_dimension_numbers<[1], [1], [0], [0], [0, 0, 1, 0], [], []>} : vector<8x8xf32>, vector<16x8xf32>, vector<8x16xf32> -> vector<8x16xf32>
    %cst_31 = arith.constant dense<0xFF800000> : vector<8xf32>
    %67 = vector.multi_reduction <maximumf>, %66, %cst_31 [1] : vector<8x16xf32> to vector<8xf32>
    %68 = vector.shape_cast %67 : vector<8xf32> to vector<8x1xf32>
    %69 = vector.broadcast %68 : vector<8x1xf32> to vector<8x16xf32>
    %70 = arith.subf %66, %69 : vector<8x16xf32>
    %71 = math.exp %70 : vector<8x16xf32>
    %cst_32 = arith.constant dense<0.000000e+00> : vector<8xf32>
    %72 = vector.multi_reduction <add>, %71, %cst_32 [1] : vector<8x16xf32> to vector<8xf32>
    %73 = vector.shape_cast %72 : vector<8xf32> to vector<8x1xf32>
    %74 = tpu.reciprocal %73 : vector<8x1xf32> -> vector<8x1xf32>
    %75 = vector.broadcast %74 : vector<8x1xf32> to vector<8x16xf32>
    %76 = arith.mulf %71, %75 : vector<8x16xf32>
    %77 = vector.extract_strided_slice %15 {offsets = [0, 24], sizes = [16, 8], strides = [1, 1]} : vector<16x32xf32> to vector<16x8xf32>
    %cst_33 = arith.constant dense<0.000000e+00> : vector<8x8xf32>
    %78 = tpu.matmul %76, %77, %cst_33 {dimension_numbers = #tpu.dot_dimension_numbers<[1], [0], [0], [1], [0, 0, 1, 1], [], []>} : vector<8x16xf32>, vector<16x8xf32>, vector<8x8xf32> -> vector<8x8xf32>
    %c0_34 = arith.constant 0 : index
    %c24 = arith.constant 24 : index
    %79 = vector.load %arg13[%c0_34, %c24] : memref<8x32xf32, #tpu.memory_space<vmem>>, vector<8x8xf32>
    tpu.vector_store %arg13[%c0_34, %c24], %78 {strides = array<i32>} : memref<8x32xf32, #tpu.memory_space<vmem>>, vector<8x8xf32>,
    %c0_35 = arith.constant 0 : index
    %c0_36 = arith.constant 0 : index
    %80 = vector.load %arg13[%c0_35, %c0_36] : memref<8x32xf32, #tpu.memory_space<vmem>>, vector<8x32xf32>
    %c0_37 = arith.constant 0 : index
    %c0_38 = arith.constant 0 : index
    %81 = vector.load %arg8[%c0_37, %c0_38] : memref<32x32xf32, #tpu.memory_space<vmem>>, vector<32x32xf32>
    %cst_39 = arith.constant dense<0.000000e+00> : vector<8x32xf32>
    %82 = tpu.matmul %80, %81, %cst_39 {dimension_numbers = #tpu.dot_dimension_numbers<[1], [0], [0], [1], [0, 0, 1, 1], [], []>} : vector<8x32xf32>, vector<32x32xf32>, vector<8x32xf32> -> vector<8x32xf32>
    %c0_40 = arith.constant 0 : index
    %c0_41 = arith.constant 0 : index
    %83 = vector.load %arg9[%c0_40, %c0_41] : memref<1x32xf32, #tpu.memory_space<vmem>>, vector<1x32xf32>
    %84 = vector.broadcast %83 : vector<1x32xf32> to vector<8x32xf32>
    %85 = arith.addf %82, %84 : vector<8x32xf32>
    %86 = arith.addf %1, %85 : vector<8x32xf32>
    %c0_42 = arith.constant 0 : index
    %c0_43 = arith.constant 0 : index
    %87 = vector.load %arg10[%c0_42, %c0_43] : memref<1x32xf32, #tpu.memory_space<vmem>>, vector<1x32xf32>
    %c0_44 = arith.constant 0 : index
    %c0_45 = arith.constant 0 : index
    %88 = vector.load %arg11[%c0_44, %c0_45] : memref<1x32xf32, #tpu.memory_space<vmem>>, vector<1x32xf32>
    %cst_46 = arith.constant dense<0.000000e+00> : vector<8xf32>
    %89 = vector.multi_reduction <add>, %86, %cst_46 [1] : vector<8x32xf32> to vector<8xf32>
    %90 = vector.shape_cast %89 : vector<8xf32> to vector<8x1xf32>
    %cst_47 = arith.constant 3.200000e+01 : f32
    %91 = vector.broadcast %cst_47 : f32 to vector<8x1xf32>
    %92 = arith.divf %90, %91 : vector<8x1xf32>
    %93 = vector.broadcast %92 : vector<8x1xf32> to vector<8x32xf32>
    %94 = arith.subf %86, %93 : vector<8x32xf32>
    %95 = arith.mulf %94, %94 : vector<8x32xf32>
    %cst_48 = arith.constant dense<0.000000e+00> : vector<8xf32>
    %96 = vector.multi_reduction <add>, %95, %cst_48 [1] : vector<8x32xf32> to vector<8xf32>
    %97 = vector.shape_cast %96 : vector<8xf32> to vector<8x1xf32>
    %cst_49 = arith.constant 3.200000e+01 : f32
    %98 = vector.broadcast %cst_49 : f32 to vector<8x1xf32>
    %99 = arith.divf %97, %98 : vector<8x1xf32>
    %cst_50 = arith.constant 9.99999974E-6 : f32
    %100 = vector.broadcast %cst_50 : f32 to vector<8x1xf32>
    %101 = arith.addf %99, %100 : vector<8x1xf32>
    %102 = math.rsqrt %101 : vector<8x1xf32>
    %103 = vector.broadcast %102 : vector<8x1xf32> to vector<8x32xf32>
    %104 = arith.mulf %94, %103 : vector<8x32xf32>
    %105 = vector.broadcast %87 : vector<1x32xf32> to vector<8x32xf32>
    %106 = arith.mulf %104, %105 : vector<8x32xf32>
    %107 = vector.broadcast %88 : vector<1x32xf32> to vector<8x32xf32>
    %108 = arith.addf %106, %107 : vector<8x32xf32>
    %c0_51 = arith.constant 0 : index
    %c0_52 = arith.constant 0 : index
    %c0_53 = arith.constant 0 : index
    %109 = vector.load %arg12[%c0_51, %c0_52, %c0_53] : memref<1x8x32xf32, #tpu.memory_space<vmem>>, vector<1x8x32xf32>
    %110 = vector.shape_cast %109 : vector<1x8x32xf32> to vector<8x32xf32>
    %111 = vector.shape_cast %108 : vector<8x32xf32> to vector<1x8x32xf32>
    tpu.vector_store %arg12[%c0_51, %c0_52, %c0_53], %111 {strides = array<i32>} : memref<1x8x32xf32, #tpu.memory_space<vmem>>, vector<1x8x32xf32>,
    return
  }
  func.func @transform_0(%arg0: i32, %arg1: i32) -> (i32, i32, i32) {
    %c0_i32 = arith.constant 0 : i32
    %c0_i32_0 = arith.constant 0 : i32
    return %arg0, %arg1, %c0_i32 : i32, i32, i32
  }
  func.func @transform_1(%arg0: i32, %arg1: i32) -> (i32, i32, i32) {
    %c0_i32 = arith.constant 0 : i32
    %c0_i32_0 = arith.constant 0 : i32
    %c0_i32_1 = arith.constant 0 : i32
    return %arg0, %c0_i32, %c0_i32_0 : i32, i32, i32
  }
  func.func @transform_2(%arg0: i32, %arg1: i32) -> (i32, i32) {
    %c0_i32 = arith.constant 0 : i32
    %c0_i32_0 = arith.constant 0 : i32
    %c0_i32_1 = arith.constant 0 : i32
    return %c0_i32, %c0_i32_0 : i32, i32
  }
  func.func @transform_3(%arg0: i32, %arg1: i32) -> (i32, i32) {
    %c0_i32 = arith.constant 0 : i32
    %c0_i32_0 = arith.constant 0 : i32
    %c0_i32_1 = arith.constant 0 : i32
    return %c0_i32, %c0_i32_0 : i32, i32
  }
  func.func @transform_4(%arg0: i32, %arg1: i32) -> (i32, i32) {
    %c0_i32 = arith.constant 0 : i32
    %c0_i32_0 = arith.constant 0 : i32
    %c0_i32_1 = arith.constant 0 : i32
    return %c0_i32, %c0_i32_0 : i32, i32
  }
  func.func @transform_5(%arg0: i32, %arg1: i32) -> (i32, i32) {
    %c0_i32 = arith.constant 0 : i32
    %c0_i32_0 = arith.constant 0 : i32
    %c0_i32_1 = arith.constant 0 : i32
    return %c0_i32, %c0_i32_0 : i32, i32
  }
  func.func @transform_6(%arg0: i32, %arg1: i32) -> (i32, i32) {
    %c0_i32 = arith.constant 0 : i32
    %c0_i32_0 = arith.constant 0 : i32
    %c0_i32_1 = arith.constant 0 : i32
    return %c0_i32, %c0_i32_0 : i32, i32
  }
  func.func @transform_7(%arg0: i32, %arg1: i32) -> (i32, i32) {
    %c0_i32 = arith.constant 0 : i32
    %c0_i32_0 = arith.constant 0 : i32
    %c0_i32_1 = arith.constant 0 : i32
    return %c0_i32, %c0_i32_0 : i32, i32
  }
  func.func @transform_8(%arg0: i32, %arg1: i32) -> (i32, i32) {
    %c0_i32 = arith.constant 0 : i32
    %c0_i32_0 = arith.constant 0 : i32
    %c0_i32_1 = arith.constant 0 : i32
    return %c0_i32, %c0_i32_0 : i32, i32
  }
  func.func @transform_9(%arg0: i32, %arg1: i32) -> (i32, i32) {
    %c0_i32 = arith.constant 0 : i32
    %c0_i32_0 = arith.constant 0 : i32
    %c0_i32_1 = arith.constant 0 : i32
    return %c0_i32, %c0_i32_0 : i32, i32
  }
  func.func @transform_10(%arg0: i32, %arg1: i32) -> (i32, i32, i32) {
    %c0_i32 = arith.constant 0 : i32
    %c0_i32_0 = arith.constant 0 : i32
    return %arg0, %arg1, %c0_i32 : i32, i32, i32
  }
}

module attributes {stable_mosaic.version = 11 : i64} {
  func.func @_self_attn_kernel(%arg0: i32, %arg1: i32, %arg2: memref<1x8x32xf32, #tpu.memory_space<vmem>>, %arg3: memref<32x32xf32, #tpu.memory_space<vmem>>, %arg4: memref<1x32xf32, #tpu.memory_space<vmem>>, %arg5: memref<32x64xf32, #tpu.memory_space<vmem>>, %arg6: memref<1x64xf32, #tpu.memory_space<vmem>>, %arg7: memref<32x32xf32, #tpu.memory_space<vmem>>, %arg8: memref<1x32xf32, #tpu.memory_space<vmem>>, %arg9: memref<1x32xf32, #tpu.memory_space<vmem>>, %arg10: memref<1x32xf32, #tpu.memory_space<vmem>>, %arg11: memref<1x8x32xf32, #tpu.memory_space<vmem>>, %arg12: memref<8x32xf32, #tpu.memory_space<vmem>>) attributes {dimension_semantics = [#tpu.dimension_semantics<parallel>, #tpu.dimension_semantics<parallel>], iteration_bounds = array<i64: 2, 1>, scalar_prefetch = 0 : i64, scratch_operands = 1 : i64, tpu.core_type = #tpu.core_type<tc>, window_params = [{transform_indices = @transform_0, window_bounds = array<i64: 1, 8, 32>}, {pipeline_mode = #tpu.pipeline_mode<synchronous>, transform_indices = @transform_1, window_bounds = array<i64: 32, 32>}, {pipeline_mode = #tpu.pipeline_mode<synchronous>, transform_indices = @transform_2, window_bounds = array<i64: 1, 32>}, {pipeline_mode = #tpu.pipeline_mode<synchronous>, transform_indices = @transform_3, window_bounds = array<i64: 32, 64>}, {pipeline_mode = #tpu.pipeline_mode<synchronous>, transform_indices = @transform_4, window_bounds = array<i64: 1, 64>}, {pipeline_mode = #tpu.pipeline_mode<synchronous>, transform_indices = @transform_5, window_bounds = array<i64: 32, 32>}, {pipeline_mode = #tpu.pipeline_mode<synchronous>, transform_indices = @transform_6, window_bounds = array<i64: 1, 32>}, {pipeline_mode = #tpu.pipeline_mode<synchronous>, transform_indices = @transform_7, window_bounds = array<i64: 1, 32>}, {pipeline_mode = #tpu.pipeline_mode<synchronous>, transform_indices = @transform_8, window_bounds = array<i64: 1, 32>}, {transform_indices = @transform_9, window_bounds = array<i64: 1, 8, 32>}]} {
    %c0 = arith.constant 0 : index
    %c0_0 = arith.constant 0 : index
    %c0_1 = arith.constant 0 : index
    %0 = vector.load %arg2[%c0, %c0_0, %c0_1] : memref<1x8x32xf32, #tpu.memory_space<vmem>>, vector<1x8x32xf32>
    %1 = vector.shape_cast %0 : vector<1x8x32xf32> to vector<8x32xf32>
    %c8_i32 = arith.constant 8 : i32
    %2 = arith.muli %arg1, %c8_i32 : i32
    %3 = tpu.assume_multiple %2, 8 : i32
    %c0_2 = arith.constant 0 : index
    %4 = arith.index_cast %3 : i32 to index
    %c0_3 = arith.constant 0 : index
    %5 = vector.load %arg2[%c0_2, %4, %c0_3] : memref<1x8x32xf32, #tpu.memory_space<vmem>>, vector<1x8x32xf32>
    %6 = vector.shape_cast %5 : vector<1x8x32xf32> to vector<8x32xf32>
    %c0_4 = arith.constant 0 : index
    %c0_5 = arith.constant 0 : index
    %7 = vector.load %arg3[%c0_4, %c0_5] : memref<32x32xf32, #tpu.memory_space<vmem>>, vector<32x32xf32>
    %cst = arith.constant dense<0.000000e+00> : vector<8x32xf32>
    %8 = tpu.matmul %6, %7, %cst {dimension_numbers = #tpu.dot_dimension_numbers<[1], [0], [0], [1], [0, 0, 1, 1], [], []>} : vector<8x32xf32>, vector<32x32xf32>, vector<8x32xf32> -> vector<8x32xf32>
    %c0_6 = arith.constant 0 : index
    %c0_7 = arith.constant 0 : index
    %9 = vector.load %arg4[%c0_6, %c0_7] : memref<1x32xf32, #tpu.memory_space<vmem>>, vector<1x32xf32>
    %10 = vector.broadcast %9 : vector<1x32xf32> to vector<8x32xf32>
    %11 = arith.addf %8, %10 : vector<8x32xf32>
    %c0_8 = arith.constant 0 : index
    %c0_9 = arith.constant 0 : index
    %12 = vector.load %arg5[%c0_8, %c0_9] : memref<32x64xf32, #tpu.memory_space<vmem>>, vector<32x64xf32>
    %cst_10 = arith.constant dense<0.000000e+00> : vector<8x64xf32>
    %13 = tpu.matmul %1, %12, %cst_10 {dimension_numbers = #tpu.dot_dimension_numbers<[1], [0], [0], [1], [0, 0, 1, 1], [], []>} : vector<8x32xf32>, vector<32x64xf32>, vector<8x64xf32> -> vector<8x64xf32>
    %c0_11 = arith.constant 0 : index
    %c0_12 = arith.constant 0 : index
    %14 = vector.load %arg6[%c0_11, %c0_12] : memref<1x64xf32, #tpu.memory_space<vmem>>, vector<1x64xf32>
    %15 = vector.broadcast %14 : vector<1x64xf32> to vector<8x64xf32>
    %16 = arith.addf %13, %15 : vector<8x64xf32>
    %17 = vector.extract_strided_slice %16 {offsets = [0, 0], sizes = [8, 32], strides = [1, 1]} : vector<8x64xf32> to vector<8x32xf32>
    %18 = vector.extract_strided_slice %16 {offsets = [0, 32], sizes = [8, 32], strides = [1, 1]} : vector<8x64xf32> to vector<8x32xf32>
    %19 = vector.extract_strided_slice %11 {offsets = [0, 0], sizes = [8, 8], strides = [1, 1]} : vector<8x32xf32> to vector<8x8xf32>
    %20 = vector.extract_strided_slice %17 {offsets = [0, 0], sizes = [8, 8], strides = [1, 1]} : vector<8x32xf32> to vector<8x8xf32>
    %cst_13 = arith.constant dense<0.000000e+00> : vector<8x8xf32>
    %21 = tpu.matmul %19, %20, %cst_13 {dimension_numbers = #tpu.dot_dimension_numbers<[1], [1], [0], [0], [0, 0, 1, 0], [], []>} : vector<8x8xf32>, vector<8x8xf32>, vector<8x8xf32> -> vector<8x8xf32>
    %cst_14 = arith.constant dense<0xFF800000> : vector<8xf32>
    %22 = vector.multi_reduction <maximumf>, %21, %cst_14 [1] : vector<8x8xf32> to vector<8xf32>
    %23 = vector.shape_cast %22 : vector<8xf32> to vector<8x1xf32>
    %24 = vector.broadcast %23 : vector<8x1xf32> to vector<8x8xf32>
    %25 = arith.subf %21, %24 : vector<8x8xf32>
    %26 = math.exp %25 : vector<8x8xf32>
    %cst_15 = arith.constant dense<0.000000e+00> : vector<8xf32>
    %27 = vector.multi_reduction <add>, %26, %cst_15 [1] : vector<8x8xf32> to vector<8xf32>
    %28 = vector.shape_cast %27 : vector<8xf32> to vector<8x1xf32>
    %29 = tpu.reciprocal %28 : vector<8x1xf32> -> vector<8x1xf32>
    %30 = vector.broadcast %29 : vector<8x1xf32> to vector<8x8xf32>
    %31 = arith.mulf %26, %30 : vector<8x8xf32>
    %32 = vector.extract_strided_slice %18 {offsets = [0, 0], sizes = [8, 8], strides = [1, 1]} : vector<8x32xf32> to vector<8x8xf32>
    %cst_16 = arith.constant dense<0.000000e+00> : vector<8x8xf32>
    %33 = tpu.matmul %31, %32, %cst_16 {dimension_numbers = #tpu.dot_dimension_numbers<[1], [0], [0], [1], [0, 0, 1, 1], [], []>} : vector<8x8xf32>, vector<8x8xf32>, vector<8x8xf32> -> vector<8x8xf32>
    %c0_17 = arith.constant 0 : index
    %c0_18 = arith.constant 0 : index
    %34 = vector.load %arg12[%c0_17, %c0_18] : memref<8x32xf32, #tpu.memory_space<vmem>>, vector<8x8xf32>
    tpu.vector_store %arg12[%c0_17, %c0_18], %33 {strides = array<i32>} : memref<8x32xf32, #tpu.memory_space<vmem>>, vector<8x8xf32>,
    %35 = vector.extract_strided_slice %11 {offsets = [0, 8], sizes = [8, 8], strides = [1, 1]} : vector<8x32xf32> to vector<8x8xf32>
    %36 = vector.extract_strided_slice %17 {offsets = [0, 8], sizes = [8, 8], strides = [1, 1]} : vector<8x32xf32> to vector<8x8xf32>
    %cst_19 = arith.constant dense<0.000000e+00> : vector<8x8xf32>
    %37 = tpu.matmul %35, %36, %cst_19 {dimension_numbers = #tpu.dot_dimension_numbers<[1], [1], [0], [0], [0, 0, 1, 0], [], []>} : vector<8x8xf32>, vector<8x8xf32>, vector<8x8xf32> -> vector<8x8xf32>
    %cst_20 = arith.constant dense<0xFF800000> : vector<8xf32>
    %38 = vector.multi_reduction <maximumf>, %37, %cst_20 [1] : vector<8x8xf32> to vector<8xf32>
    %39 = vector.shape_cast %38 : vector<8xf32> to vector<8x1xf32>
    %40 = vector.broadcast %39 : vector<8x1xf32> to vector<8x8xf32>
    %41 = arith.subf %37, %40 : vector<8x8xf32>
    %42 = math.exp %41 : vector<8x8xf32>
    %cst_21 = arith.constant dense<0.000000e+00> : vector<8xf32>
    %43 = vector.multi_reduction <add>, %42, %cst_21 [1] : vector<8x8xf32> to vector<8xf32>
    %44 = vector.shape_cast %43 : vector<8xf32> to vector<8x1xf32>
    %45 = tpu.reciprocal %44 : vector<8x1xf32> -> vector<8x1xf32>
    %46 = vector.broadcast %45 : vector<8x1xf32> to vector<8x8xf32>
    %47 = arith.mulf %42, %46 : vector<8x8xf32>
    %48 = vector.extract_strided_slice %18 {offsets = [0, 8], sizes = [8, 8], strides = [1, 1]} : vector<8x32xf32> to vector<8x8xf32>
    %cst_22 = arith.constant dense<0.000000e+00> : vector<8x8xf32>
    %49 = tpu.matmul %47, %48, %cst_22 {dimension_numbers = #tpu.dot_dimension_numbers<[1], [0], [0], [1], [0, 0, 1, 1], [], []>} : vector<8x8xf32>, vector<8x8xf32>, vector<8x8xf32> -> vector<8x8xf32>
    %c0_23 = arith.constant 0 : index
    %c8 = arith.constant 8 : index
    %50 = vector.load %arg12[%c0_23, %c8] : memref<8x32xf32, #tpu.memory_space<vmem>>, vector<8x8xf32>
    tpu.vector_store %arg12[%c0_23, %c8], %49 {strides = array<i32>} : memref<8x32xf32, #tpu.memory_space<vmem>>, vector<8x8xf32>,
    %51 = vector.extract_strided_slice %11 {offsets = [0, 16], sizes = [8, 8], strides = [1, 1]} : vector<8x32xf32> to vector<8x8xf32>
    %52 = vector.extract_strided_slice %17 {offsets = [0, 16], sizes = [8, 8], strides = [1, 1]} : vector<8x32xf32> to vector<8x8xf32>
    %cst_24 = arith.constant dense<0.000000e+00> : vector<8x8xf32>
    %53 = tpu.matmul %51, %52, %cst_24 {dimension_numbers = #tpu.dot_dimension_numbers<[1], [1], [0], [0], [0, 0, 1, 0], [], []>} : vector<8x8xf32>, vector<8x8xf32>, vector<8x8xf32> -> vector<8x8xf32>
    %cst_25 = arith.constant dense<0xFF800000> : vector<8xf32>
    %54 = vector.multi_reduction <maximumf>, %53, %cst_25 [1] : vector<8x8xf32> to vector<8xf32>
    %55 = vector.shape_cast %54 : vector<8xf32> to vector<8x1xf32>
    %56 = vector.broadcast %55 : vector<8x1xf32> to vector<8x8xf32>
    %57 = arith.subf %53, %56 : vector<8x8xf32>
    %58 = math.exp %57 : vector<8x8xf32>
    %cst_26 = arith.constant dense<0.000000e+00> : vector<8xf32>
    %59 = vector.multi_reduction <add>, %58, %cst_26 [1] : vector<8x8xf32> to vector<8xf32>
    %60 = vector.shape_cast %59 : vector<8xf32> to vector<8x1xf32>
    %61 = tpu.reciprocal %60 : vector<8x1xf32> -> vector<8x1xf32>
    %62 = vector.broadcast %61 : vector<8x1xf32> to vector<8x8xf32>
    %63 = arith.mulf %58, %62 : vector<8x8xf32>
    %64 = vector.extract_strided_slice %18 {offsets = [0, 16], sizes = [8, 8], strides = [1, 1]} : vector<8x32xf32> to vector<8x8xf32>
    %cst_27 = arith.constant dense<0.000000e+00> : vector<8x8xf32>
    %65 = tpu.matmul %63, %64, %cst_27 {dimension_numbers = #tpu.dot_dimension_numbers<[1], [0], [0], [1], [0, 0, 1, 1], [], []>} : vector<8x8xf32>, vector<8x8xf32>, vector<8x8xf32> -> vector<8x8xf32>
    %c0_28 = arith.constant 0 : index
    %c16 = arith.constant 16 : index
    %66 = vector.load %arg12[%c0_28, %c16] : memref<8x32xf32, #tpu.memory_space<vmem>>, vector<8x8xf32>
    tpu.vector_store %arg12[%c0_28, %c16], %65 {strides = array<i32>} : memref<8x32xf32, #tpu.memory_space<vmem>>, vector<8x8xf32>,
    %67 = vector.extract_strided_slice %11 {offsets = [0, 24], sizes = [8, 8], strides = [1, 1]} : vector<8x32xf32> to vector<8x8xf32>
    %68 = vector.extract_strided_slice %17 {offsets = [0, 24], sizes = [8, 8], strides = [1, 1]} : vector<8x32xf32> to vector<8x8xf32>
    %cst_29 = arith.constant dense<0.000000e+00> : vector<8x8xf32>
    %69 = tpu.matmul %67, %68, %cst_29 {dimension_numbers = #tpu.dot_dimension_numbers<[1], [1], [0], [0], [0, 0, 1, 0], [], []>} : vector<8x8xf32>, vector<8x8xf32>, vector<8x8xf32> -> vector<8x8xf32>
    %cst_30 = arith.constant dense<0xFF800000> : vector<8xf32>
    %70 = vector.multi_reduction <maximumf>, %69, %cst_30 [1] : vector<8x8xf32> to vector<8xf32>
    %71 = vector.shape_cast %70 : vector<8xf32> to vector<8x1xf32>
    %72 = vector.broadcast %71 : vector<8x1xf32> to vector<8x8xf32>
    %73 = arith.subf %69, %72 : vector<8x8xf32>
    %74 = math.exp %73 : vector<8x8xf32>
    %cst_31 = arith.constant dense<0.000000e+00> : vector<8xf32>
    %75 = vector.multi_reduction <add>, %74, %cst_31 [1] : vector<8x8xf32> to vector<8xf32>
    %76 = vector.shape_cast %75 : vector<8xf32> to vector<8x1xf32>
    %77 = tpu.reciprocal %76 : vector<8x1xf32> -> vector<8x1xf32>
    %78 = vector.broadcast %77 : vector<8x1xf32> to vector<8x8xf32>
    %79 = arith.mulf %74, %78 : vector<8x8xf32>
    %80 = vector.extract_strided_slice %18 {offsets = [0, 24], sizes = [8, 8], strides = [1, 1]} : vector<8x32xf32> to vector<8x8xf32>
    %cst_32 = arith.constant dense<0.000000e+00> : vector<8x8xf32>
    %81 = tpu.matmul %79, %80, %cst_32 {dimension_numbers = #tpu.dot_dimension_numbers<[1], [0], [0], [1], [0, 0, 1, 1], [], []>} : vector<8x8xf32>, vector<8x8xf32>, vector<8x8xf32> -> vector<8x8xf32>
    %c0_33 = arith.constant 0 : index
    %c24 = arith.constant 24 : index
    %82 = vector.load %arg12[%c0_33, %c24] : memref<8x32xf32, #tpu.memory_space<vmem>>, vector<8x8xf32>
    tpu.vector_store %arg12[%c0_33, %c24], %81 {strides = array<i32>} : memref<8x32xf32, #tpu.memory_space<vmem>>, vector<8x8xf32>,
    %c0_34 = arith.constant 0 : index
    %c0_35 = arith.constant 0 : index
    %83 = vector.load %arg12[%c0_34, %c0_35] : memref<8x32xf32, #tpu.memory_space<vmem>>, vector<8x32xf32>
    %c0_36 = arith.constant 0 : index
    %c0_37 = arith.constant 0 : index
    %84 = vector.load %arg7[%c0_36, %c0_37] : memref<32x32xf32, #tpu.memory_space<vmem>>, vector<32x32xf32>
    %cst_38 = arith.constant dense<0.000000e+00> : vector<8x32xf32>
    %85 = tpu.matmul %83, %84, %cst_38 {dimension_numbers = #tpu.dot_dimension_numbers<[1], [0], [0], [1], [0, 0, 1, 1], [], []>} : vector<8x32xf32>, vector<32x32xf32>, vector<8x32xf32> -> vector<8x32xf32>
    %c0_39 = arith.constant 0 : index
    %c0_40 = arith.constant 0 : index
    %86 = vector.load %arg8[%c0_39, %c0_40] : memref<1x32xf32, #tpu.memory_space<vmem>>, vector<1x32xf32>
    %87 = vector.broadcast %86 : vector<1x32xf32> to vector<8x32xf32>
    %88 = arith.addf %85, %87 : vector<8x32xf32>
    %89 = arith.addf %6, %88 : vector<8x32xf32>
    %c0_41 = arith.constant 0 : index
    %c0_42 = arith.constant 0 : index
    %90 = vector.load %arg9[%c0_41, %c0_42] : memref<1x32xf32, #tpu.memory_space<vmem>>, vector<1x32xf32>
    %c0_43 = arith.constant 0 : index
    %c0_44 = arith.constant 0 : index
    %91 = vector.load %arg10[%c0_43, %c0_44] : memref<1x32xf32, #tpu.memory_space<vmem>>, vector<1x32xf32>
    %cst_45 = arith.constant dense<0.000000e+00> : vector<8xf32>
    %92 = vector.multi_reduction <add>, %89, %cst_45 [1] : vector<8x32xf32> to vector<8xf32>
    %93 = vector.shape_cast %92 : vector<8xf32> to vector<8x1xf32>
    %cst_46 = arith.constant 3.200000e+01 : f32
    %94 = vector.broadcast %cst_46 : f32 to vector<8x1xf32>
    %95 = arith.divf %93, %94 : vector<8x1xf32>
    %96 = vector.broadcast %95 : vector<8x1xf32> to vector<8x32xf32>
    %97 = arith.subf %89, %96 : vector<8x32xf32>
    %98 = arith.mulf %97, %97 : vector<8x32xf32>
    %cst_47 = arith.constant dense<0.000000e+00> : vector<8xf32>
    %99 = vector.multi_reduction <add>, %98, %cst_47 [1] : vector<8x32xf32> to vector<8xf32>
    %100 = vector.shape_cast %99 : vector<8xf32> to vector<8x1xf32>
    %cst_48 = arith.constant 3.200000e+01 : f32
    %101 = vector.broadcast %cst_48 : f32 to vector<8x1xf32>
    %102 = arith.divf %100, %101 : vector<8x1xf32>
    %cst_49 = arith.constant 9.99999974E-6 : f32
    %103 = vector.broadcast %cst_49 : f32 to vector<8x1xf32>
    %104 = arith.addf %102, %103 : vector<8x1xf32>
    %105 = math.rsqrt %104 : vector<8x1xf32>
    %106 = vector.broadcast %105 : vector<8x1xf32> to vector<8x32xf32>
    %107 = arith.mulf %97, %106 : vector<8x32xf32>
    %108 = vector.broadcast %90 : vector<1x32xf32> to vector<8x32xf32>
    %109 = arith.mulf %107, %108 : vector<8x32xf32>
    %110 = vector.broadcast %91 : vector<1x32xf32> to vector<8x32xf32>
    %111 = arith.addf %109, %110 : vector<8x32xf32>
    %c0_50 = arith.constant 0 : index
    %c0_51 = arith.constant 0 : index
    %c0_52 = arith.constant 0 : index
    %112 = vector.load %arg11[%c0_50, %c0_51, %c0_52] : memref<1x8x32xf32, #tpu.memory_space<vmem>>, vector<1x8x32xf32>
    %113 = vector.shape_cast %112 : vector<1x8x32xf32> to vector<8x32xf32>
    %114 = vector.shape_cast %111 : vector<8x32xf32> to vector<1x8x32xf32>
    tpu.vector_store %arg11[%c0_50, %c0_51, %c0_52], %114 {strides = array<i32>} : memref<1x8x32xf32, #tpu.memory_space<vmem>>, vector<1x8x32xf32>,
    return
  }
  func.func @transform_0(%arg0: i32, %arg1: i32) -> (i32, i32, i32) {
    %c0_i32 = arith.constant 0 : i32
    %c0_i32_0 = arith.constant 0 : i32
    %c0_i32_1 = arith.constant 0 : i32
    return %arg0, %c0_i32, %c0_i32_0 : i32, i32, i32
  }
  func.func @transform_1(%arg0: i32, %arg1: i32) -> (i32, i32) {
    %c0_i32 = arith.constant 0 : i32
    %c0_i32_0 = arith.constant 0 : i32
    %c0_i32_1 = arith.constant 0 : i32
    return %c0_i32, %c0_i32_0 : i32, i32
  }
  func.func @transform_2(%arg0: i32, %arg1: i32) -> (i32, i32) {
    %c0_i32 = arith.constant 0 : i32
    %c0_i32_0 = arith.constant 0 : i32
    %c0_i32_1 = arith.constant 0 : i32
    return %c0_i32, %c0_i32_0 : i32, i32
  }
  func.func @transform_3(%arg0: i32, %arg1: i32) -> (i32, i32) {
    %c0_i32 = arith.constant 0 : i32
    %c0_i32_0 = arith.constant 0 : i32
    %c0_i32_1 = arith.constant 0 : i32
    return %c0_i32, %c0_i32_0 : i32, i32
  }
  func.func @transform_4(%arg0: i32, %arg1: i32) -> (i32, i32) {
    %c0_i32 = arith.constant 0 : i32
    %c0_i32_0 = arith.constant 0 : i32
    %c0_i32_1 = arith.constant 0 : i32
    return %c0_i32, %c0_i32_0 : i32, i32
  }
  func.func @transform_5(%arg0: i32, %arg1: i32) -> (i32, i32) {
    %c0_i32 = arith.constant 0 : i32
    %c0_i32_0 = arith.constant 0 : i32
    %c0_i32_1 = arith.constant 0 : i32
    return %c0_i32, %c0_i32_0 : i32, i32
  }
  func.func @transform_6(%arg0: i32, %arg1: i32) -> (i32, i32) {
    %c0_i32 = arith.constant 0 : i32
    %c0_i32_0 = arith.constant 0 : i32
    %c0_i32_1 = arith.constant 0 : i32
    return %c0_i32, %c0_i32_0 : i32, i32
  }
  func.func @transform_7(%arg0: i32, %arg1: i32) -> (i32, i32) {
    %c0_i32 = arith.constant 0 : i32
    %c0_i32_0 = arith.constant 0 : i32
    %c0_i32_1 = arith.constant 0 : i32
    return %c0_i32, %c0_i32_0 : i32, i32
  }
  func.func @transform_8(%arg0: i32, %arg1: i32) -> (i32, i32) {
    %c0_i32 = arith.constant 0 : i32
    %c0_i32_0 = arith.constant 0 : i32
    %c0_i32_1 = arith.constant 0 : i32
    return %c0_i32, %c0_i32_0 : i32, i32
  }
  func.func @transform_9(%arg0: i32, %arg1: i32) -> (i32, i32, i32) {
    %c0_i32 = arith.constant 0 : i32
    %c0_i32_0 = arith.constant 0 : i32
    return %arg0, %arg1, %c0_i32 : i32, i32, i32
  }
}

module attributes {stable_mosaic.version = 11 : i64} {
  func.func @_self_attn_kernel(%arg0: i32, %arg1: i32, %arg2: memref<1x8x32xf32, #tpu.memory_space<vmem>>, %arg3: memref<32x32xf32, #tpu.memory_space<vmem>>, %arg4: memref<1x32xf32, #tpu.memory_space<vmem>>, %arg5: memref<32x64xf32, #tpu.memory_space<vmem>>, %arg6: memref<1x64xf32, #tpu.memory_space<vmem>>, %arg7: memref<32x32xf32, #tpu.memory_space<vmem>>, %arg8: memref<1x32xf32, #tpu.memory_space<vmem>>, %arg9: memref<1x32xf32, #tpu.memory_space<vmem>>, %arg10: memref<1x32xf32, #tpu.memory_space<vmem>>, %arg11: memref<1x8x32xf32, #tpu.memory_space<vmem>>, %arg12: memref<8x32xf32, #tpu.memory_space<vmem>>) attributes {dimension_semantics = [#tpu.dimension_semantics<parallel>, #tpu.dimension_semantics<parallel>], iteration_bounds = array<i64: 2, 1>, scalar_prefetch = 0 : i64, scratch_operands = 1 : i64, tpu.core_type = #tpu.core_type<tc>, window_params = [{transform_indices = @transform_0, window_bounds = array<i64: 1, 8, 32>}, {pipeline_mode = #tpu.pipeline_mode<synchronous>, transform_indices = @transform_1, window_bounds = array<i64: 32, 32>}, {pipeline_mode = #tpu.pipeline_mode<synchronous>, transform_indices = @transform_2, window_bounds = array<i64: 1, 32>}, {pipeline_mode = #tpu.pipeline_mode<synchronous>, transform_indices = @transform_3, window_bounds = array<i64: 32, 64>}, {pipeline_mode = #tpu.pipeline_mode<synchronous>, transform_indices = @transform_4, window_bounds = array<i64: 1, 64>}, {pipeline_mode = #tpu.pipeline_mode<synchronous>, transform_indices = @transform_5, window_bounds = array<i64: 32, 32>}, {pipeline_mode = #tpu.pipeline_mode<synchronous>, transform_indices = @transform_6, window_bounds = array<i64: 1, 32>}, {pipeline_mode = #tpu.pipeline_mode<synchronous>, transform_indices = @transform_7, window_bounds = array<i64: 1, 32>}, {pipeline_mode = #tpu.pipeline_mode<synchronous>, transform_indices = @transform_8, window_bounds = array<i64: 1, 32>}, {transform_indices = @transform_9, window_bounds = array<i64: 1, 8, 32>}]} {
    %c0 = arith.constant 0 : index
    %c0_0 = arith.constant 0 : index
    %c0_1 = arith.constant 0 : index
    %0 = vector.load %arg2[%c0, %c0_0, %c0_1] : memref<1x8x32xf32, #tpu.memory_space<vmem>>, vector<1x8x32xf32>
    %1 = vector.shape_cast %0 : vector<1x8x32xf32> to vector<8x32xf32>
    %c8_i32 = arith.constant 8 : i32
    %2 = arith.muli %arg1, %c8_i32 : i32
    %3 = tpu.assume_multiple %2, 8 : i32
    %c0_2 = arith.constant 0 : index
    %4 = arith.index_cast %3 : i32 to index
    %c0_3 = arith.constant 0 : index
    %5 = vector.load %arg2[%c0_2, %4, %c0_3] : memref<1x8x32xf32, #tpu.memory_space<vmem>>, vector<1x8x32xf32>
    %6 = vector.shape_cast %5 : vector<1x8x32xf32> to vector<8x32xf32>
    %c0_4 = arith.constant 0 : index
    %c0_5 = arith.constant 0 : index
    %7 = vector.load %arg3[%c0_4, %c0_5] : memref<32x32xf32, #tpu.memory_space<vmem>>, vector<32x32xf32>
    %cst = arith.constant dense<0.000000e+00> : vector<8x32xf32>
    %8 = tpu.matmul %6, %7, %cst {dimension_numbers = #tpu.dot_dimension_numbers<[1], [0], [0], [1], [0, 0, 1, 1], [], []>} : vector<8x32xf32>, vector<32x32xf32>, vector<8x32xf32> -> vector<8x32xf32>
    %c0_6 = arith.constant 0 : index
    %c0_7 = arith.constant 0 : index
    %9 = vector.load %arg4[%c0_6, %c0_7] : memref<1x32xf32, #tpu.memory_space<vmem>>, vector<1x32xf32>
    %10 = vector.broadcast %9 : vector<1x32xf32> to vector<8x32xf32>
    %11 = arith.addf %8, %10 : vector<8x32xf32>
    %c0_8 = arith.constant 0 : index
    %c0_9 = arith.constant 0 : index
    %12 = vector.load %arg5[%c0_8, %c0_9] : memref<32x64xf32, #tpu.memory_space<vmem>>, vector<32x64xf32>
    %cst_10 = arith.constant dense<0.000000e+00> : vector<8x64xf32>
    %13 = tpu.matmul %1, %12, %cst_10 {dimension_numbers = #tpu.dot_dimension_numbers<[1], [0], [0], [1], [0, 0, 1, 1], [], []>} : vector<8x32xf32>, vector<32x64xf32>, vector<8x64xf32> -> vector<8x64xf32>
    %c0_11 = arith.constant 0 : index
    %c0_12 = arith.constant 0 : index
    %14 = vector.load %arg6[%c0_11, %c0_12] : memref<1x64xf32, #tpu.memory_space<vmem>>, vector<1x64xf32>
    %15 = vector.broadcast %14 : vector<1x64xf32> to vector<8x64xf32>
    %16 = arith.addf %13, %15 : vector<8x64xf32>
    %17 = vector.extract_strided_slice %16 {offsets = [0, 0], sizes = [8, 32], strides = [1, 1]} : vector<8x64xf32> to vector<8x32xf32>
    %18 = vector.extract_strided_slice %16 {offsets = [0, 32], sizes = [8, 32], strides = [1, 1]} : vector<8x64xf32> to vector<8x32xf32>
    %19 = vector.extract_strided_slice %11 {offsets = [0, 0], sizes = [8, 8], strides = [1, 1]} : vector<8x32xf32> to vector<8x8xf32>
    %20 = vector.extract_strided_slice %17 {offsets = [0, 0], sizes = [8, 8], strides = [1, 1]} : vector<8x32xf32> to vector<8x8xf32>
    %cst_13 = arith.constant dense<0.000000e+00> : vector<8x8xf32>
    %21 = tpu.matmul %19, %20, %cst_13 {dimension_numbers = #tpu.dot_dimension_numbers<[1], [1], [0], [0], [0, 0, 1, 0], [], []>} : vector<8x8xf32>, vector<8x8xf32>, vector<8x8xf32> -> vector<8x8xf32>
    %cst_14 = arith.constant dense<0xFF800000> : vector<8xf32>
    %22 = vector.multi_reduction <maximumf>, %21, %cst_14 [1] : vector<8x8xf32> to vector<8xf32>
    %23 = vector.shape_cast %22 : vector<8xf32> to vector<8x1xf32>
    %24 = vector.broadcast %23 : vector<8x1xf32> to vector<8x8xf32>
    %25 = arith.subf %21, %24 : vector<8x8xf32>
    %26 = math.exp %25 : vector<8x8xf32>
    %cst_15 = arith.constant dense<0.000000e+00> : vector<8xf32>
    %27 = vector.multi_reduction <add>, %26, %cst_15 [1] : vector<8x8xf32> to vector<8xf32>
    %28 = vector.shape_cast %27 : vector<8xf32> to vector<8x1xf32>
    %29 = tpu.reciprocal %28 : vector<8x1xf32> -> vector<8x1xf32>
    %30 = vector.broadcast %29 : vector<8x1xf32> to vector<8x8xf32>
    %31 = arith.mulf %26, %30 : vector<8x8xf32>
    %32 = vector.extract_strided_slice %18 {offsets = [0, 0], sizes = [8, 8], strides = [1, 1]} : vector<8x32xf32> to vector<8x8xf32>
    %cst_16 = arith.constant dense<0.000000e+00> : vector<8x8xf32>
    %33 = tpu.matmul %31, %32, %cst_16 {dimension_numbers = #tpu.dot_dimension_numbers<[1], [0], [0], [1], [0, 0, 1, 1], [], []>} : vector<8x8xf32>, vector<8x8xf32>, vector<8x8xf32> -> vector<8x8xf32>
    %c0_17 = arith.constant 0 : index
    %c0_18 = arith.constant 0 : index
    %34 = vector.load %arg12[%c0_17, %c0_18] : memref<8x32xf32, #tpu.memory_space<vmem>>, vector<8x8xf32>
    tpu.vector_store %arg12[%c0_17, %c0_18], %33 {strides = array<i32>} : memref<8x32xf32, #tpu.memory_space<vmem>>, vector<8x8xf32>,
    %35 = vector.extract_strided_slice %11 {offsets = [0, 8], sizes = [8, 8], strides = [1, 1]} : vector<8x32xf32> to vector<8x8xf32>
    %36 = vector.extract_strided_slice %17 {offsets = [0, 8], sizes = [8, 8], strides = [1, 1]} : vector<8x32xf32> to vector<8x8xf32>
    %cst_19 = arith.constant dense<0.000000e+00> : vector<8x8xf32>
    %37 = tpu.matmul %35, %36, %cst_19 {dimension_numbers = #tpu.dot_dimension_numbers<[1], [1], [0], [0], [0, 0, 1, 0], [], []>} : vector<8x8xf32>, vector<8x8xf32>, vector<8x8xf32> -> vector<8x8xf32>
    %cst_20 = arith.constant dense<0xFF800000> : vector<8xf32>
    %38 = vector.multi_reduction <maximumf>, %37, %cst_20 [1] : vector<8x8xf32> to vector<8xf32>
    %39 = vector.shape_cast %38 : vector<8xf32> to vector<8x1xf32>
    %40 = vector.broadcast %39 : vector<8x1xf32> to vector<8x8xf32>
    %41 = arith.subf %37, %40 : vector<8x8xf32>
    %42 = math.exp %41 : vector<8x8xf32>
    %cst_21 = arith.constant dense<0.000000e+00> : vector<8xf32>
    %43 = vector.multi_reduction <add>, %42, %cst_21 [1] : vector<8x8xf32> to vector<8xf32>
    %44 = vector.shape_cast %43 : vector<8xf32> to vector<8x1xf32>
    %45 = tpu.reciprocal %44 : vector<8x1xf32> -> vector<8x1xf32>
    %46 = vector.broadcast %45 : vector<8x1xf32> to vector<8x8xf32>
    %47 = arith.mulf %42, %46 : vector<8x8xf32>
    %48 = vector.extract_strided_slice %18 {offsets = [0, 8], sizes = [8, 8], strides = [1, 1]} : vector<8x32xf32> to vector<8x8xf32>
    %cst_22 = arith.constant dense<0.000000e+00> : vector<8x8xf32>
    %49 = tpu.matmul %47, %48, %cst_22 {dimension_numbers = #tpu.dot_dimension_numbers<[1], [0], [0], [1], [0, 0, 1, 1], [], []>} : vector<8x8xf32>, vector<8x8xf32>, vector<8x8xf32> -> vector<8x8xf32>
    %c0_23 = arith.constant 0 : index
    %c8 = arith.constant 8 : index
    %50 = vector.load %arg12[%c0_23, %c8] : memref<8x32xf32, #tpu.memory_space<vmem>>, vector<8x8xf32>
    tpu.vector_store %arg12[%c0_23, %c8], %49 {strides = array<i32>} : memref<8x32xf32, #tpu.memory_space<vmem>>, vector<8x8xf32>,
    %51 = vector.extract_strided_slice %11 {offsets = [0, 16], sizes = [8, 8], strides = [1, 1]} : vector<8x32xf32> to vector<8x8xf32>
    %52 = vector.extract_strided_slice %17 {offsets = [0, 16], sizes = [8, 8], strides = [1, 1]} : vector<8x32xf32> to vector<8x8xf32>
    %cst_24 = arith.constant dense<0.000000e+00> : vector<8x8xf32>
    %53 = tpu.matmul %51, %52, %cst_24 {dimension_numbers = #tpu.dot_dimension_numbers<[1], [1], [0], [0], [0, 0, 1, 0], [], []>} : vector<8x8xf32>, vector<8x8xf32>, vector<8x8xf32> -> vector<8x8xf32>
    %cst_25 = arith.constant dense<0xFF800000> : vector<8xf32>
    %54 = vector.multi_reduction <maximumf>, %53, %cst_25 [1] : vector<8x8xf32> to vector<8xf32>
    %55 = vector.shape_cast %54 : vector<8xf32> to vector<8x1xf32>
    %56 = vector.broadcast %55 : vector<8x1xf32> to vector<8x8xf32>
    %57 = arith.subf %53, %56 : vector<8x8xf32>
    %58 = math.exp %57 : vector<8x8xf32>
    %cst_26 = arith.constant dense<0.000000e+00> : vector<8xf32>
    %59 = vector.multi_reduction <add>, %58, %cst_26 [1] : vector<8x8xf32> to vector<8xf32>
    %60 = vector.shape_cast %59 : vector<8xf32> to vector<8x1xf32>
    %61 = tpu.reciprocal %60 : vector<8x1xf32> -> vector<8x1xf32>
    %62 = vector.broadcast %61 : vector<8x1xf32> to vector<8x8xf32>
    %63 = arith.mulf %58, %62 : vector<8x8xf32>
    %64 = vector.extract_strided_slice %18 {offsets = [0, 16], sizes = [8, 8], strides = [1, 1]} : vector<8x32xf32> to vector<8x8xf32>
    %cst_27 = arith.constant dense<0.000000e+00> : vector<8x8xf32>
    %65 = tpu.matmul %63, %64, %cst_27 {dimension_numbers = #tpu.dot_dimension_numbers<[1], [0], [0], [1], [0, 0, 1, 1], [], []>} : vector<8x8xf32>, vector<8x8xf32>, vector<8x8xf32> -> vector<8x8xf32>
    %c0_28 = arith.constant 0 : index
    %c16 = arith.constant 16 : index
    %66 = vector.load %arg12[%c0_28, %c16] : memref<8x32xf32, #tpu.memory_space<vmem>>, vector<8x8xf32>
    tpu.vector_store %arg12[%c0_28, %c16], %65 {strides = array<i32>} : memref<8x32xf32, #tpu.memory_space<vmem>>, vector<8x8xf32>,
    %67 = vector.extract_strided_slice %11 {offsets = [0, 24], sizes = [8, 8], strides = [1, 1]} : vector<8x32xf32> to vector<8x8xf32>
    %68 = vector.extract_strided_slice %17 {offsets = [0, 24], sizes = [8, 8], strides = [1, 1]} : vector<8x32xf32> to vector<8x8xf32>
    %cst_29 = arith.constant dense<0.000000e+00> : vector<8x8xf32>
    %69 = tpu.matmul %67, %68, %cst_29 {dimension_numbers = #tpu.dot_dimension_numbers<[1], [1], [0], [0], [0, 0, 1, 0], [], []>} : vector<8x8xf32>, vector<8x8xf32>, vector<8x8xf32> -> vector<8x8xf32>
    %cst_30 = arith.constant dense<0xFF800000> : vector<8xf32>
    %70 = vector.multi_reduction <maximumf>, %69, %cst_30 [1] : vector<8x8xf32> to vector<8xf32>
    %71 = vector.shape_cast %70 : vector<8xf32> to vector<8x1xf32>
    %72 = vector.broadcast %71 : vector<8x1xf32> to vector<8x8xf32>
    %73 = arith.subf %69, %72 : vector<8x8xf32>
    %74 = math.exp %73 : vector<8x8xf32>
    %cst_31 = arith.constant dense<0.000000e+00> : vector<8xf32>
    %75 = vector.multi_reduction <add>, %74, %cst_31 [1] : vector<8x8xf32> to vector<8xf32>
    %76 = vector.shape_cast %75 : vector<8xf32> to vector<8x1xf32>
    %77 = tpu.reciprocal %76 : vector<8x1xf32> -> vector<8x1xf32>
    %78 = vector.broadcast %77 : vector<8x1xf32> to vector<8x8xf32>
    %79 = arith.mulf %74, %78 : vector<8x8xf32>
    %80 = vector.extract_strided_slice %18 {offsets = [0, 24], sizes = [8, 8], strides = [1, 1]} : vector<8x32xf32> to vector<8x8xf32>
    %cst_32 = arith.constant dense<0.000000e+00> : vector<8x8xf32>
    %81 = tpu.matmul %79, %80, %cst_32 {dimension_numbers = #tpu.dot_dimension_numbers<[1], [0], [0], [1], [0, 0, 1, 1], [], []>} : vector<8x8xf32>, vector<8x8xf32>, vector<8x8xf32> -> vector<8x8xf32>
    %c0_33 = arith.constant 0 : index
    %c24 = arith.constant 24 : index
    %82 = vector.load %arg12[%c0_33, %c24] : memref<8x32xf32, #tpu.memory_space<vmem>>, vector<8x8xf32>
    tpu.vector_store %arg12[%c0_33, %c24], %81 {strides = array<i32>} : memref<8x32xf32, #tpu.memory_space<vmem>>, vector<8x8xf32>,
    %c0_34 = arith.constant 0 : index
    %c0_35 = arith.constant 0 : index
    %83 = vector.load %arg12[%c0_34, %c0_35] : memref<8x32xf32, #tpu.memory_space<vmem>>, vector<8x32xf32>
    %c0_36 = arith.constant 0 : index
    %c0_37 = arith.constant 0 : index
    %84 = vector.load %arg7[%c0_36, %c0_37] : memref<32x32xf32, #tpu.memory_space<vmem>>, vector<32x32xf32>
    %cst_38 = arith.constant dense<0.000000e+00> : vector<8x32xf32>
    %85 = tpu.matmul %83, %84, %cst_38 {dimension_numbers = #tpu.dot_dimension_numbers<[1], [0], [0], [1], [0, 0, 1, 1], [], []>} : vector<8x32xf32>, vector<32x32xf32>, vector<8x32xf32> -> vector<8x32xf32>
    %c0_39 = arith.constant 0 : index
    %c0_40 = arith.constant 0 : index
    %86 = vector.load %arg8[%c0_39, %c0_40] : memref<1x32xf32, #tpu.memory_space<vmem>>, vector<1x32xf32>
    %87 = vector.broadcast %86 : vector<1x32xf32> to vector<8x32xf32>
    %88 = arith.addf %85, %87 : vector<8x32xf32>
    %89 = arith.addf %6, %88 : vector<8x32xf32>
    %c0_41 = arith.constant 0 : index
    %c0_42 = arith.constant 0 : index
    %90 = vector.load %arg9[%c0_41, %c0_42] : memref<1x32xf32, #tpu.memory_space<vmem>>, vector<1x32xf32>
    %c0_43 = arith.constant 0 : index
    %c0_44 = arith.constant 0 : index
    %91 = vector.load %arg10[%c0_43, %c0_44] : memref<1x32xf32, #tpu.memory_space<vmem>>, vector<1x32xf32>
    %cst_45 = arith.constant dense<0.000000e+00> : vector<8xf32>
    %92 = vector.multi_reduction <add>, %89, %cst_45 [1] : vector<8x32xf32> to vector<8xf32>
    %93 = vector.shape_cast %92 : vector<8xf32> to vector<8x1xf32>
    %cst_46 = arith.constant 3.200000e+01 : f32
    %94 = vector.broadcast %cst_46 : f32 to vector<8x1xf32>
    %95 = arith.divf %93, %94 : vector<8x1xf32>
    %96 = vector.broadcast %95 : vector<8x1xf32> to vector<8x32xf32>
    %97 = arith.subf %89, %96 : vector<8x32xf32>
    %98 = arith.mulf %97, %97 : vector<8x32xf32>
    %cst_47 = arith.constant dense<0.000000e+00> : vector<8xf32>
    %99 = vector.multi_reduction <add>, %98, %cst_47 [1] : vector<8x32xf32> to vector<8xf32>
    %100 = vector.shape_cast %99 : vector<8xf32> to vector<8x1xf32>
    %cst_48 = arith.constant 3.200000e+01 : f32
    %101 = vector.broadcast %cst_48 : f32 to vector<8x1xf32>
    %102 = arith.divf %100, %101 : vector<8x1xf32>
    %cst_49 = arith.constant 9.99999974E-6 : f32
    %103 = vector.broadcast %cst_49 : f32 to vector<8x1xf32>
    %104 = arith.addf %102, %103 : vector<8x1xf32>
    %105 = math.rsqrt %104 : vector<8x1xf32>
    %106 = vector.broadcast %105 : vector<8x1xf32> to vector<8x32xf32>
    %107 = arith.mulf %97, %106 : vector<8x32xf32>
    %108 = vector.broadcast %90 : vector<1x32xf32> to vector<8x32xf32>
    %109 = arith.mulf %107, %108 : vector<8x32xf32>
    %110 = vector.broadcast %91 : vector<1x32xf32> to vector<8x32xf32>
    %111 = arith.addf %109, %110 : vector<8x32xf32>
    %c0_50 = arith.constant 0 : index
    %c0_51 = arith.constant 0 : index
    %c0_52 = arith.constant 0 : index
    %112 = vector.load %arg11[%c0_50, %c0_51, %c0_52] : memref<1x8x32xf32, #tpu.memory_space<vmem>>, vector<1x8x32xf32>
    %113 = vector.shape_cast %112 : vector<1x8x32xf32> to vector<8x32xf32>
    %114 = vector.shape_cast %111 : vector<8x32xf32> to vector<1x8x32xf32>
    tpu.vector_store %arg11[%c0_50, %c0_51, %c0_52], %114 {strides = array<i32>} : memref<1x8x32xf32, #tpu.memory_space<vmem>>, vector<1x8x32xf32>,
    return
  }
  func.func @transform_0(%arg0: i32, %arg1: i32) -> (i32, i32, i32) {
    %c0_i32 = arith.constant 0 : i32
    %c0_i32_0 = arith.constant 0 : i32
    %c0_i32_1 = arith.constant 0 : i32
    return %arg0, %c0_i32, %c0_i32_0 : i32, i32, i32
  }
  func.func @transform_1(%arg0: i32, %arg1: i32) -> (i32, i32) {
    %c0_i32 = arith.constant 0 : i32
    %c0_i32_0 = arith.constant 0 : i32
    %c0_i32_1 = arith.constant 0 : i32
    return %c0_i32, %c0_i32_0 : i32, i32
  }
  func.func @transform_2(%arg0: i32, %arg1: i32) -> (i32, i32) {
    %c0_i32 = arith.constant 0 : i32
    %c0_i32_0 = arith.constant 0 : i32
    %c0_i32_1 = arith.constant 0 : i32
    return %c0_i32, %c0_i32_0 : i32, i32
  }
  func.func @transform_3(%arg0: i32, %arg1: i32) -> (i32, i32) {
    %c0_i32 = arith.constant 0 : i32
    %c0_i32_0 = arith.constant 0 : i32
    %c0_i32_1 = arith.constant 0 : i32
    return %c0_i32, %c0_i32_0 : i32, i32
  }
  func.func @transform_4(%arg0: i32, %arg1: i32) -> (i32, i32) {
    %c0_i32 = arith.constant 0 : i32
    %c0_i32_0 = arith.constant 0 : i32
    %c0_i32_1 = arith.constant 0 : i32
    return %c0_i32, %c0_i32_0 : i32, i32
  }
  func.func @transform_5(%arg0: i32, %arg1: i32) -> (i32, i32) {
    %c0_i32 = arith.constant 0 : i32
    %c0_i32_0 = arith.constant 0 : i32
    %c0_i32_1 = arith.constant 0 : i32
    return %c0_i32, %c0_i32_0 : i32, i32
  }
  func.func @transform_6(%arg0: i32, %arg1: i32) -> (i32, i32) {
    %c0_i32 = arith.constant 0 : i32
    %c0_i32_0 = arith.constant 0 : i32
    %c0_i32_1 = arith.constant 0 : i32
    return %c0_i32, %c0_i32_0 : i32, i32
  }
  func.func @transform_7(%arg0: i32, %arg1: i32) -> (i32, i32) {
    %c0_i32 = arith.constant 0 : i32
    %c0_i32_0 = arith.constant 0 : i32
    %c0_i32_1 = arith.constant 0 : i32
    return %c0_i32, %c0_i32_0 : i32, i32
  }
  func.func @transform_8(%arg0: i32, %arg1: i32) -> (i32, i32) {
    %c0_i32 = arith.constant 0 : i32
    %c0_i32_0 = arith.constant 0 : i32
    %c0_i32_1 = arith.constant 0 : i32
    return %c0_i32, %c0_i32_0 : i32, i32
  }
  func.func @transform_9(%arg0: i32, %arg1: i32) -> (i32, i32, i32) {
    %c0_i32 = arith.constant 0 : i32
    %c0_i32_0 = arith.constant 0 : i32
    return %arg0, %arg1, %c0_i32 : i32, i32, i32
  }
}

module attributes {stable_mosaic.version = 11 : i64} {
  func.func @_cross_attn_kernel(%arg0: i32, %arg1: i32, %arg2: memref<1x8x32xf32, #tpu.memory_space<vmem>>, %arg3: memref<1x16x32xf32, #tpu.memory_space<vmem>>, %arg4: memref<32x32xf32, #tpu.memory_space<vmem>>, %arg5: memref<1x32xf32, #tpu.memory_space<vmem>>, %arg6: memref<32x64xf32, #tpu.memory_space<vmem>>, %arg7: memref<1x64xf32, #tpu.memory_space<vmem>>, %arg8: memref<32x32xf32, #tpu.memory_space<vmem>>, %arg9: memref<1x32xf32, #tpu.memory_space<vmem>>, %arg10: memref<1x32xf32, #tpu.memory_space<vmem>>, %arg11: memref<1x32xf32, #tpu.memory_space<vmem>>, %arg12: memref<1x8x32xf32, #tpu.memory_space<vmem>>, %arg13: memref<8x32xf32, #tpu.memory_space<vmem>>) attributes {dimension_semantics = [#tpu.dimension_semantics<parallel>, #tpu.dimension_semantics<parallel>], iteration_bounds = array<i64: 2, 1>, scalar_prefetch = 0 : i64, scratch_operands = 1 : i64, tpu.core_type = #tpu.core_type<tc>, window_params = [{transform_indices = @transform_0, window_bounds = array<i64: 1, 8, 32>}, {transform_indices = @transform_1, window_bounds = array<i64: 1, 16, 32>}, {pipeline_mode = #tpu.pipeline_mode<synchronous>, transform_indices = @transform_2, window_bounds = array<i64: 32, 32>}, {pipeline_mode = #tpu.pipeline_mode<synchronous>, transform_indices = @transform_3, window_bounds = array<i64: 1, 32>}, {pipeline_mode = #tpu.pipeline_mode<synchronous>, transform_indices = @transform_4, window_bounds = array<i64: 32, 64>}, {pipeline_mode = #tpu.pipeline_mode<synchronous>, transform_indices = @transform_5, window_bounds = array<i64: 1, 64>}, {pipeline_mode = #tpu.pipeline_mode<synchronous>, transform_indices = @transform_6, window_bounds = array<i64: 32, 32>}, {pipeline_mode = #tpu.pipeline_mode<synchronous>, transform_indices = @transform_7, window_bounds = array<i64: 1, 32>}, {pipeline_mode = #tpu.pipeline_mode<synchronous>, transform_indices = @transform_8, window_bounds = array<i64: 1, 32>}, {pipeline_mode = #tpu.pipeline_mode<synchronous>, transform_indices = @transform_9, window_bounds = array<i64: 1, 32>}, {transform_indices = @transform_10, window_bounds = array<i64: 1, 8, 32>}]} {
    %c0 = arith.constant 0 : index
    %c0_0 = arith.constant 0 : index
    %c0_1 = arith.constant 0 : index
    %0 = vector.load %arg2[%c0, %c0_0, %c0_1] : memref<1x8x32xf32, #tpu.memory_space<vmem>>, vector<1x8x32xf32>
    %1 = vector.shape_cast %0 : vector<1x8x32xf32> to vector<8x32xf32>
    %c0_2 = arith.constant 0 : index
    %c0_3 = arith.constant 0 : index
    %c0_4 = arith.constant 0 : index
    %2 = vector.load %arg3[%c0_2, %c0_3, %c0_4] : memref<1x16x32xf32, #tpu.memory_space<vmem>>, vector<1x16x32xf32>
    %3 = vector.shape_cast %2 : vector<1x16x32xf32> to vector<16x32xf32>
    %c0_5 = arith.constant 0 : index
    %c0_6 = arith.constant 0 : index
    %4 = vector.load %arg4[%c0_5, %c0_6] : memref<32x32xf32, #tpu.memory_space<vmem>>, vector<32x32xf32>
    %cst = arith.constant dense<0.000000e+00> : vector<8x32xf32>
    %5 = tpu.matmul %1, %4, %cst {dimension_numbers = #tpu.dot_dimension_numbers<[1], [0], [0], [1], [0, 0, 1, 1], [], []>} : vector<8x32xf32>, vector<32x32xf32>, vector<8x32xf32> -> vector<8x32xf32>
    %c0_7 = arith.constant 0 : index
    %c0_8 = arith.constant 0 : index
    %6 = vector.load %arg5[%c0_7, %c0_8] : memref<1x32xf32, #tpu.memory_space<vmem>>, vector<1x32xf32>
    %7 = vector.broadcast %6 : vector<1x32xf32> to vector<8x32xf32>
    %8 = arith.addf %5, %7 : vector<8x32xf32>
    %c0_9 = arith.constant 0 : index
    %c0_10 = arith.constant 0 : index
    %9 = vector.load %arg6[%c0_9, %c0_10] : memref<32x64xf32, #tpu.memory_space<vmem>>, vector<32x64xf32>
    %cst_11 = arith.constant dense<0.000000e+00> : vector<16x64xf32>
    %10 = tpu.matmul %3, %9, %cst_11 {dimension_numbers = #tpu.dot_dimension_numbers<[1], [0], [0], [1], [0, 0, 1, 1], [], []>} : vector<16x32xf32>, vector<32x64xf32>, vector<16x64xf32> -> vector<16x64xf32>
    %c0_12 = arith.constant 0 : index
    %c0_13 = arith.constant 0 : index
    %11 = vector.load %arg7[%c0_12, %c0_13] : memref<1x64xf32, #tpu.memory_space<vmem>>, vector<1x64xf32>
    %12 = vector.broadcast %11 : vector<1x64xf32> to vector<16x64xf32>
    %13 = arith.addf %10, %12 : vector<16x64xf32>
    %14 = vector.extract_strided_slice %13 {offsets = [0, 0], sizes = [16, 32], strides = [1, 1]} : vector<16x64xf32> to vector<16x32xf32>
    %15 = vector.extract_strided_slice %13 {offsets = [0, 32], sizes = [16, 32], strides = [1, 1]} : vector<16x64xf32> to vector<16x32xf32>
    %16 = vector.extract_strided_slice %8 {offsets = [0, 0], sizes = [8, 8], strides = [1, 1]} : vector<8x32xf32> to vector<8x8xf32>
    %17 = vector.extract_strided_slice %14 {offsets = [0, 0], sizes = [16, 8], strides = [1, 1]} : vector<16x32xf32> to vector<16x8xf32>
    %cst_14 = arith.constant dense<0.000000e+00> : vector<8x16xf32>
    %18 = tpu.matmul %16, %17, %cst_14 {dimension_numbers = #tpu.dot_dimension_numbers<[1], [1], [0], [0], [0, 0, 1, 0], [], []>} : vector<8x8xf32>, vector<16x8xf32>, vector<8x16xf32> -> vector<8x16xf32>
    %cst_15 = arith.constant dense<0xFF800000> : vector<8xf32>
    %19 = vector.multi_reduction <maximumf>, %18, %cst_15 [1] : vector<8x16xf32> to vector<8xf32>
    %20 = vector.shape_cast %19 : vector<8xf32> to vector<8x1xf32>
    %21 = vector.broadcast %20 : vector<8x1xf32> to vector<8x16xf32>
    %22 = arith.subf %18, %21 : vector<8x16xf32>
    %23 = math.exp %22 : vector<8x16xf32>
    %cst_16 = arith.constant dense<0.000000e+00> : vector<8xf32>
    %24 = vector.multi_reduction <add>, %23, %cst_16 [1] : vector<8x16xf32> to vector<8xf32>
    %25 = vector.shape_cast %24 : vector<8xf32> to vector<8x1xf32>
    %26 = tpu.reciprocal %25 : vector<8x1xf32> -> vector<8x1xf32>
    %27 = vector.broadcast %26 : vector<8x1xf32> to vector<8x16xf32>
    %28 = arith.mulf %23, %27 : vector<8x16xf32>
    %29 = vector.extract_strided_slice %15 {offsets = [0, 0], sizes = [16, 8], strides = [1, 1]} : vector<16x32xf32> to vector<16x8xf32>
    %cst_17 = arith.constant dense<0.000000e+00> : vector<8x8xf32>
    %30 = tpu.matmul %28, %29, %cst_17 {dimension_numbers = #tpu.dot_dimension_numbers<[1], [0], [0], [1], [0, 0, 1, 1], [], []>} : vector<8x16xf32>, vector<16x8xf32>, vector<8x8xf32> -> vector<8x8xf32>
    %c0_18 = arith.constant 0 : index
    %c0_19 = arith.constant 0 : index
    %31 = vector.load %arg13[%c0_18, %c0_19] : memref<8x32xf32, #tpu.memory_space<vmem>>, vector<8x8xf32>
    tpu.vector_store %arg13[%c0_18, %c0_19], %30 {strides = array<i32>} : memref<8x32xf32, #tpu.memory_space<vmem>>, vector<8x8xf32>,
    %32 = vector.extract_strided_slice %8 {offsets = [0, 8], sizes = [8, 8], strides = [1, 1]} : vector<8x32xf32> to vector<8x8xf32>
    %33 = vector.extract_strided_slice %14 {offsets = [0, 8], sizes = [16, 8], strides = [1, 1]} : vector<16x32xf32> to vector<16x8xf32>
    %cst_20 = arith.constant dense<0.000000e+00> : vector<8x16xf32>
    %34 = tpu.matmul %32, %33, %cst_20 {dimension_numbers = #tpu.dot_dimension_numbers<[1], [1], [0], [0], [0, 0, 1, 0], [], []>} : vector<8x8xf32>, vector<16x8xf32>, vector<8x16xf32> -> vector<8x16xf32>
    %cst_21 = arith.constant dense<0xFF800000> : vector<8xf32>
    %35 = vector.multi_reduction <maximumf>, %34, %cst_21 [1] : vector<8x16xf32> to vector<8xf32>
    %36 = vector.shape_cast %35 : vector<8xf32> to vector<8x1xf32>
    %37 = vector.broadcast %36 : vector<8x1xf32> to vector<8x16xf32>
    %38 = arith.subf %34, %37 : vector<8x16xf32>
    %39 = math.exp %38 : vector<8x16xf32>
    %cst_22 = arith.constant dense<0.000000e+00> : vector<8xf32>
    %40 = vector.multi_reduction <add>, %39, %cst_22 [1] : vector<8x16xf32> to vector<8xf32>
    %41 = vector.shape_cast %40 : vector<8xf32> to vector<8x1xf32>
    %42 = tpu.reciprocal %41 : vector<8x1xf32> -> vector<8x1xf32>
    %43 = vector.broadcast %42 : vector<8x1xf32> to vector<8x16xf32>
    %44 = arith.mulf %39, %43 : vector<8x16xf32>
    %45 = vector.extract_strided_slice %15 {offsets = [0, 8], sizes = [16, 8], strides = [1, 1]} : vector<16x32xf32> to vector<16x8xf32>
    %cst_23 = arith.constant dense<0.000000e+00> : vector<8x8xf32>
    %46 = tpu.matmul %44, %45, %cst_23 {dimension_numbers = #tpu.dot_dimension_numbers<[1], [0], [0], [1], [0, 0, 1, 1], [], []>} : vector<8x16xf32>, vector<16x8xf32>, vector<8x8xf32> -> vector<8x8xf32>
    %c0_24 = arith.constant 0 : index
    %c8 = arith.constant 8 : index
    %47 = vector.load %arg13[%c0_24, %c8] : memref<8x32xf32, #tpu.memory_space<vmem>>, vector<8x8xf32>
    tpu.vector_store %arg13[%c0_24, %c8], %46 {strides = array<i32>} : memref<8x32xf32, #tpu.memory_space<vmem>>, vector<8x8xf32>,
    %48 = vector.extract_strided_slice %8 {offsets = [0, 16], sizes = [8, 8], strides = [1, 1]} : vector<8x32xf32> to vector<8x8xf32>
    %49 = vector.extract_strided_slice %14 {offsets = [0, 16], sizes = [16, 8], strides = [1, 1]} : vector<16x32xf32> to vector<16x8xf32>
    %cst_25 = arith.constant dense<0.000000e+00> : vector<8x16xf32>
    %50 = tpu.matmul %48, %49, %cst_25 {dimension_numbers = #tpu.dot_dimension_numbers<[1], [1], [0], [0], [0, 0, 1, 0], [], []>} : vector<8x8xf32>, vector<16x8xf32>, vector<8x16xf32> -> vector<8x16xf32>
    %cst_26 = arith.constant dense<0xFF800000> : vector<8xf32>
    %51 = vector.multi_reduction <maximumf>, %50, %cst_26 [1] : vector<8x16xf32> to vector<8xf32>
    %52 = vector.shape_cast %51 : vector<8xf32> to vector<8x1xf32>
    %53 = vector.broadcast %52 : vector<8x1xf32> to vector<8x16xf32>
    %54 = arith.subf %50, %53 : vector<8x16xf32>
    %55 = math.exp %54 : vector<8x16xf32>
    %cst_27 = arith.constant dense<0.000000e+00> : vector<8xf32>
    %56 = vector.multi_reduction <add>, %55, %cst_27 [1] : vector<8x16xf32> to vector<8xf32>
    %57 = vector.shape_cast %56 : vector<8xf32> to vector<8x1xf32>
    %58 = tpu.reciprocal %57 : vector<8x1xf32> -> vector<8x1xf32>
    %59 = vector.broadcast %58 : vector<8x1xf32> to vector<8x16xf32>
    %60 = arith.mulf %55, %59 : vector<8x16xf32>
    %61 = vector.extract_strided_slice %15 {offsets = [0, 16], sizes = [16, 8], strides = [1, 1]} : vector<16x32xf32> to vector<16x8xf32>
    %cst_28 = arith.constant dense<0.000000e+00> : vector<8x8xf32>
    %62 = tpu.matmul %60, %61, %cst_28 {dimension_numbers = #tpu.dot_dimension_numbers<[1], [0], [0], [1], [0, 0, 1, 1], [], []>} : vector<8x16xf32>, vector<16x8xf32>, vector<8x8xf32> -> vector<8x8xf32>
    %c0_29 = arith.constant 0 : index
    %c16 = arith.constant 16 : index
    %63 = vector.load %arg13[%c0_29, %c16] : memref<8x32xf32, #tpu.memory_space<vmem>>, vector<8x8xf32>
    tpu.vector_store %arg13[%c0_29, %c16], %62 {strides = array<i32>} : memref<8x32xf32, #tpu.memory_space<vmem>>, vector<8x8xf32>,
    %64 = vector.extract_strided_slice %8 {offsets = [0, 24], sizes = [8, 8], strides = [1, 1]} : vector<8x32xf32> to vector<8x8xf32>
    %65 = vector.extract_strided_slice %14 {offsets = [0, 24], sizes = [16, 8], strides = [1, 1]} : vector<16x32xf32> to vector<16x8xf32>
    %cst_30 = arith.constant dense<0.000000e+00> : vector<8x16xf32>
    %66 = tpu.matmul %64, %65, %cst_30 {dimension_numbers = #tpu.dot_dimension_numbers<[1], [1], [0], [0], [0, 0, 1, 0], [], []>} : vector<8x8xf32>, vector<16x8xf32>, vector<8x16xf32> -> vector<8x16xf32>
    %cst_31 = arith.constant dense<0xFF800000> : vector<8xf32>
    %67 = vector.multi_reduction <maximumf>, %66, %cst_31 [1] : vector<8x16xf32> to vector<8xf32>
    %68 = vector.shape_cast %67 : vector<8xf32> to vector<8x1xf32>
    %69 = vector.broadcast %68 : vector<8x1xf32> to vector<8x16xf32>
    %70 = arith.subf %66, %69 : vector<8x16xf32>
    %71 = math.exp %70 : vector<8x16xf32>
    %cst_32 = arith.constant dense<0.000000e+00> : vector<8xf32>
    %72 = vector.multi_reduction <add>, %71, %cst_32 [1] : vector<8x16xf32> to vector<8xf32>
    %73 = vector.shape_cast %72 : vector<8xf32> to vector<8x1xf32>
    %74 = tpu.reciprocal %73 : vector<8x1xf32> -> vector<8x1xf32>
    %75 = vector.broadcast %74 : vector<8x1xf32> to vector<8x16xf32>
    %76 = arith.mulf %71, %75 : vector<8x16xf32>
    %77 = vector.extract_strided_slice %15 {offsets = [0, 24], sizes = [16, 8], strides = [1, 1]} : vector<16x32xf32> to vector<16x8xf32>
    %cst_33 = arith.constant dense<0.000000e+00> : vector<8x8xf32>
    %78 = tpu.matmul %76, %77, %cst_33 {dimension_numbers = #tpu.dot_dimension_numbers<[1], [0], [0], [1], [0, 0, 1, 1], [], []>} : vector<8x16xf32>, vector<16x8xf32>, vector<8x8xf32> -> vector<8x8xf32>
    %c0_34 = arith.constant 0 : index
    %c24 = arith.constant 24 : index
    %79 = vector.load %arg13[%c0_34, %c24] : memref<8x32xf32, #tpu.memory_space<vmem>>, vector<8x8xf32>
    tpu.vector_store %arg13[%c0_34, %c24], %78 {strides = array<i32>} : memref<8x32xf32, #tpu.memory_space<vmem>>, vector<8x8xf32>,
    %c0_35 = arith.constant 0 : index
    %c0_36 = arith.constant 0 : index
    %80 = vector.load %arg13[%c0_35, %c0_36] : memref<8x32xf32, #tpu.memory_space<vmem>>, vector<8x32xf32>
    %c0_37 = arith.constant 0 : index
    %c0_38 = arith.constant 0 : index
    %81 = vector.load %arg8[%c0_37, %c0_38] : memref<32x32xf32, #tpu.memory_space<vmem>>, vector<32x32xf32>
    %cst_39 = arith.constant dense<0.000000e+00> : vector<8x32xf32>
    %82 = tpu.matmul %80, %81, %cst_39 {dimension_numbers = #tpu.dot_dimension_numbers<[1], [0], [0], [1], [0, 0, 1, 1], [], []>} : vector<8x32xf32>, vector<32x32xf32>, vector<8x32xf32> -> vector<8x32xf32>
    %c0_40 = arith.constant 0 : index
    %c0_41 = arith.constant 0 : index
    %83 = vector.load %arg9[%c0_40, %c0_41] : memref<1x32xf32, #tpu.memory_space<vmem>>, vector<1x32xf32>
    %84 = vector.broadcast %83 : vector<1x32xf32> to vector<8x32xf32>
    %85 = arith.addf %82, %84 : vector<8x32xf32>
    %86 = arith.addf %1, %85 : vector<8x32xf32>
    %c0_42 = arith.constant 0 : index
    %c0_43 = arith.constant 0 : index
    %87 = vector.load %arg10[%c0_42, %c0_43] : memref<1x32xf32, #tpu.memory_space<vmem>>, vector<1x32xf32>
    %c0_44 = arith.constant 0 : index
    %c0_45 = arith.constant 0 : index
    %88 = vector.load %arg11[%c0_44, %c0_45] : memref<1x32xf32, #tpu.memory_space<vmem>>, vector<1x32xf32>
    %cst_46 = arith.constant dense<0.000000e+00> : vector<8xf32>
    %89 = vector.multi_reduction <add>, %86, %cst_46 [1] : vector<8x32xf32> to vector<8xf32>
    %90 = vector.shape_cast %89 : vector<8xf32> to vector<8x1xf32>
    %cst_47 = arith.constant 3.200000e+01 : f32
    %91 = vector.broadcast %cst_47 : f32 to vector<8x1xf32>
    %92 = arith.divf %90, %91 : vector<8x1xf32>
    %93 = vector.broadcast %92 : vector<8x1xf32> to vector<8x32xf32>
    %94 = arith.subf %86, %93 : vector<8x32xf32>
    %95 = arith.mulf %94, %94 : vector<8x32xf32>
    %cst_48 = arith.constant dense<0.000000e+00> : vector<8xf32>
    %96 = vector.multi_reduction <add>, %95, %cst_48 [1] : vector<8x32xf32> to vector<8xf32>
    %97 = vector.shape_cast %96 : vector<8xf32> to vector<8x1xf32>
    %cst_49 = arith.constant 3.200000e+01 : f32
    %98 = vector.broadcast %cst_49 : f32 to vector<8x1xf32>
    %99 = arith.divf %97, %98 : vector<8x1xf32>
    %cst_50 = arith.constant 9.99999974E-6 : f32
    %100 = vector.broadcast %cst_50 : f32 to vector<8x1xf32>
    %101 = arith.addf %99, %100 : vector<8x1xf32>
    %102 = math.rsqrt %101 : vector<8x1xf32>
    %103 = vector.broadcast %102 : vector<8x1xf32> to vector<8x32xf32>
    %104 = arith.mulf %94, %103 : vector<8x32xf32>
    %105 = vector.broadcast %87 : vector<1x32xf32> to vector<8x32xf32>
    %106 = arith.mulf %104, %105 : vector<8x32xf32>
    %107 = vector.broadcast %88 : vector<1x32xf32> to vector<8x32xf32>
    %108 = arith.addf %106, %107 : vector<8x32xf32>
    %c0_51 = arith.constant 0 : index
    %c0_52 = arith.constant 0 : index
    %c0_53 = arith.constant 0 : index
    %109 = vector.load %arg12[%c0_51, %c0_52, %c0_53] : memref<1x8x32xf32, #tpu.memory_space<vmem>>, vector<1x8x32xf32>
    %110 = vector.shape_cast %109 : vector<1x8x32xf32> to vector<8x32xf32>
    %111 = vector.shape_cast %108 : vector<8x32xf32> to vector<1x8x32xf32>
    tpu.vector_store %arg12[%c0_51, %c0_52, %c0_53], %111 {strides = array<i32>} : memref<1x8x32xf32, #tpu.memory_space<vmem>>, vector<1x8x32xf32>,
    return
  }
  func.func @transform_0(%arg0: i32, %arg1: i32) -> (i32, i32, i32) {
    %c0_i32 = arith.constant 0 : i32
    %c0_i32_0 = arith.constant 0 : i32
    return %arg0, %arg1, %c0_i32 : i32, i32, i32
  }
  func.func @transform_1(%arg0: i32, %arg1: i32) -> (i32, i32, i32) {
    %c0_i32 = arith.constant 0 : i32
    %c0_i32_0 = arith.constant 0 : i32
    %c0_i32_1 = arith.constant 0 : i32
    return %arg0, %c0_i32, %c0_i32_0 : i32, i32, i32
  }
  func.func @transform_2(%arg0: i32, %arg1: i32) -> (i32, i32) {
    %c0_i32 = arith.constant 0 : i32
    %c0_i32_0 = arith.constant 0 : i32
    %c0_i32_1 = arith.constant 0 : i32
    return %c0_i32, %c0_i32_0 : i32, i32
  }
  func.func @transform_3(%arg0: i32, %arg1: i32) -> (i32, i32) {
    %c0_i32 = arith.constant 0 : i32
    %c0_i32_0 = arith.constant 0 : i32
    %c0_i32_1 = arith.constant 0 : i32
    return %c0_i32, %c0_i32_0 : i32, i32
  }
  func.func @transform_4(%arg0: i32, %arg1: i32) -> (i32, i32) {
    %c0_i32 = arith.constant 0 : i32
    %c0_i32_0 = arith.constant 0 : i32
    %c0_i32_1 = arith.constant 0 : i32
    return %c0_i32, %c0_i32_0 : i32, i32
  }
  func.func @transform_5(%arg0: i32, %arg1: i32) -> (i32, i32) {
    %c0_i32 = arith.constant 0 : i32
    %c0_i32_0 = arith.constant 0 : i32
    %c0_i32_1 = arith.constant 0 : i32
    return %c0_i32, %c0_i32_0 : i32, i32
  }
  func.func @transform_6(%arg0: i32, %arg1: i32) -> (i32, i32) {
    %c0_i32 = arith.constant 0 : i32
    %c0_i32_0 = arith.constant 0 : i32
    %c0_i32_1 = arith.constant 0 : i32
    return %c0_i32, %c0_i32_0 : i32, i32
  }
  func.func @transform_7(%arg0: i32, %arg1: i32) -> (i32, i32) {
    %c0_i32 = arith.constant 0 : i32
    %c0_i32_0 = arith.constant 0 : i32
    %c0_i32_1 = arith.constant 0 : i32
    return %c0_i32, %c0_i32_0 : i32, i32
  }
  func.func @transform_8(%arg0: i32, %arg1: i32) -> (i32, i32) {
    %c0_i32 = arith.constant 0 : i32
    %c0_i32_0 = arith.constant 0 : i32
    %c0_i32_1 = arith.constant 0 : i32
    return %c0_i32, %c0_i32_0 : i32, i32
  }
  func.func @transform_9(%arg0: i32, %arg1: i32) -> (i32, i32) {
    %c0_i32 = arith.constant 0 : i32
    %c0_i32_0 = arith.constant 0 : i32
    %c0_i32_1 = arith.constant 0 : i32
    return %c0_i32, %c0_i32_0 : i32, i32
  }
  func.func @transform_10(%arg0: i32, %arg1: i32) -> (i32, i32, i32) {
    %c0_i32 = arith.constant 0 : i32
    %c0_i32_0 = arith.constant 0 : i32
    return %arg0, %arg1, %c0_i32 : i32, i32, i32
  }
}

module attributes {stable_mosaic.version = 11 : i64} {
  func.func @_ffn_ln_kernel(%arg0: i32, %arg1: memref<16x32xf32, #tpu.memory_space<vmem>>, %arg2: memref<32x64xf32, #tpu.memory_space<vmem>>, %arg3: memref<1x64xf32, #tpu.memory_space<vmem>>, %arg4: memref<64x32xf32, #tpu.memory_space<vmem>>, %arg5: memref<1x32xf32, #tpu.memory_space<vmem>>, %arg6: memref<1x32xf32, #tpu.memory_space<vmem>>, %arg7: memref<1x32xf32, #tpu.memory_space<vmem>>, %arg8: memref<16x32xf32, #tpu.memory_space<vmem>>) attributes {dimension_semantics = [#tpu.dimension_semantics<parallel>], iteration_bounds = array<i64: 1>, scalar_prefetch = 0 : i64, scratch_operands = 0 : i64, tpu.core_type = #tpu.core_type<tc>, window_params = [{transform_indices = @transform_0, window_bounds = array<i64: 16, 32>}, {pipeline_mode = #tpu.pipeline_mode<synchronous>, transform_indices = @transform_1, window_bounds = array<i64: 32, 64>}, {pipeline_mode = #tpu.pipeline_mode<synchronous>, transform_indices = @transform_2, window_bounds = array<i64: 1, 64>}, {pipeline_mode = #tpu.pipeline_mode<synchronous>, transform_indices = @transform_3, window_bounds = array<i64: 64, 32>}, {pipeline_mode = #tpu.pipeline_mode<synchronous>, transform_indices = @transform_4, window_bounds = array<i64: 1, 32>}, {pipeline_mode = #tpu.pipeline_mode<synchronous>, transform_indices = @transform_5, window_bounds = array<i64: 1, 32>}, {pipeline_mode = #tpu.pipeline_mode<synchronous>, transform_indices = @transform_6, window_bounds = array<i64: 1, 32>}, {transform_indices = @transform_7, window_bounds = array<i64: 16, 32>}]} {
    %c0 = arith.constant 0 : index
    %c0_0 = arith.constant 0 : index
    %0 = vector.load %arg1[%c0, %c0_0] : memref<16x32xf32, #tpu.memory_space<vmem>>, vector<16x32xf32>
    %c0_1 = arith.constant 0 : index
    %c0_2 = arith.constant 0 : index
    %1 = vector.load %arg2[%c0_1, %c0_2] : memref<32x64xf32, #tpu.memory_space<vmem>>, vector<32x64xf32>
    %cst = arith.constant dense<0.000000e+00> : vector<16x64xf32>
    %2 = tpu.matmul %0, %1, %cst {dimension_numbers = #tpu.dot_dimension_numbers<[1], [0], [0], [1], [0, 0, 1, 1], [], []>} : vector<16x32xf32>, vector<32x64xf32>, vector<16x64xf32> -> vector<16x64xf32>
    %c0_3 = arith.constant 0 : index
    %c0_4 = arith.constant 0 : index
    %3 = vector.load %arg3[%c0_3, %c0_4] : memref<1x64xf32, #tpu.memory_space<vmem>>, vector<1x64xf32>
    %4 = vector.broadcast %3 : vector<1x64xf32> to vector<16x64xf32>
    %5 = arith.addf %2, %4 : vector<16x64xf32>
    %cst_5 = arith.constant 0.000000e+00 : f32
    %6 = vector.broadcast %cst_5 : f32 to vector<16x64xf32>
    %7 = arith.maximumf %5, %6 : vector<16x64xf32>
    %c0_6 = arith.constant 0 : index
    %c0_7 = arith.constant 0 : index
    %8 = vector.load %arg4[%c0_6, %c0_7] : memref<64x32xf32, #tpu.memory_space<vmem>>, vector<64x32xf32>
    %cst_8 = arith.constant dense<0.000000e+00> : vector<16x32xf32>
    %9 = tpu.matmul %7, %8, %cst_8 {dimension_numbers = #tpu.dot_dimension_numbers<[1], [0], [0], [1], [0, 0, 1, 1], [], []>} : vector<16x64xf32>, vector<64x32xf32>, vector<16x32xf32> -> vector<16x32xf32>
    %10 = arith.addf %0, %9 : vector<16x32xf32>
    %c0_9 = arith.constant 0 : index
    %c0_10 = arith.constant 0 : index
    %11 = vector.load %arg5[%c0_9, %c0_10] : memref<1x32xf32, #tpu.memory_space<vmem>>, vector<1x32xf32>
    %12 = vector.broadcast %11 : vector<1x32xf32> to vector<16x32xf32>
    %13 = arith.addf %10, %12 : vector<16x32xf32>
    %c0_11 = arith.constant 0 : index
    %c0_12 = arith.constant 0 : index
    %14 = vector.load %arg6[%c0_11, %c0_12] : memref<1x32xf32, #tpu.memory_space<vmem>>, vector<1x32xf32>
    %c0_13 = arith.constant 0 : index
    %c0_14 = arith.constant 0 : index
    %15 = vector.load %arg7[%c0_13, %c0_14] : memref<1x32xf32, #tpu.memory_space<vmem>>, vector<1x32xf32>
    %cst_15 = arith.constant dense<0.000000e+00> : vector<16xf32>
    %16 = vector.multi_reduction <add>, %13, %cst_15 [1] : vector<16x32xf32> to vector<16xf32>
    %17 = vector.shape_cast %16 : vector<16xf32> to vector<16x1xf32>
    %cst_16 = arith.constant 3.200000e+01 : f32
    %18 = vector.broadcast %cst_16 : f32 to vector<16x1xf32>
    %19 = arith.divf %17, %18 : vector<16x1xf32>
    %20 = vector.broadcast %19 : vector<16x1xf32> to vector<16x32xf32>
    %21 = arith.subf %13, %20 : vector<16x32xf32>
    %22 = arith.mulf %21, %21 : vector<16x32xf32>
    %cst_17 = arith.constant dense<0.000000e+00> : vector<16xf32>
    %23 = vector.multi_reduction <add>, %22, %cst_17 [1] : vector<16x32xf32> to vector<16xf32>
    %24 = vector.shape_cast %23 : vector<16xf32> to vector<16x1xf32>
    %cst_18 = arith.constant 3.200000e+01 : f32
    %25 = vector.broadcast %cst_18 : f32 to vector<16x1xf32>
    %26 = arith.divf %24, %25 : vector<16x1xf32>
    %cst_19 = arith.constant 9.99999974E-6 : f32
    %27 = vector.broadcast %cst_19 : f32 to vector<16x1xf32>
    %28 = arith.addf %26, %27 : vector<16x1xf32>
    %29 = math.rsqrt %28 : vector<16x1xf32>
    %30 = vector.broadcast %29 : vector<16x1xf32> to vector<16x32xf32>
    %31 = arith.mulf %21, %30 : vector<16x32xf32>
    %32 = vector.broadcast %14 : vector<1x32xf32> to vector<16x32xf32>
    %33 = arith.mulf %31, %32 : vector<16x32xf32>
    %34 = vector.broadcast %15 : vector<1x32xf32> to vector<16x32xf32>
    %35 = arith.addf %33, %34 : vector<16x32xf32>
    %c0_20 = arith.constant 0 : index
    %c0_21 = arith.constant 0 : index
    %36 = vector.load %arg8[%c0_20, %c0_21] : memref<16x32xf32, #tpu.memory_space<vmem>>, vector<16x32xf32>
    tpu.vector_store %arg8[%c0_20, %c0_21], %35 {strides = array<i32>} : memref<16x32xf32, #tpu.memory_space<vmem>>, vector<16x32xf32>,
    return
  }
  func.func @transform_0(%arg0: i32) -> (i32, i32) {
    %c0_i32 = arith.constant 0 : i32
    %c0_i32_0 = arith.constant 0 : i32
    return %arg0, %c0_i32 : i32, i32
  }
  func.func @transform_1(%arg0: i32) -> (i32, i32) {
    %c0_i32 = arith.constant 0 : i32
    %c0_i32_0 = arith.constant 0 : i32
    %c0_i32_1 = arith.constant 0 : i32
    return %c0_i32, %c0_i32_0 : i32, i32
  }
  func.func @transform_2(%arg0: i32) -> (i32, i32) {
    %c0_i32 = arith.constant 0 : i32
    %c0_i32_0 = arith.constant 0 : i32
    %c0_i32_1 = arith.constant 0 : i32
    return %c0_i32, %c0_i32_0 : i32, i32
  }
  func.func @transform_3(%arg0: i32) -> (i32, i32) {
    %c0_i32 = arith.constant 0 : i32
    %c0_i32_0 = arith.constant 0 : i32
    %c0_i32_1 = arith.constant 0 : i32
    return %c0_i32, %c0_i32_0 : i32, i32
  }
  func.func @transform_4(%arg0: i32) -> (i32, i32) {
    %c0_i32 = arith.constant 0 : i32
    %c0_i32_0 = arith.constant 0 : i32
    %c0_i32_1 = arith.constant 0 : i32
    return %c0_i32, %c0_i32_0 : i32, i32
  }
  func.func @transform_5(%arg0: i32) -> (i32, i32) {
    %c0_i32 = arith.constant 0 : i32
    %c0_i32_0 = arith.constant 0 : i32
    %c0_i32_1 = arith.constant 0 : i32
    return %c0_i32, %c0_i32_0 : i32, i32
  }
  func.func @transform_6(%arg0: i32) -> (i32, i32) {
    %c0_i32 = arith.constant 0 : i32
    %c0_i32_0 = arith.constant 0 : i32
    %c0_i32_1 = arith.constant 0 : i32
    return %c0_i32, %c0_i32_0 : i32, i32
  }
  func.func @transform_7(%arg0: i32) -> (i32, i32) {
    %c0_i32 = arith.constant 0 : i32
    %c0_i32_0 = arith.constant 0 : i32
    return %arg0, %c0_i32 : i32, i32
  }
}

module attributes {stable_mosaic.version = 11 : i64} {
  func.func @_ln_proj_kernel(%arg0: i32, %arg1: memref<16x32xf32, #tpu.memory_space<vmem>>, %arg2: memref<32x128xf32, #tpu.memory_space<vmem>>, %arg3: memref<1x128xf32, #tpu.memory_space<vmem>>, %arg4: memref<16x128xf32, #tpu.memory_space<vmem>>) attributes {dimension_semantics = [#tpu.dimension_semantics<parallel>], iteration_bounds = array<i64: 1>, scalar_prefetch = 0 : i64, scratch_operands = 0 : i64, tpu.core_type = #tpu.core_type<tc>, window_params = [{transform_indices = @transform_0, window_bounds = array<i64: 16, 32>}, {pipeline_mode = #tpu.pipeline_mode<synchronous>, transform_indices = @transform_1, window_bounds = array<i64: 32, 128>}, {pipeline_mode = #tpu.pipeline_mode<synchronous>, transform_indices = @transform_2, window_bounds = array<i64: 1, 128>}, {transform_indices = @transform_3, window_bounds = array<i64: 16, 128>}]} {
    %c0 = arith.constant 0 : index
    %c0_0 = arith.constant 0 : index
    %0 = vector.load %arg1[%c0, %c0_0] : memref<16x32xf32, #tpu.memory_space<vmem>>, vector<16x32xf32>
    %cst = arith.constant dense<0.000000e+00> : vector<16xf32>
    %1 = vector.multi_reduction <add>, %0, %cst [1] : vector<16x32xf32> to vector<16xf32>
    %2 = vector.shape_cast %1 : vector<16xf32> to vector<16x1xf32>
    %cst_1 = arith.constant 3.200000e+01 : f32
    %3 = vector.broadcast %cst_1 : f32 to vector<16x1xf32>
    %4 = arith.divf %2, %3 : vector<16x1xf32>
    %5 = vector.broadcast %4 : vector<16x1xf32> to vector<16x32xf32>
    %6 = arith.subf %0, %5 : vector<16x32xf32>
    %7 = arith.mulf %6, %6 : vector<16x32xf32>
    %cst_2 = arith.constant dense<0.000000e+00> : vector<16xf32>
    %8 = vector.multi_reduction <add>, %7, %cst_2 [1] : vector<16x32xf32> to vector<16xf32>
    %9 = vector.shape_cast %8 : vector<16xf32> to vector<16x1xf32>
    %cst_3 = arith.constant 3.200000e+01 : f32
    %10 = vector.broadcast %cst_3 : f32 to vector<16x1xf32>
    %11 = arith.divf %9, %10 : vector<16x1xf32>
    %cst_4 = arith.constant 9.99999974E-6 : f32
    %12 = vector.broadcast %cst_4 : f32 to vector<16x1xf32>
    %13 = arith.addf %11, %12 : vector<16x1xf32>
    %14 = math.rsqrt %13 : vector<16x1xf32>
    %15 = vector.broadcast %14 : vector<16x1xf32> to vector<16x32xf32>
    %16 = arith.mulf %6, %15 : vector<16x32xf32>
    %c0_5 = arith.constant 0 : index
    %c0_6 = arith.constant 0 : index
    %17 = vector.load %arg2[%c0_5, %c0_6] : memref<32x128xf32, #tpu.memory_space<vmem>>, vector<32x128xf32>
    %cst_7 = arith.constant dense<0.000000e+00> : vector<16x128xf32>
    %18 = tpu.matmul %16, %17, %cst_7 {dimension_numbers = #tpu.dot_dimension_numbers<[1], [0], [0], [1], [0, 0, 1, 1], [], []>} : vector<16x32xf32>, vector<32x128xf32>, vector<16x128xf32> -> vector<16x128xf32>
    %c0_8 = arith.constant 0 : index
    %c0_9 = arith.constant 0 : index
    %19 = vector.load %arg3[%c0_8, %c0_9] : memref<1x128xf32, #tpu.memory_space<vmem>>, vector<1x128xf32>
    %20 = vector.broadcast %19 : vector<1x128xf32> to vector<16x128xf32>
    %21 = arith.addf %18, %20 : vector<16x128xf32>
    %c0_10 = arith.constant 0 : index
    %c0_11 = arith.constant 0 : index
    %22 = vector.load %arg4[%c0_10, %c0_11] : memref<16x128xf32, #tpu.memory_space<vmem>>, vector<16x128xf32>
    tpu.vector_store %arg4[%c0_10, %c0_11], %21 {strides = array<i32>} : memref<16x128xf32, #tpu.memory_space<vmem>>, vector<16x128xf32>,
    return
  }
  func.func @transform_0(%arg0: i32) -> (i32, i32) {
    %c0_i32 = arith.constant 0 : i32
    %c0_i32_0 = arith.constant 0 : i32
    return %arg0, %c0_i32 : i32, i32
  }
  func.func @transform_1(%arg0: i32) -> (i32, i32) {
    %c0_i32 = arith.constant 0 : i32
    %c0_i32_0 = arith.constant 0 : i32
    %c0_i32_1 = arith.constant 0 : i32
    return %c0_i32, %c0_i32_0 : i32, i32
  }
  func.func @transform_2(%arg0: i32) -> (i32, i32) {
    %c0_i32 = arith.constant 0 : i32
    %c0_i32_0 = arith.constant 0 : i32
    %c0_i32_1 = arith.constant 0 : i32
    return %c0_i32, %c0_i32_0 : i32, i32
  }
  func.func @transform_3(%arg0: i32) -> (i32, i32) {
    %c0_i32 = arith.constant 0 : i32
    %c0_i32_0 = arith.constant 0 : i32
    return %arg0, %c0_i32 : i32, i32
  }
}

</mosaic_0001>

<bundles_post_ra>
// kernel: decoder_forward.9
= control target key start
LH: loop header
LB: loop body
LE: loop exit
PB: predicated region body
PF: predicated region fallthrough
CT: control target
= control target key end

     0   :  { %12 = vsyncpa [#allocation3], 0  ;;  %s487_s0 = inlined_call_operand.vmem [shape: f32[16,32], index: 0, kind: input, shape index: {}]   ;;  %s488_s1 = inlined_call_operand.vmem [shape: f32[32,64], index: 1, kind: input, shape index: {}]   ;;  %s489_s2 = inlined_call_operand.hbm [shape: f32[1,64], index: 2, kind: input, shape index: {}]   ;;  %s490_s3 = inlined_call_operand.vmem [shape: f32[64,32], index: 3, kind: input, shape index: {}]   ;;  %s491_s4 = inlined_call_operand.hbm [shape: f32[1,32], index: 4, kind: input, shape index: {}]   ;;  %s492_s5 = inlined_call_operand.hbm [shape: f32[1,32], index: 5, kind: input, shape index: {}]   ;;  %s493_s6 = inlined_call_operand.hbm [shape: f32[1,32], index: 6, kind: input, shape index: {}]   ;;  %s494_s7 = inlined_call_operand.vmem [shape: f32[16,32], index: 7, kind: output, shape index: {}]  }
   0x1   :  { %13 = vsyncpa [#allocation5], 0  ;;  %s37_s26 = sshll.u32 %s491_s4, 4  ;;  %s38_s26 = int_to_ptr.hbm [resolvable:$true] %s37_s26 }
   0x2   :  { %14 = vsyncpa [#allocation8], 0  ;;  %s374_s27 = smov [#allocation4]   ;;  %s24_s8 = sshll.u32 %s489_s2, 4  ;;  %s25_s8 = int_to_ptr.hbm [resolvable:$true] %s24_s8 }
   0x3   :  { %s39_s28 = sshll.u32 %s374_s27, 4  ;;  %s375_s9 = smov [#allocation2]   ;;  %s40_s28 = int_to_ptr.vmem [resolvable:$true] %s39_s28 }
   0x4   :  { %42 = dma.hbm_to_vmem [thread:$0]  %s38_s26, 16, %s40_s28, [#allocation5]  }
   0x5   :  { %s26_s10 = sshll.u32 %s375_s9, 4  ;;  %s48_s13 = sshll.u32 %s492_s5, 4  ;;  %s27_s10 = int_to_ptr.vmem [resolvable:$true] %s26_s10  ;;  %s49_s13 = int_to_ptr.hbm [resolvable:$true] %s48_s13 }
   0x6   :  { %29 = dma.hbm_to_vmem [thread:$0]  %s25_s8, 16, %s27_s10, [#allocation3]  }
   0x7   :  { %s59_s15 = sshll.u32 %s493_s6, 4  ;;  %s376_s16 = smov [#allocation6]   ;;  %s60_s15 = int_to_ptr.hbm [resolvable:$true] %s59_s15 }
   0x8   :  { %s50_s17 = sshll.u32 %s376_s16, 4  ;;  %s377_s2 = smov [#allocation7]   ;;  %s51_s17 = int_to_ptr.vmem [resolvable:$true] %s50_s17 }
   0x9   :  { %53 = dma.hbm_to_vmem [thread:$0]  %s49_s13, 16, %s51_s17, [#allocation5]  }
   0xa   :  { %s61_s18 = sshll.u32 %s377_s2, 4  ;;  %s62_s18 = int_to_ptr.vmem [resolvable:$true] %s61_s18 }
   0xb   :  { %64 = dma.hbm_to_vmem [thread:$0]  %s60_s15, 16, %s62_s18, [#allocation8]  }
   0xc   :  { %368 = dma.done.wait [#allocation3], 16  }
   0xd   :  { %369 = vsyncadd [#allocation3], 4294967280 }
   0xe   :  { %370 = dma.done.wait [#allocation5], 32  }
   0xf   :  { %371 = vsyncadd [#allocation5], 4294967264 }
  0x10   :  { %372 = dma.done.wait [#allocation8], 16  }
  0x11   :  { %373 = vsyncadd [#allocation8], 4294967280  ;;  %v86_v0 = vld [vmem:[%s488_s1 + $0x18] sm:$0xff]  ;;  %v85_v1 = vld [vmem:[%s488_s1 + $0x10] sm:$0xff]  ;;  %vm91_vm0 = vcmask 261120   ;;  %vm131_vm1 = vcmask 523264  }
  0x12   :  { %110 = vmatpush.msra.mxu0 %v86_v0  ;;  %245 = vmatpush.msra.mxu3 %v86_v0  ;;  %v84_v2 = vld [vmem:[%s488_s1 + $0x8] sm:$0xff]  ;;  %v130_v3 = vld [vmem:[%s490_s3 + $0x38] sm:$0xff]  ;;  %v129_v4 = vld [vmem:[%s490_s3 + $0x30] sm:$0xff]  ;;  %v378_v30 = vmov 32.0  }
  0x13   :  { %v83_v5 = vld [vmem:[%s488_s1] sm:$0xff]  ;;  %146 = vmatpush.msra.mxu1 %v130_v3  ;;  %249 = vmatpush.msra.mxu2 %v130_v3  ;;  %v82_v7 = vld [vmem:[%s487_s0 + $0x8] sm:$0xff]  ;;  %v126_v10 = vld [vmem:[%s490_s3 + $0x18] sm:$0xff]  ;;  %266 = vrcp.f32 %v378_v30 }
  0x14   :  { %111 = vmatpush.msra.mxu0 %v85_v1  ;;  %246 = vmatpush.msra.mxu3 %v85_v1  ;;  %v81_v6 = vld [vmem:[%s487_s0] sm:$0xff]  ;;  %v128_v8 = vld [vmem:[%s490_s3 + $0x28] sm:$0xff]  ;;  %v125_v11 = vld [vmem:[%s490_s3 + $0x10] sm:$0xff] }
  0x15   :  { %147 = vmatpush.msra.mxu1 %v129_v4  ;;  %250 = vmatpush.msra.mxu2 %v129_v4  ;;  %v127_v9 = vld [vmem:[%s490_s3 + $0x20] sm:$0xff]  ;;  %v124_v12 = vld [vmem:[%s490_s3 + $0x8] sm:$0xff] }
  0x16   :  { %112 = vmatpush.msra.mxu0 %v84_v2  ;;  %247 = vmatpush.msra.mxu3 %v84_v2  ;;  %v123_v13 = vld [vmem:[%s490_s3] sm:$0xff] }
  0x17   :  { %148 = vmatpush.msra.mxu1 %v128_v8  ;;  %251 = vmatpush.msra.mxu2 %v128_v8  ;;  %v262_v14 = vld [vmem:[#allocation2] ss:$0 sm:$0xff]  ;;  %v263_v21 = vld [vmem:[#allocation4] ss:$0 sm:$0xff]  ;;  %v264_v59 = vld [vmem:[#allocation6] ss:$0 sm:$0xff] }
  0x18   :  { %113 = vmatpush.msra.mxu0 %v83_v5  ;;  %248 = vmatpush.msra.mxu3 %v83_v5  ;;  %v265_v62 = vld [vmem:[#allocation7] ss:$0 sm:$0xff] }
  0x19   :  { %241 = vmatmul.msk.f32.vlgmr.msra.gmra.mxu0 %vm91_vm0, %v81_v6  ;;  %242 = vmatmul.msk.f32.vlgmr.msra.gmra.mxu3 %vm91_vm0, %v82_v7  ;;  %v267_v31 = vpop.eup %266 }
  0x1a   :  { %149 = vmatpush.msra.mxu1 %v127_v9  ;;  %252 = vmatpush.msra.mxu2 %v127_v9  ;;  %v178_v32 = vmul.f32 32.0, %v267_v31  ;;  %vm182_vm2 = vweird.f32 %v267_v31 }
  0x1c   :  { %150 = vmatpush.msra.mxu1 %v126_v10  ;;  %253 = vmatpush.msra.mxu2 %v126_v10  ;;  %v179_v33 = vsub.f32 1.0, %v178_v32 }
  0x1e   :  { %151 = vmatpush.msra.mxu1 %v125_v11  ;;  %254 = vmatpush.msra.mxu2 %v125_v11  ;;  %v180_v34 = vmul.f32 %v267_v31, %v179_v33 }
  0x20   :  { %152 = vmatpush.msra.mxu1 %v124_v12  ;;  %255 = vmatpush.msra.mxu2 %v124_v12  ;;  %v181_v35 = vadd.f32 %v267_v31, %v180_v34 }
  0x22   :  { %153 = vmatpush.msra.mxu1 %v123_v13  ;;  %256 = vmatpush.msra.mxu2 %v123_v13  ;;  %v183_v36 = vsel %vm182_vm2, %v267_v31, %v181_v35 }
  0x96   :  { %v115_v15 = vpop.f32.mrf.mxu0 }
  0x97   :  { %v116_v16 = vadd.f32 %v262_v14, %v115_v15 }
  0x99   :  { %v121_v17 = vmax.f32 %v116_v16, 0.0 }
  0x9b   :  { %243 = vmatmul.msk.f32.vlgmr.msra.gmra.mxu1 %vm131_vm1, %v121_v17 }
  0x9c   :  { %v118_v18 = vpop.f32.mrf.mxu3 }
  0x9d   :  { %v119_v19 = vadd.f32 %v262_v14, %v118_v18 }
  0x9f   :  { %v122_v20 = vmax.f32 %v119_v19, 0.0 }
  0xa1   :  { %244 = vmatmul.msk.f32.vlgmr.msra.gmra.mxu2 %vm131_vm1, %v122_v20 }
 0x118   :  { %v155_v22 = vpop.f32.mrf.mxu1 }
 0x119   :  { %v161_v23 = vadd.f32 %v155_v22, %v81_v6 }
 0x11b   :  { %v167_v24 = vadd.f32 %v263_v21, %v161_v23 }
 0x11d   :  { %v171_v25 = vsel %vm91_vm0, %v167_v24, 0.0 }
 0x11e   :  { %172 = vadd.xlane.f32.xlu0 %v171_v25 }
 0x124   :  { %v158_v26 = vpop.f32.mrf.mxu2 }
 0x125   :  { %v162_v27 = vadd.f32 %v158_v26, %v82_v7 }
 0x127   :  { %v168_v28 = vadd.f32 %v263_v21, %v162_v27 }
 0x129   :  { %v174_v29 = vsel %vm91_vm0, %v168_v28, 0.0 }
 0x12a   :  { %175 = vadd.xlane.f32.xlu0 %v174_v29 }
 0x191   :  { %v173_v37 = vpop.xlane.xlu0 %172 }
 0x192   :  { %v184_v38 = vmul.f32 %v183_v36, %v173_v37 }
 0x194   :  { %v186_v39 = vsub.f32 %v167_v24, %v184_v38 }
 0x196   :  { %v188_v40 = vmul.f32 %v186_v39, %v186_v39 }
 0x198   :  { %v190_v41 = vsel %vm91_vm0, %v188_v40, 0.0 }
 0x199   :  { %191 = vadd.xlane.f32.xlu1 %v190_v41 }
 0x19d   :  { %v176_v42 = vpop.xlane.xlu0 %175 }
 0x19e   :  { %v185_v43 = vmul.f32 %v183_v36, %v176_v42 }
 0x1a0   :  { %v187_v44 = vsub.f32 %v168_v28, %v185_v43 }
 0x1a2   :  { %v189_v45 = vmul.f32 %v187_v44, %v187_v44 }
 0x1a4   :  { %v193_v46 = vsel %vm91_vm0, %v189_v45, 0.0 }
 0x1a5   :  { %194 = vadd.xlane.f32.xlu1 %v193_v46 }
 0x20c   :  { %v192_v47 = vpop.xlane.xlu1 %191 }
 0x20d   :  { %v196_v48 = vmul.f32 %v192_v47, %v183_v36 }
 0x20f   :  { %v198_v49 = vadd.f32 1e-05, %v196_v48 }
 0x211   :  { %268 = vrsqrt.f32 %v198_v49  ;;  %vm206_vm4 = vweird.f32 %v198_v49 }
 0x217   :  { %v269_v50 = vpop.eup %268 }
 0x218   :  { %v201_v51 = vmul.f32 %v269_v50, %v198_v49  ;;  %v195_v52 = vpop.xlane.xlu1 %194  ;;  %vm207_vm3 = vweird.f32 %v269_v50 }
 0x219   :  { %v197_v53 = vmul.f32 %v195_v52, %v183_v36  ;;  %vm208_vm5 = vmor %vm206_vm4, %vm207_vm3 }
 0x21a   :  { %v202_v54 = vmul.f32 %v269_v50, %v201_v51 }
 0x21b   :  { %v199_v55 = vadd.f32 1e-05, %v197_v53 }
 0x21c   :  { %v203_v56 = vmul.f32 0.5, %v202_v54 }
 0x21d   :  { %270 = vrsqrt.f32 %v199_v55  ;;  %vm216_vm7 = vweird.f32 %v199_v55 }
 0x21e   :  { %v204_v57 = vsub.f32 1.5, %v203_v56 }
 0x220   :  { %v205_v58 = vmul.f32 %v269_v50, %v204_v57 }
 0x222   :  { %v209_v60 = vsel %vm208_vm5, %v269_v50, %v205_v58 }
 0x223   :  { %v271_v61 = vpop.eup %270  ;;  %v220_v63 = vmul.f32 %v209_v60, %v186_v39 }
 0x224   :  { %v211_v0 = vmul.f32 %v271_v61, %v199_v55  ;;  %vm217_vm6 = vweird.f32 %v271_v61 }
 0x225   :  { %v225_v1 = vmul.f32 %v264_v59, %v220_v63  ;;  %vm218_vm8 = vmor %vm216_vm7, %vm217_vm6 }
 0x226   :  { %v212_v2 = vmul.f32 %v271_v61, %v211_v0 }
 0x227   :  { %v230_v3 = vadd.f32 %v265_v62, %v225_v1 }
 0x228   :  { %v213_v4 = vmul.f32 0.5, %v212_v2 }
 0x229   :  { %232 = vst.msk [vmem:[%s494_s7] sm:$0xff] %vm91_vm0, %v230_v3 }
 0x22a   :  { %v214_v5 = vsub.f32 1.5, %v213_v4 }
 0x22c   :  { %v215_v6 = vmul.f32 %v271_v61, %v214_v5 }
 0x22e   :  { %v219_v7 = vsel %vm218_vm8, %v271_v61, %v215_v6 }
 0x22f   :  { %v221_v8 = vmul.f32 %v219_v7, %v187_v44 }
 0x231   :  { %v226_v9 = vmul.f32 %v264_v59, %v221_v8 }
 0x233   :  { %v231_v10 = vadd.f32 %v265_v62, %v226_v9 }
 0x235   :  { %233 = vst.msk [vmem:[%s494_s7 + $0x8] sm:$0xff] %vm91_vm0, %v231_v10 }
 0x236   :  { %238 = vsyncpa [#allocation3], 1 }
 0x237   :  { %239 = vsyncpa [#allocation5], 1 }
 0x238   :  { %240 = vsyncpa [#allocation8], 1 }

// kernel: decoder_forward.7
= control target key start
LH: loop header
LB: loop body
LE: loop exit
PB: predicated region body
PF: predicated region fallthrough
CT: control target
= control target key end

     0   :  { %s1961_s0 = inlined_call_operand.hbm [shape: f32[2,8,32], index: 0, kind: input, shape index: {}]   ;;  %s1962_s1 = inlined_call_operand.hbm [shape: f32[32,32], index: 1, kind: input, shape index: {}]   ;;  %s1963_s2 = inlined_call_operand.hbm [shape: f32[1,32], index: 2, kind: input, shape index: {}]   ;;  %s1964_s3 = inlined_call_operand.hbm [shape: f32[32,64], index: 3, kind: input, shape index: {}]   ;;  %s1965_s4 = inlined_call_operand.hbm [shape: f32[1,64], index: 4, kind: input, shape index: {}]   ;;  %s1966_s5 = inlined_call_operand.hbm [shape: f32[32,32], index: 5, kind: input, shape index: {}]   ;;  %s1967_s6 = inlined_call_operand.hbm [shape: f32[1,32], index: 6, kind: input, shape index: {}]   ;;  %s1968_s7 = inlined_call_operand.hbm [shape: f32[1,32], index: 7, kind: input, shape index: {}]   ;;  %s1969_s8 = inlined_call_operand.hbm [shape: f32[1,32], index: 8, kind: input, shape index: {}]   ;;  %s1970_s9 = inlined_call_operand.vmem [shape: f32[2,8,32], index: 9, kind: output, shape index: {}]  }
   0x1   :  { %1971 = sst [smem:[#allocation22_spill]] %s1962_s1 }
   0x2   :  { %1972 = sst [smem:[#allocation23_spill]] %s1963_s2 }
   0x3   :  { %1973 = sst [smem:[#allocation24_spill]] %s1964_s3 }
   0x4   :  { %1974 = sst [smem:[#allocation25_spill]] %s1970_s9 }
   0x5   :  { %14 = vsyncpa [#allocation4], 0 }
   0x6   :  { %16 = vsyncpa [#allocation4 + $0x1], 0 }
   0x7   :  { %17 = vsyncpa [#allocation6], 0 }
   0x8   :  { %18 = vsyncpa [#allocation9], 0 }
   0x9   :  { %19 = vsyncpa [#allocation12], 0 }
   0xa   :  { %20 = vsyncpa [#allocation15], 0  ;;  %s1748_s30 = smov 0   ;;  %s1750_s10 = smov 0  }
   0xb   :  { %s1752_s11 = smov 0   ;;  %s1754_s12 = smov 0  }
   0xc   :  { %s1756_s13 = smov 0   ;;  %s1758_s14 = smov 0  }
   0xd LB: > { %s1123_s15 = sadd.s32 4294967295, %s1675_s14   ;;  %p1125_p0 = scmp.ge.s32.totalorder %s1675_s14, 1  ;;  %s1675_s14 = sphi %s1758_s14, %s26_s14   ;;  %s1671_s13 = sphi %s1756_s13, %s1988_s13   ;;  %s1667_s12 = sphi %s1754_s12, %s1987_s12   ;;  %s1663_s11 = sphi %s1752_s11, %s1986_s11   ;;  %s1659_s10 = sphi %s1750_s10, %s1985_s10   ;;  %s1655_s30 = sphi %s1748_s30, %s1984_s30  }
   0xe   : > { %p1780_p1 = scmp.eq.s32.totalorder %s1123_s15, 0  ;;  %p265_p2 = scmp.lt.s32.totalorder %s1675_s14, 3 }
   0xf   : > { %s1976_s1 = sld [smem:[#allocation22_spill]]  ;;  %s1677_s21 = smov [#allocation5]  }
  0x10   : > { %p1788_p3 = pnand %p1125_p0, %p265_p2  ;;  %s278_s22 = sshll.u32 %s1677_s21, 4  ;;  %s279_s22 = int_to_ptr.vmem [resolvable:$true] %s278_s22 }
  0x11   : > { %s1979_s3 = sld [smem:[#allocation24_spill]]  ;;  %s1678_s27 = smov 128  }
  0x12   : > { %p1199_p4 = pneg %p1788_p3  ;;  %s1679_s28 = smov 8  }
  0x13   : > { %s1680_s29 = smov [#allocation8]   ;;  %s328_s21 = sshll.u32 %s1966_s5, 4  ;;  %s329_s21 = int_to_ptr.hbm [resolvable:$true] %s328_s21 }
  0x14   : > { %p1796_p5 = pnand %p1199_p4, %p1780_p1  ;;  %s304_s15 = sshll.u32 %s1680_s29, 4  ;;  %s305_s15 = int_to_ptr.vmem [resolvable:$true] %s304_s15 }
  0x15   : > { %s276_s19 = sshll.u32 %s1976_s1, 4  ;;  %s355_s1 = sshll.u32 %s1968_s7, 4  ;;  %s277_s19 = int_to_ptr.hbm [resolvable:$true] %s276_s19  ;;  %s356_s1 = int_to_ptr.hbm [resolvable:$true] %s355_s1 }
  0x16   : > { %1202 = dma.hbm_to_vmem [thread:$0]  (!%p1796_p5), %s277_s19, 512, %s279_s22, [#allocation6], %s1678_s27, %s1678_s27, %s1679_s28  }
  0x17   : > { %s302_s26 = sshll.u32 %s1979_s3, 4  ;;  %s1681_s3 = smov [#allocation11]   ;;  %s303_s26 = int_to_ptr.hbm [resolvable:$true] %s302_s26 }
  0x18   : > { %1208 = dma.hbm_to_vmem [thread:$0]  (!%p1796_p5), %s303_s26, 512, %s305_s15, [#allocation9], %s1678_s27, %s1678_s27, %s1679_s28  }
  0x19   : > { %s330_s9 = sshll.u32 %s1681_s3, 4  ;;  %s1682_s19 = smov [#allocation14]   ;;  %s331_s9 = int_to_ptr.vmem [resolvable:$true] %s330_s9 }
  0x1a   : > { %1214 = dma.hbm_to_vmem [thread:$0]  (!%p1796_p5), %s329_s21, 512, %s331_s9, [#allocation12], %s1678_s27, %s1678_s27, %s1679_s28  }
  0x1b   : > { %s357_s22 = sshll.u32 %s1682_s19, 4  ;;  %s1980_s2 = sld [smem:[#allocation23_spill]]  ;;  %s358_s22 = int_to_ptr.vmem [resolvable:$true] %s357_s22 }
  0x1c   : > { %1220 = dma.hbm_to_vmem [thread:$0]  (!%p1796_p5), %s356_s1, 16, %s358_s22, [#allocation15]  }
  0x1d   : > { %s317_s24 = sshll.u32 %s1965_s4, 4  ;;  %s1683_s3 = smov [#allocation7]   ;;  %s318_s24 = int_to_ptr.hbm [resolvable:$true] %s317_s24 }
  0x1e   : > { %s293_s25 = sshll.u32 %s1683_s3, 4  ;;  %s1684_s9 = smov [#allocation10]   ;;  %s294_s25 = int_to_ptr.vmem [resolvable:$true] %s293_s25 }
  0x1f   : > { %s319_s27 = sshll.u32 %s1684_s9, 4  ;;  %s343_s1 = sshll.u32 %s1967_s6, 4  ;;  %s320_s27 = int_to_ptr.vmem [resolvable:$true] %s319_s27  ;;  %s344_s1 = int_to_ptr.hbm [resolvable:$true] %s343_s1 }
  0x20   : > { %1211 = dma.hbm_to_vmem [thread:$0]  (!%p1796_p5), %s318_s24, 16, %s320_s27, [#allocation9]  }
  0x21   : > { %s291_s18 = sshll.u32 %s1980_s2, 4  ;;  %s367_s29 = sshll.u32 %s1969_s8, 4  ;;  %s292_s18 = int_to_ptr.hbm [resolvable:$true] %s291_s18  ;;  %s368_s29 = int_to_ptr.hbm [resolvable:$true] %s367_s29 }
  0x22   : > { %1205 = dma.hbm_to_vmem [thread:$0]  (!%p1796_p5), %s292_s18, 16, %s294_s25, [#allocation6]  }
  0x23   : > { %s1685_s17 = smov [#allocation13]   ;;  %s1686_s26 = smov [#allocation16]  }
  0x24   : > { %s345_s18 = sshll.u32 %s1685_s17, 4  ;;  %s369_s15 = sshll.u32 %s1686_s26, 4  ;;  %s346_s18 = int_to_ptr.vmem [resolvable:$true] %s345_s18  ;;  %s370_s15 = int_to_ptr.vmem [resolvable:$true] %s369_s15 }
  0x25   : > { %1217 = dma.hbm_to_vmem [thread:$0]  (!%p1796_p5), %s344_s1, 16, %s346_s18, [#allocation12]  }
  0x26   : > { %1223 = dma.hbm_to_vmem [thread:$0]  (!%p1796_p5), %s368_s29, 16, %s370_s15, [#allocation15]  }
  0x27   : > { %s38_s24 = sadd.s32 1, %s1671_s13  ;;  %s45_s3 = sadd.s32 1, %s1663_s11 }
  0x28   : > { %p40_p6 = scmp.ge.s32.totalorder %s38_s24, 2  ;;  %p52_p7 = scmp.ne.s32.totalorder %s1663_s11, %s1659_s10 }
  0x29   : > { %p53_p8 = scmp.eq.s32.totalorder %s1675_s14, 0  ;;  %p58_p9 = scmp.ne.s32.totalorder %s1659_s10, %s1655_s30 }
  0x2a   : > { %s1990_s24 = smov (%p40_p6, %s38_s24), 0  ;;  %p1236_p12 = scmp.lt.s32.totalorder %s1675_s14, 2 }
  0x2b   : > { %p1846_p10 = por %p53_p8, %p52_p7  ;;  %p1852_p11 = por %p1780_p1, %p58_p9 }
  0x2c   : > { %s42_s9 = ssub.s32 %s1671_s13, %s1990_s24  ;;  %s380_s27 = sand.u32 1, %s1663_s11  }
  0x2d   : > { %p43_p13 = scmp.eq.s32.totalorder %s42_s9, 0  ;;  %s1135_s28 = sshll.u32 %s380_s27, 3 }
  0x2e   : > { %s1136_s30 = sshll.u32 %s1671_s13, 3  ;;  %s384_s29 = scalar_lea.vmem [#allocation3], %s1135_s28 }
  0x2f   : > { %s1861_s21 = scalar_select %p43_p13, %s1663_s11, %s45_s3  }
  0x30   : > { %s388_s22 = scalar_lea.hbm %s1961_s0, %s1136_s30  ;;  %s392_s17 = sshll.u32 %s384_s29, 4  ;;  %s393_s17 = int_to_ptr.vmem [resolvable:$true] %s392_s17 }
  0x31   : > { %s390_s18 = sshll.u32 %s388_s22, 4  ;;  %p1225_p0 = pnand %p1236_p12, %p1846_p10  ;;  %s391_s18 = int_to_ptr.hbm [resolvable:$true] %s390_s18 }
  0x32   : > { %s381_s26 = scalar_lea.sflag [#allocation4], %s380_s27  ;;  %401 = sbr.rel (%p1788_p3) target bundleno = 1674 (0x68a), region = 56 }
  0x33   : > { %1227 = dma.hbm_to_vmem [thread:$0]  (!%p1225_p0), %s391_s18, 128, %s393_s17, %s381_s26  }
  0x34   : > { %s403_s15 = sand.u32 (!%p1788_p3), 1, %s1659_s10  }
  0x35   : > { %s1138_s3 = sshll.u32 (!%p1788_p3), %s403_s15, 3  ;;  %s404_s9 = scalar_lea.sflag (!%p1788_p3), [#allocation4], %s403_s15 }
  0x36   : > { %s407_s2 = scalar_lea.vmem (!%p1788_p3), [#allocation3], %s1138_s3 }
  0x37   : > { %1634 = dma.done.wait (%p1852_p11), %s404_s9, 128  }
  0x38   : > { %1636 = vsyncadd (%p1852_p11), %s404_s9, 4294967168 }
  0x39   : > { %1638 = dma.done.wait (%p1780_p1), [#allocation6], 528  }
  0x3a   : > { %1640 = vsyncadd (%p1780_p1), [#allocation6], 4294966768 }
  0x3b   : > { %1642 = dma.done.wait (%p1780_p1), [#allocation9], 528  }
  0x3c   : > { %1644 = vsyncadd (%p1780_p1), [#allocation9], 4294966768 }
  0x3d   : > { %1646 = dma.done.wait (%p1780_p1), [#allocation12], 528  }
  0x3e   : > { %1648 = vsyncadd (%p1780_p1), [#allocation12], 4294966768 }
  0x3f   : > { %1650 = dma.done.wait (%p1780_p1), [#allocation15], 32  }
  0x40   : > { %1652 = vsyncadd (%p1780_p1), [#allocation15], 4294967264  ;;  %v499_v0 = vld [vmem:[#allocation5 + $0x18] sm:$0xff]  ;;  %v498_v2 = vld [vmem:[#allocation5 + $0x10] sm:$0xff]  ;;  %vm504_vm0 = vcmask 261120   ;;  %vm559_vm1 = vcmask 64512  }
  0x41   : > { %v531_v1 = vld [vmem:[#allocation8 + $0x18] sm:$0xff]  ;;  %520 = vmatpush.msra.mxu0 %v499_v0  ;;  %v530_v3 = vld [vmem:[#allocation8 + $0x10] sm:$0xff]  ;;  %v497_v4 = vld [vmem:[#allocation5 + $0x8] sm:$0xff]  ;;  %s1687_s16 = smov 120   ;;  %s1689_s20 = smov 104  }
  0x42   : > { %551 = vmatpush.msra.mxu1 %v531_v1  ;;  %v529_v5 = vld [vmem:[#allocation8 + $0x8] sm:$0xff]  ;;  %v496_v6 = vld [vmem:[#allocation5] sm:$0xff]  ;;  %s1690_s25 = smov 112   ;;  %s1691_s23 = smov 72  }
  0x43   : > { %521 = vmatpush.msra.mxu0 %v498_v2  ;;  %v528_v7 = vld [vmem:[#allocation8] sm:$0xff]  ;;  %v1892_v8 = vld [vmem:[%s407_s2] sm:$0xff]  ;;  %v1314_v9 = vld [vmem:[#allocation7] ss:$0 sm:$0xff]  ;;  %s1688_s2 = smov 96   ;;  %s1692_s27 = smov 80  }
  0x44   : > { %552 = vmatpush.msra.mxu1 %v530_v3  ;;  %v1315_v10 = vld [vmem:[#allocation10] ss:$0 sm:$0xff]  ;;  %s1693_s28 = smov 88   ;;  %s1694_s30 = smov 16  }
  0x45   : > { %522 = vmatpush.msra.mxu0 %v497_v4  ;;  %s1695_s1 = smov 8   ;;  %s1696_s19 = smov 24  }
  0x46   : > { %553 = vmatpush.msra.mxu1 %v529_v5  ;;  %p485_p1 = scmp.lt.s32.totalorder %s1667_s12, 1  ;;  %s1983_s18 = sld [smem:[#allocation25_spill]] }
  0x47   : > { %523 = vmatpush.msra.mxu0 %v496_v6 }
  0x48   : > { %554 = vmatpush.msra.mxu1 %v528_v7  ;;  %1148 = vmatmul.msk.f32.vlgmr.msra.gmra.mxu0 %vm504_vm0, %v1892_v8  ;;  %s1992_s12 = smov (!%p485_p1, %s1667_s12), 1 }
  0x49   : > { %1149 = vmatmul.msk.f32.vlgmr.msra.gmra.mxu1 %vm504_vm0, %v1892_v8  ;;  %s1147_s22 = sshll.u32 %s1992_s12, 3 }
  0x4c   : > { %s491_s26 = scalar_lea.vmem %s1983_s18, %s1147_s22 }
  0xc5   : > { %v525_v11 = vpop.f32.mrf.mxu0 }
  0xc6   : > { %v556_v12 = vpop.f32.mrf.mxu1  ;;  %v526_v13 = vadd.f32 %v1314_v9, %v525_v11 }
  0xc7   : > { %v1898_v14 = vadd.f32 %v1315_v10, %v556_v12 }
  0xc8   : > { %637 = vrot.lane.b32.xlu2 %v526_v13, %s1687_s16 }
  0xc9   : > { %610 = vrot.lane.b32.xlu1 %v1898_v14, %s1688_s2  ;;  %1150 = vmatpush.xpose.msk.msra.mxu2 %vm559_vm1, %v1898_v14 }
  0xcc   : > { %1151 = vmatmul.msk.f32.vlgmr.msra.gmra.mxu2 %vm559_vm1, %v526_v13 }
  0xd0   : > { %807 = vrot.lane.b32.xlu2 %v1898_v14, %s1689_s20 }
  0xd1   : > { %639 = vrot.lane.b32.xlu1 %v1898_v14, %s1687_s16 }
  0xd8   : > { %721 = vrot.lane.b32.xlu2 %v526_v13, %s1690_s25 }
  0xd9   : > { %723 = vrot.lane.b32.xlu1 %v1898_v14, %s1690_s25 }
 0x122   : > { %v638_v15 = vpop.permute.xlu2 %637 }
 0x12a   : > { %v808_v18 = vpop.permute.xlu2 %807 }
 0x132   : > { %v722_v20 = vpop.permute.xlu2 %721 }
 0x13b   : > { %v611_v16 = vpop.permute.xlu1 %610 }
 0x13c   : > { %631 = vmatpush.msra.mxu3 %v611_v16 }
 0x143   : > { %v640_v17 = vpop.permute.xlu1 %639 }
 0x144   : > { %1153 = vmatpush.xpose.msk.msrb.mxu3 %vm559_vm1, %v640_v17 }
 0x14b   : > { %v724_v19 = vpop.permute.xlu1 %723 }
 0x14c   : > { %1156 = vmatpush.xpose.msk.msrb.mxu0 %vm559_vm1, %v724_v19 }
 0x14f   : > { %1157 = vmatmul.msk.f32.vlgmr.msrb.gmra.mxu0 %vm559_vm1, %v722_v20  ;;  %v583_v21 = vpop.f32.mrf.mxu2 }
 0x150   : > { %v586_v22 = vsel %vm559_vm1, %v583_v21, -inf }
 0x151   : > { %587 = vmax.xlane.f32.xlu0 %v586_v22 }
 0x1c4   : > { %v588_v23 = vpop.xlane.xlu0 %587 }
 0x1c5   : > { %v589_v24 = vsub.f32 %v583_v21, %v588_v23 }
 0x1c7   : > { %v590_v25 = vmul.f32 1.442695, %v589_v24 }
 0x1c9   : > { %1319 = vpow2.f32 %v590_v25 }
 0x1cc   : > { %v746_v28 = vpop.f32.mrf.mxu0 }
 0x1cd   : > { %v749_v29 = vsel %vm559_vm1, %v746_v28, -inf }
 0x1cf   : > { %v1320_v26 = vpop.eup %1319 }
 0x1d0   : > { %v592_v27 = vsel %vm559_vm1, %v1320_v26, 0.0 }
 0x1d1   : > { %593 = vadd.xlane.f32.xlu0 %v592_v27 }
 0x1e5   : > { %805 = vrot.lane.b32.xlu0 %v526_v13, %s1689_s20 }
 0x20f   : > { %750 = vmax.xlane.f32.xlu0 %v749_v29 }
 0x223   : > { %857 = vrot.lane.b32.xlu0 %v1898_v14, %s1691_s23 }
 0x244   : > { %v594_v30 = vpop.xlane.xlu0 %593 }
 0x245   : > { %1321 = vrcp.f32 %v594_v30  ;;  %v606_v34 = vand.u32 2147483648, %v594_v30  ;;  %v604_v36 = vand.u32 2147483647, %v594_v30  ;;  %vm600_vm3 = vweird.f32 %v594_v30 }
 0x247   : > { %v607_v38 = vor.u32 1.1754944e-38, %v606_v34  ;;  %vm605_vm5 = vcmp.eq.f32.partialorder %v604_v36, 8.507059e+37 }
 0x24b   : > { %v1322_v31 = vpop.eup %1321 }
 0x24c   : > { %v596_v32 = vmul.f32 %v1322_v31, %v594_v30  ;;  %vm601_vm2 = vweird.f32 %v1322_v31 }
 0x24d   : > { %vm602_vm4 = vmor %vm600_vm3, %vm601_vm2 }
 0x24e   : > { %v597_v33 = vsub.f32 1.0, %v596_v32 }
 0x250   : > { %v598_v35 = vmul.f32 %v1322_v31, %v597_v33 }
 0x252   : > { %v599_v37 = vadd.f32 %v1322_v31, %v598_v35 }
 0x254   : > { %v603_v39 = vsel %vm602_vm4, %v1322_v31, %v599_v37  ;;  %vm719_vm4 = vcmask 130112  }
 0x255   : > { %v608_v40 = vsel %vm605_vm5, %v607_v38, %v603_v39  ;;  %vm803_vm5 = vcmask 195712  }
 0x256   : > { %v609_v41 = vmul.f32 %v1320_v26, %v608_v40 }
 0x257   : > { %v806_v42 = vpop.permute.xlu0 %805 }
 0x258   : > { %1152 = vmatmul.msk.f32.vlgmr.msra.gmra.mxu3 %vm559_vm1, %v609_v41 }
 0x259   : > { %1159 = vmatpush.xpose.msk.msra.mxu3 %vm559_vm1, %v808_v18 }
 0x260   : > { %1154 = vmatmul.msk.f32.vlgmr.msrb.gmra.mxu3 %vm559_vm1, %v638_v15 }
 0x268   : > { %1160 = vmatmul.msk.f32.vlgmr.msra.gmra.mxu3 %vm559_vm1, %v806_v42  ;;  %v893_v42 = vld [vmem:[#allocation11 + $0x18] sm:$0xff] }
 0x269   : > { %913 = vmatpush.msra.mxu0 %v893_v42 }
 0x282   : > { %v751_v44 = vpop.xlane.xlu0 %750 }
 0x283   : > { %v752_v45 = vsub.f32 %v746_v28, %v751_v44  ;;  %v891_v44 = vld [vmem:[#allocation11 + $0x8] sm:$0xff] }
 0x285   : > { %v753_v48 = vmul.f32 1.442695, %v752_v45  ;;  %v890_v45 = vld [vmem:[#allocation11] sm:$0xff] }
 0x287   : > { %1323 = vpow2.f32 %v753_v48 }
 0x28d   : > { %v1324_v51 = vpop.eup %1323 }
 0x28e   : > { %v755_v52 = vsel %vm559_vm1, %v1324_v51, 0.0 }
 0x295   : > { %v858_v34 = vpop.permute.xlu0 %857 }
 0x2db   : > { %v633_v43 = vpop.f32.mrf.mxu3 }
 0x2dc   : > { %636 = vst.msk [vmem:[#allocation2] sm:$0xff] %vm559_vm1, %v633_v43  ;;  %v892_v43 = vld [vmem:[#allocation11 + $0x10] sm:$0xff] }
 0x2dd   : > { %914 = vmatpush.msra.mxu0 %v892_v43 }
 0x2df   : > { %915 = vmatpush.msra.mxu0 %v891_v44 }
 0x2e1   : > { %916 = vmatpush.msra.mxu0 %v890_v45 }
 0x2e3   : > { %v662_v46 = vpop.f32.mrf.mxu3 }
 0x2e4   : > { %v665_v47 = vsel %vm559_vm1, %v662_v46, -inf }
 0x2e5   : > { %666 = vmax.xlane.f32.xlu1 %v665_v47 }
 0x2eb   : > { %v830_v49 = vpop.f32.mrf.mxu3 }
 0x2ec   : > { %v833_v50 = vsel %vm559_vm1, %v830_v49, -inf }
 0x2ed   : > { %834 = vmax.xlane.f32.xlu2 %v833_v50  ;;  %v1316_v50 = vld [vmem:[#allocation13] ss:$0 sm:$0xff] }
 0x2f5   : > { %756 = vadd.xlane.f32.xlu2 %v755_v52 }
 0x358   : > { %v667_v53 = vpop.xlane.xlu1 %666 }
 0x359   : > { %v668_v54 = vsub.f32 %v662_v46, %v667_v53 }
 0x35b   : > { %v669_v55 = vmul.f32 1.442695, %v668_v54 }
 0x35d   : > { %1325 = vpow2.f32 %v669_v55  ;;  %v1697_v55 = vmov 32.0  }
 0x360   : > { %v835_v56 = vpop.xlane.xlu2 %834 }
 0x361   : > { %v836_v57 = vsub.f32 %v830_v49, %v835_v56 }
 0x363   : > { %v1326_v58 = vpop.eup %1325  ;;  %v837_v59 = vmul.f32 1.442695, %v836_v57 }
 0x364   : > { %v671_v60 = vsel %vm559_vm1, %v1326_v58, 0.0 }
 0x365   : > { %1327 = vpow2.f32 %v837_v59  ;;  %672 = vadd.xlane.f32.xlu2 %v671_v60 }
 0x368   : > { %v757_v63 = vpop.xlane.xlu2 %756 }
 0x369   : > { %1329 = vrcp.f32 %v757_v63  ;;  %v769_v5 = vand.u32 2147483648, %v757_v63  ;;  %vm763_vm7 = vweird.f32 %v757_v63  ;;  %v767_v6 = vand.u32 2147483647, %v757_v63 }
 0x36b   : > { %v1923_v61 = vpop.eup %1327  ;;  %v770_v10 = vor.u32 1.1754944e-38, %v769_v5  ;;  %vm768_vm9 = vcmp.eq.f32.partialorder %v767_v6, 8.507059e+37 }
 0x36c   : > { %v839_v62 = vsel %vm559_vm1, %v1923_v61, 0.0 }
 0x36d   : > { %840 = vadd.xlane.f32.xlu1 %v839_v62 }
 0x36f   : > { %v1330_v0 = vpop.eup %1329 }
 0x370   : > { %v759_v1 = vmul.f32 %v1330_v0, %v757_v63  ;;  %vm764_vm6 = vweird.f32 %v1330_v0 }
 0x371   : > { %vm765_vm8 = vmor %vm763_vm7, %vm764_vm6 }
 0x372   : > { %v760_v2 = vsub.f32 1.0, %v759_v1 }
 0x374   : > { %v761_v3 = vmul.f32 %v1330_v0, %v760_v2 }
 0x376   : > { %v762_v4 = vadd.f32 %v1330_v0, %v761_v3 }
 0x378   : > { %v766_v9 = vsel %vm765_vm8, %v1330_v0, %v762_v4 }
 0x379   : > { %v771_v11 = vsel %vm768_vm9, %v770_v10, %v766_v9 }
 0x37a   : > { %v772_v15 = vmul.f32 %v1324_v51, %v771_v11 }
 0x37d   : > { %773 = vrot.lane.b32.xlu2 %v1898_v14, %s1692_s27 }
 0x386   : > { %689 = vrot.lane.b32.xlu1 %v1898_v14, %s1693_s28 }
 0x3d8   : > { %v673_v7 = vpop.xlane.xlu2 %672 }
 0x3d9   : > { %1331 = vrcp.f32 %v673_v7  ;;  %v685_v23 = vand.u32 2147483648, %v673_v7  ;;  %vm679_vm11 = vweird.f32 %v673_v7  ;;  %v683_v24 = vand.u32 2147483647, %v673_v7 }
 0x3db   : > { %v686_v27 = vor.u32 1.1754944e-38, %v685_v23  ;;  %vm684_vm13 = vcmp.eq.f32.partialorder %v683_v24, 8.507059e+37 }
 0x3df   : > { %v1332_v12 = vpop.eup %1331 }
 0x3e0   : > { %v841_v13 = vpop.xlane.xlu1 %840  ;;  %v774_v14 = vpop.permute.xlu2 %773  ;;  %v675_v16 = vmul.f32 %v1332_v12, %v673_v7  ;;  %vm680_vm10 = vweird.f32 %v1332_v12 }
 0x3e1   : > { %1333 = vrcp.f32 %v841_v13  ;;  %794 = vmatpush.msrb.mxu1 %v774_v14  ;;  %vm681_vm12 = vmor %vm679_vm11, %vm680_vm10  ;;  %v853_v30 = vand.u32 2147483648, %v841_v13  ;;  %vm847_vm15 = vweird.f32 %v841_v13  ;;  %v851_v31 = vand.u32 2147483647, %v841_v13  ;;  %v1318_v14 = vld [vmem:[#allocation16] ss:$0 sm:$0xff] }
 0x3e2   : > { %1158 = vmatmul.msk.f32.vlgmr.msrb.gmra.mxu1 %vm559_vm1, %v772_v15  ;;  %v676_v17 = vsub.f32 1.0, %v675_v16  ;;  %1335 = vrcp.f32 %v1697_v55 }
 0x3e3   : > { %v854_v36 = vor.u32 1.1754944e-38, %v853_v30  ;;  %vm852_vm3 = vcmp.eq.f32.partialorder %v851_v31, 8.507059e+37 }
 0x3e4   : > { %v677_v19 = vmul.f32 %v1332_v12, %v676_v17 }
 0x3e6   : > { %v678_v21 = vadd.f32 %v1332_v12, %v677_v19 }
 0x3e7   : > { %v1334_v18 = vpop.eup %1333 }
 0x3e8   : > { %v843_v20 = vmul.f32 %v1334_v18, %v841_v13  ;;  %v682_v26 = vsel %vm681_vm12, %v1332_v12, %v678_v21  ;;  %vm848_vm14 = vweird.f32 %v1334_v18  ;;  %v1336_v56 = vpop.eup %1335  ;;  %v1317_v12 = vld [vmem:[#allocation14] ss:$0 sm:$0xff] }
 0x3e9   : > { %v687_v28 = vsel %vm684_vm13, %v686_v27, %v682_v26  ;;  %vm849_vm2 = vmor %vm847_vm15, %vm848_vm14  ;;  %v928_v57 = vmul.f32 32.0, %v1336_v56  ;;  %vm932_vm6 = vweird.f32 %v1336_v56 }
 0x3ea   : > { %v844_v22 = vsub.f32 1.0, %v843_v20  ;;  %v688_v33 = vmul.f32 %v1326_v58, %v687_v28 }
 0x3eb   : > { %v929_v58 = vsub.f32 1.0, %v928_v57 }
 0x3ec   : > { %v845_v25 = vmul.f32 %v1334_v18, %v844_v22 }
 0x3ed   : > { %v930_v59 = vmul.f32 %v1336_v56, %v929_v58 }
 0x3ee   : > { %v846_v29 = vadd.f32 %v1334_v18, %v845_v25 }
 0x3ef   : > { %v931_v60 = vadd.f32 %v1336_v56, %v930_v59 }
 0x3f0   : > { %v850_v35 = vsel %vm849_vm2, %v1334_v18, %v846_v29 }
 0x3f1   : > { %v855_v37 = vsel %vm852_vm3, %v854_v36, %v850_v35 }
 0x3f2   : > { %v856_v38 = vmul.f32 %v1923_v61, %v855_v37  ;;  %v933_v61 = vsel %vm932_vm6, %v1336_v56, %v931_v60 }
 0x3f8   : > { %v690_v32 = vpop.permute.xlu1 %689 }
 0x3f9   : > { %710 = vmatpush.msrb.mxu2 %v690_v32 }
 0x3fa   : > { %1155 = vmatmul.msk.f32.vlgmr.msrb.gmra.mxu2 %vm559_vm1, %v688_v33 }
 0x3fb   : > { %878 = vmatpush.msra.mxu2 %v858_v34 }
 0x402   : > { %1161 = vmatmul.msk.f32.vlgmr.msra.gmra.mxu2 %vm559_vm1, %v856_v38  ;;  %vm887_vm1 = vcmask 261312  }
 0x45f   : > { %v796_v39 = vpop.f32.mrf.mxu1 }
 0x460   : > { %800 = vrot.lane.b32.xlu1 %v796_v39, %s1694_s30 }
 0x47d   : > { %v712_v40 = vpop.f32.mrf.mxu2 }
 0x47e   : > { %716 = vrot.lane.b32.xlu0 %v712_v40, %s1695_s1 }
 0x485   : > { %v880_v41 = vpop.f32.mrf.mxu2 }
 0x486   : > { %884 = vrot.lane.b32.xlu2 %v880_v41, %s1696_s19 }
 0x4d2   : > { %v801_v47 = vpop.permute.xlu1 %800 }
 0x4e0   : > { %v885_v48 = vpop.permute.xlu2 %884 }
 0x4f0   : > { %v717_v46 = vpop.permute.xlu0 %716 }
 0x4f1   : > { %720 = vst.msk [vmem:[#allocation2] sm:$0xff] %vm719_vm4, %v717_v46 }
 0x4f2   : > { %804 = vst.msk [vmem:[#allocation2] sm:$0xff] %vm803_vm5, %v801_v47 }
 0x4f3   : > { %888 = vst.msk [vmem:[#allocation2] sm:$0xff] %vm887_vm1, %v885_v48 }
 0x4fa   : > { %v889_v49 = vld [vmem:[#allocation2] sm:$0xff] }
 0x4fb   : > { %1162 = vmatmul.msk.f32.vlgmr.msra.gmra.mxu0 %vm504_vm0, %v889_v49 }
 0x578   : > { %v918_v51 = vpop.f32.mrf.mxu0 }
 0x579   : > { %v919_v52 = vadd.f32 %v1316_v50, %v918_v51 }
 0x57b   : > { %v921_v53 = vadd.f32 %v919_v52, %v1892_v8 }
 0x57d   : > { %v924_v54 = vsel %vm504_vm0, %v921_v53, 0.0 }
 0x57e   : > { %925 = vadd.xlane.f32.xlu0 %v924_v54 }
 0x5f1   : > { %v926_v62 = vpop.xlane.xlu0 %925 }
 0x5f2   : > { %v934_v63 = vmul.f32 %v933_v61, %v926_v62 }
 0x5f4   : > { %v935_v0 = vsub.f32 %v921_v53, %v934_v63 }
 0x5f6   : > { %v936_v1 = vmul.f32 %v935_v0, %v935_v0 }
 0x5f8   : > { %v937_v8 = vsel %vm504_vm0, %v936_v1, 0.0 }
 0x5f9   : > { %938 = vadd.xlane.f32.xlu1 %v937_v8 }
 0x66c   : > { %v939_v2 = vpop.xlane.xlu1 %938 }
 0x66d   : > { %v940_v3 = vmul.f32 %v939_v2, %v933_v61 }
 0x66f   : > { %v941_v4 = vadd.f32 1e-05, %v940_v3 }
 0x671   : > { %1337 = vrsqrt.f32 %v941_v4  ;;  %vm948_vm8 = vweird.f32 %v941_v4 }
 0x677   : > { %v1338_v5 = vpop.eup %1337 }
 0x678   : > { %v943_v6 = vmul.f32 %v1338_v5, %v941_v4  ;;  %vm949_vm7 = vweird.f32 %v1338_v5 }
 0x679   : > { %vm950_vm9 = vmor %vm948_vm8, %vm949_vm7 }
 0x67a   : > { %v944_v7 = vmul.f32 %v1338_v5, %v943_v6 }
 0x67c   : > { %v945_v9 = vmul.f32 0.5, %v944_v7 }
 0x67e   : > { %v946_v10 = vsub.f32 1.5, %v945_v9 }
 0x680   : > { %v947_v11 = vmul.f32 %v1338_v5, %v946_v10 }
 0x682   : > { %v951_v13 = vsel %vm950_vm9, %v1338_v5, %v947_v11 }
 0x683   : > { %v952_v15 = vmul.f32 %v951_v13, %v935_v0 }
 0x685   : > { %v956_v16 = vmul.f32 %v1317_v12, %v952_v15 }
 0x687   : > { %v960_v17 = vadd.f32 %v1318_v14, %v956_v16 }
 0x689   : > { %961 = vst.msk [vmem:[%s491_s26] sm:$0xff] %vm504_vm0, %v960_v17 }
 0x68a PF: > { %s26_s14 = sadd.s32 1, %s1675_s14   ;;  %s1984_s30 = smov %s1659_s10 }
 0x68b   : > { %p23_p2 = scmp.ge.s32.totalorder %s26_s14, 4   ;;  %s1985_s10 = smov %s1663_s11 }
 0x68c   : > { %s1986_s11 = smov %s1861_s21  ;;  %s1987_s12 = smov %s1671_s13 }
 0x68d   : > { %s1988_s13 = smov %s1990_s24  ;;  %25 = sbr.rel (!%p23_p2) target bundleno = 13 (0xd), region = 129 }
 0x692   :  { %987 = vsyncpa [#allocation4], 1 }
 0x693   :  { %989 = vsyncpa [#allocation4 + $0x1], 1 }
 0x694   :  { %990 = vsyncpa [#allocation6], 1 }
 0x695   :  { %991 = vsyncpa [#allocation9], 1 }
 0x696   :  { %992 = vsyncpa [#allocation12], 1 }
 0x697   :  { %993 = vsyncpa [#allocation15], 1 }

// kernel: decoder_forward.8
= control target key start
LH: loop header
LB: loop body
LE: loop exit
PB: predicated region body
PF: predicated region fallthrough
CT: control target
= control target key end

     0   :  { %s2136_s0 = inlined_call_operand.vmem [shape: f32[2,8,32], index: 0, kind: input, shape index: {}]   ;;  %s2137_s1 = inlined_call_operand.hbm [shape: f32[2,16,32], index: 1, kind: input, shape index: {}]   ;;  %s2138_s2 = inlined_call_operand.hbm [shape: f32[32,32], index: 2, kind: input, shape index: {}]   ;;  %s2139_s3 = inlined_call_operand.hbm [shape: f32[1,32], index: 3, kind: input, shape index: {}]   ;;  %s2140_s4 = inlined_call_operand.hbm [shape: f32[32,64], index: 4, kind: input, shape index: {}]   ;;  %s2141_s5 = inlined_call_operand.hbm [shape: f32[1,64], index: 5, kind: input, shape index: {}]   ;;  %s2142_s6 = inlined_call_operand.hbm [shape: f32[32,32], index: 6, kind: input, shape index: {}]   ;;  %s2143_s7 = inlined_call_operand.hbm [shape: f32[1,32], index: 7, kind: input, shape index: {}]   ;;  %s2144_s8 = inlined_call_operand.hbm [shape: f32[1,32], index: 8, kind: input, shape index: {}]   ;;  %s2145_s9 = inlined_call_operand.hbm [shape: f32[1,32], index: 9, kind: input, shape index: {}]   ;;  %s2146_s10 = inlined_call_operand.vmem [shape: f32[2,8,32], index: 10, kind: output, shape index: {}]  }
   0x1   :  { %2148 = sst [smem:[#allocation22_spill]] %s2138_s2 }
   0x2   :  { %2149 = sst [smem:[#allocation23_spill]] %s2139_s3 }
   0x3   :  { %2150 = sst [smem:[#allocation24_spill]] %s2140_s4 }
   0x4   :  { %2151 = sst [smem:[#allocation25_spill]] %s2142_s6 }
   0x5   :  { %2152 = sst [smem:[#allocation26_spill]] %s2146_s10 }
   0x6   :  { %15 = vsyncpa [#allocation4], 0 }
   0x7   :  { %17 = vsyncpa [#allocation4 + $0x1], 0 }
   0x8   :  { %18 = vsyncpa [#allocation6], 0 }
   0x9   :  { %19 = vsyncpa [#allocation9], 0 }
   0xa   :  { %20 = vsyncpa [#allocation12], 0 }
   0xb   :  { %21 = vsyncpa [#allocation15], 0  ;;  %s1885_s13 = smov 0   ;;  %s1887_s14 = smov 0  }
   0xc   :  { %s1889_s15 = smov 0   ;;  %s1891_s16 = smov 0  }
   0xd   :  { %s1893_s17 = smov 0   ;;  %s1895_s18 = smov 0  }
   0xe LB: > { %s1227_s19 = sadd.s32 4294967295, %s1807_s18   ;;  %p1229_p0 = scmp.ge.s32.totalorder %s1807_s18, 1  ;;  %s1807_s18 = sphi %s1895_s18, %s27_s18   ;;  %s1803_s17 = sphi %s1893_s17, %s2168_s17   ;;  %s1799_s16 = sphi %s1891_s16, %s2167_s16   ;;  %s1795_s15 = sphi %s1889_s15, %s2166_s15   ;;  %s1791_s14 = sphi %s1887_s14, %s2165_s14   ;;  %s1787_s13 = sphi %s1885_s13, %s2164_s13  }
   0xf   : > { %p1917_p1 = scmp.eq.s32.totalorder %s1227_s19, 0  ;;  %p294_p2 = scmp.lt.s32.totalorder %s1807_s18, 3 }
  0x10   : > { %s2154_s2 = sld [smem:[#allocation22_spill]]  ;;  %s1809_s25 = smov [#allocation5]  }
  0x11   : > { %p1925_p3 = pnand %p1229_p0, %p294_p2  ;;  %s307_s26 = sshll.u32 %s1809_s25, 4  ;;  %s308_s26 = int_to_ptr.vmem [resolvable:$true] %s307_s26 }
  0x12   : > { %s2157_s4 = sld [smem:[#allocation24_spill]]  ;;  %s2147_s11 = smov 128  }
  0x13   : > { %p1311_p4 = pneg %p1925_p3  ;;  %s1811_s12 = smov 8  }
  0x14   : > { %s1812_s19 = smov [#allocation8]   ;;  %s2158_s6 = sld [smem:[#allocation25_spill]] }
  0x15   : > { %p1933_p5 = pnand %p1311_p4, %p1917_p1  ;;  %s333_s21 = sshll.u32 %s1812_s19, 4  ;;  %s334_s21 = int_to_ptr.vmem [resolvable:$true] %s333_s21 }
  0x16   : > { %s305_s23 = sshll.u32 %s2154_s2, 4  ;;  %s1813_s10 = smov [#allocation11]   ;;  %s306_s23 = int_to_ptr.hbm [resolvable:$true] %s305_s23 }
  0x17   : > { %1314 = dma.hbm_to_vmem [thread:$0]  (!%p1933_p5), %s306_s23, 512, %s308_s26, [#allocation6], %s2147_s11, %s2147_s11, %s1811_s12  }
  0x18   : > { %s331_s30 = sshll.u32 %s2157_s4, 4  ;;  %s384_s4 = sshll.u32 %s2144_s8, 4  ;;  %s332_s30 = int_to_ptr.hbm [resolvable:$true] %s331_s30  ;;  %s385_s4 = int_to_ptr.hbm [resolvable:$true] %s384_s4 }
  0x19   : > { %1320 = dma.hbm_to_vmem [thread:$0]  (!%p1933_p5), %s332_s30, 512, %s334_s21, [#allocation9], %s2147_s11, %s2147_s11, %s1811_s12  }
  0x1a   : > { %s357_s2 = sshll.u32 %s2158_s6, 4  ;;  %s359_s23 = sshll.u32 %s1813_s10, 4  ;;  %s358_s2 = int_to_ptr.hbm [resolvable:$true] %s357_s2  ;;  %s360_s23 = int_to_ptr.vmem [resolvable:$true] %s359_s23 }
  0x1b   : > { %1326 = dma.hbm_to_vmem [thread:$0]  (!%p1933_p5), %s358_s2, 512, %s360_s23, [#allocation12], %s2147_s11, %s2147_s11, %s1811_s12  }
  0x1c   : > { %s1814_s26 = smov [#allocation14]   ;;  %s2159_s3 = sld [smem:[#allocation23_spill]] }
  0x1d   : > { %s386_s19 = sshll.u32 %s1814_s26, 4  ;;  %s346_s28 = sshll.u32 %s2141_s5, 4  ;;  %s387_s19 = int_to_ptr.vmem [resolvable:$true] %s386_s19  ;;  %s347_s28 = int_to_ptr.hbm [resolvable:$true] %s346_s28 }
  0x1e   : > { %1332 = dma.hbm_to_vmem [thread:$0]  (!%p1933_p5), %s385_s4, 16, %s387_s19, [#allocation15]  }
  0x1f   : > { %s1815_s29 = smov [#allocation7]   ;;  %s1816_s2 = smov [#allocation10]  }
  0x20   : > { %s322_s6 = sshll.u32 %s1815_s29, 4  ;;  %s348_s23 = sshll.u32 %s1816_s2, 4  ;;  %s323_s6 = int_to_ptr.vmem [resolvable:$true] %s322_s6  ;;  %s349_s23 = int_to_ptr.vmem [resolvable:$true] %s348_s23 }
  0x21   : > { %s372_s4 = sshll.u32 %s2143_s7, 4  ;;  %s1818_s10 = smov [#allocation16]   ;;  %s373_s4 = int_to_ptr.hbm [resolvable:$true] %s372_s4 }
  0x22   : > { %s320_s30 = sshll.u32 %s2159_s3, 4  ;;  %s398_s29 = sshll.u32 %s1818_s10, 4  ;;  %s321_s30 = int_to_ptr.hbm [resolvable:$true] %s320_s30  ;;  %s399_s29 = int_to_ptr.vmem [resolvable:$true] %s398_s29 }
  0x23   : > { %1317 = dma.hbm_to_vmem [thread:$0]  (!%p1933_p5), %s321_s30, 16, %s323_s6, [#allocation6]  }
  0x24   : > { %1323 = dma.hbm_to_vmem [thread:$0]  (!%p1933_p5), %s347_s28, 16, %s349_s23, [#allocation9]  }
  0x25   : > { %s396_s6 = sshll.u32 %s2145_s9, 4  ;;  %s1817_s30 = smov [#allocation13]   ;;  %s397_s6 = int_to_ptr.hbm [resolvable:$true] %s396_s6 }
  0x26   : > { %s374_s21 = sshll.u32 %s1817_s30, 4  ;;  %s39_s28 = sadd.s32 1, %s1803_s17  ;;  %s375_s21 = int_to_ptr.vmem [resolvable:$true] %s374_s21 }
  0x27   : > { %1329 = dma.hbm_to_vmem [thread:$0]  (!%p1933_p5), %s373_s4, 16, %s375_s21, [#allocation12]  }
  0x28   : > { %1335 = dma.hbm_to_vmem [thread:$0]  (!%p1933_p5), %s397_s6, 16, %s399_s29, [#allocation15]  }
  0x29   : > { %s74_s2 = sadd.s32 1, %s1795_s15  ;;  %p41_p6 = scmp.ge.s32.totalorder %s39_s28, 2 }
  0x2a   : > { %p81_p7 = scmp.ne.s32.totalorder %s1795_s15, %s1791_s14  ;;  %p82_p8 = scmp.eq.s32.totalorder %s1807_s18, 0 }
  0x2b   : > { %p87_p9 = scmp.ne.s32.totalorder %s1791_s14, %s1787_s13  ;;  %s2170_s28 = smov (%p41_p6, %s39_s28), 0 }
  0x2c   : > { %p1992_p10 = por %p82_p8, %p81_p7  ;;  %s71_s26 = ssub.s32 %s1803_s17, %s2170_s28 }
  0x2d   : > { %p1998_p11 = por %p1917_p1, %p87_p9  ;;  %p1348_p12 = scmp.lt.s32.totalorder %s1807_s18, 2 }
  0x2e   : > { %p72_p13 = scmp.eq.s32.totalorder %s71_s26, 0  ;;  %s419_s22 = sand.u32 1, %s1795_s15  }
  0x2f   : > { %s1239_s4 = sshll.u32 %s419_s22, 4  ;;  %s1276_s13 = sshll.u32 %s1803_s17, 4 }
  0x30   : > { %s2007_s19 = scalar_select %p72_p13, %s1795_s15, %s74_s2  }
  0x31   : > { %s428_s30 = scalar_lea.hbm %s2137_s1, %s1276_s13  ;;  %s423_s21 = scalar_lea.vmem [#allocation3], %s1239_s4 }
  0x32   : > { %s431_s10 = sshll.u32 %s423_s21, 4  ;;  %s429_s29 = sshll.u32 %s428_s30, 4  ;;  %s432_s10 = int_to_ptr.vmem [resolvable:$true] %s431_s10  ;;  %s430_s29 = int_to_ptr.hbm [resolvable:$true] %s429_s29 }
  0x33   : > { %p1337_p0 = pnand %p1348_p12, %p1992_p10  ;;  %s420_s11 = scalar_lea.sflag [#allocation4], %s419_s22 }
  0x34   : > { %s2162_s3 = smov 128   ;;  %443 = sbr.rel (%p1925_p3) target bundleno = 2093 (0x82d), region = 60 }
  0x35   : > { %1339 = dma.hbm_to_vmem [thread:$0]  (!%p1337_p0), %s430_s29, 256, %s432_s10, %s420_s11, %s2162_s3, %s2162_s3, %s1811_s12  }
  0x36   : > { %s445_s2 = sand.u32 (!%p1925_p3), 1, %s1791_s14  }
  0x37   : > { %s2021_s26 = sshll.u32 (!%p1925_p3), %s445_s2, 4  ;;  %s446_s4 = scalar_lea.sflag (!%p1925_p3), [#allocation4], %s445_s2 }
  0x38   : > { %s449_s13 = scalar_lea.vmem (!%p1925_p3), [#allocation3], %s2021_s26 }
  0x39   : > { %1766 = dma.done.wait (%p1998_p11), %s446_s4, 256  }
  0x3a   : > { %1768 = vsyncadd (%p1998_p11), %s446_s4, 4294967040 }
  0x3b   : > { %1770 = dma.done.wait (%p1917_p1), [#allocation6], 528  }
  0x3c   : > { %1772 = vsyncadd (%p1917_p1), [#allocation6], 4294966768 }
  0x3d   : > { %1774 = dma.done.wait (%p1917_p1), [#allocation9], 528  }
  0x3e   : > { %1776 = vsyncadd (%p1917_p1), [#allocation9], 4294966768 }
  0x3f   : > { %1778 = dma.done.wait (%p1917_p1), [#allocation12], 528  }
  0x40   : > { %1780 = vsyncadd (%p1917_p1), [#allocation12], 4294966768 }
  0x41   : > { %1782 = dma.done.wait (%p1917_p1), [#allocation15], 32  }
  0x42   : > { %1784 = vsyncadd (%p1917_p1), [#allocation15], 4294967264  ;;  %p536_p2 = scmp.lt.s32.totalorder %s1799_s16, 1  ;;  %v588_v0 = vld [vmem:[#allocation8 + $0x18] sm:$0xff]  ;;  %v587_v1 = vld [vmem:[#allocation8 + $0x10] sm:$0xff]  ;;  %vm561_vm0 = vcmask 261120  }
  0x43   : > { %611 = vmatpush.msra.mxu1 %v588_v0  ;;  %v556_v2 = vld [vmem:[#allocation5 + $0x18] sm:$0xff]  ;;  %v586_v3 = vld [vmem:[#allocation8 + $0x8] sm:$0xff]  ;;  %v585_v5 = vld [vmem:[#allocation8] sm:$0xff]  ;;  %s1819_s12 = smov 120   ;;  %vm622_vm1 = vcmask 64512   ;;  %s1820_s23 = smov 96  }
  0x44   : > { %s2172_s16 = smov (!%p536_p2, %s1799_s16), 1  ;;  %577 = vmatpush.msra.mxu0 %v556_v2  ;;  %v555_v4 = vld [vmem:[#allocation5 + $0x10] sm:$0xff]  ;;  %v554_v6 = vld [vmem:[#allocation5 + $0x8] sm:$0xff]  ;;  %v553_v8 = vld [vmem:[#allocation5] sm:$0xff]  ;;  %s1821_s27 = smov 112   ;;  %vm652_vm2 = vcmask 130048  }
  0x45   : > { %s1252_s3 = sshll.u32 %s2172_s16, 3  ;;  %612 = vmatpush.msra.mxu1 %v587_v1  ;;  %v551_v7 = vld [vmem:[%s449_s13] sm:$0xff]  ;;  %v552_v10 = vld [vmem:[%s449_s13 + $0x8] sm:$0xff]  ;;  %s1822_s22 = smov 88   ;;  %vm796_vm11 = vcmask 130112  }
  0x46   : > { %s542_s11 = scalar_lea.vmem %s2136_s0, %s1252_s3  ;;  %578 = vmatpush.msra.mxu0 %v555_v4  ;;  %v1446_v11 = vld [vmem:[#allocation10] ss:$0 sm:$0xff]  ;;  %v1447_v14 = vld [vmem:[#allocation7] ss:$0 sm:$0xff]  ;;  %s1823_s25 = smov 104  }
  0x47   : > { %613 = vmatpush.msra.mxu1 %v586_v3  ;;  %v2056_v9 = vld [vmem:[%s542_s11] sm:$0xff]  ;;  %s1824_s6 = smov 72   ;;  %s1825_s30 = smov 8  }
  0x48   : > { %579 = vmatpush.msra.mxu0 %v554_v6  ;;  %s1826_s21 = smov 80   ;;  %s1827_s10 = smov 16  }
  0x49   : > { %614 = vmatpush.msra.mxu1 %v585_v5  ;;  %s1828_s29 = smov 24   ;;  %s2163_s4 = sld [smem:[#allocation26_spill]] }
  0x4a   : > { %1255 = vmatmul.msk.f32.vlgmr.msra.gmra.mxu1 %vm561_vm0, %v551_v7  ;;  %580 = vmatpush.msra.mxu0 %v553_v8 }
  0x4b   : > { %1254 = vmatmul.msk.f32.vlgmr.msra.gmra.mxu0 %vm561_vm0, %v2056_v9 }
  0x4f   : > { %s549_s13 = scalar_lea.vmem %s2163_s4, %s1252_s3 }
  0x52   : > { %1256 = vmatmul.msk.f32.gmra.mxu1 %vm561_vm0, %v552_v10 }
  0xc7   : > { %v616_v12 = vpop.f32.mrf.mxu1 }
  0xc8   : > { %v2064_v13 = vadd.f32 %v1446_v11, %v616_v12  ;;  %v582_v15 = vpop.f32.mrf.mxu0 }
  0xc9   : > { %v583_v16 = vadd.f32 %v1447_v14, %v582_v15 }
  0xca   : > { %709 = vrot.lane.b32.xlu2 %v2064_v13, %s1819_s12 }
  0xcf   : > { %v619_v17 = vpop.f32.mrf.mxu1 }
  0xd0   : > { %v620_v18 = vadd.f32 %v1446_v11, %v619_v17 }
  0xd2   : > { %1257 = vmatpush.xpose.msk.msra.mxu2 %vm622_vm1, %v620_v18  ;;  %707 = vrot.lane.b32.xlu2 %v583_v16, %s1819_s12  ;;  %v2069_v19 = vpack.i.bf16 %v2064_v13, %v620_v18 }
  0xd4   : > { %1427 = vrot.lane.b32.xlu1 %v2069_v19, %s1820_s23 }
  0xd6   : > { %1258 = vmatpush.xpose.msk.msra.mxu2 %vm622_vm1, %v2064_v13 }
  0xd9   : > { %1259 = vmatmul.msk.f32.vlgmr.msra.gmra.mxu2 %vm622_vm1, %v583_v16 }
  0xda   : > { %802 = vrot.lane.b32.xlu2 %v620_v18, %s1821_s27 }
  0xdc   : > { %711 = vrot.lane.b32.xlu1 %v620_v18, %s1819_s12 }
  0xe2   : > { %798 = vrot.lane.b32.xlu2 %v583_v16, %s1821_s27 }
  0xea   : > { %1432 = vrot.lane.b32.xlu2 %v2069_v19, %s1822_s22 }
  0xf2   : > { %893 = vrot.lane.b32.xlu2 %v620_v18, %s1823_s25 }
  0xfa   : > { %889 = vrot.lane.b32.xlu2 %v583_v16, %s1823_s25 }
 0x124   : > { %v710_v20 = vpop.permute.xlu2 %709 }
 0x12c   : > { %v708_v21 = vpop.permute.xlu2 %707 }
 0x134   : > { %v803_v22 = vpop.permute.xlu2 %802 }
 0x135   : > { %1265 = vmatpush.xpose.msk.msrb.mxu2 %vm622_vm1, %v803_v22 }
 0x13c   : > { %v799_v23 = vpop.permute.xlu2 %798 }
 0x144   : > { %v1433_v24 = vpop.permute.xlu2 %1432 }
 0x145   : > { %v1434_v25 = vunpack.i.l.bf16 %v1433_v24  ;;  %v1435_v28 = vunpack.i.h.bf16 %v1433_v24 }
 0x146   : > { %v1428_v26 = vpop.permute.xlu1 %1427 }
 0x147   : > { %786 = vmatpush.msrb.mxu0 %v1434_v25  ;;  %v1429_v27 = vunpack.i.l.bf16 %v1428_v26  ;;  %v1430_v29 = vunpack.i.h.bf16 %v1428_v26 }
 0x149   : > { %700 = vmatpush.msra.mxu3 %v1429_v27  ;;  %787 = vmatpush.msrb.mxu0 %v1435_v28 }
 0x14b   : > { %701 = vmatpush.msra.mxu3 %v1430_v29 }
 0x14c   : > { %v894_v30 = vpop.permute.xlu2 %893 }
 0x14d   : > { %1269 = vmatpush.xpose.msk.msra.mxu0 %vm622_vm1, %v894_v30 }
 0x14e   : > { %v712_v31 = vpop.permute.xlu1 %711 }
 0x14f   : > { %1261 = vmatpush.xpose.msk.msrb.mxu3 %vm622_vm1, %v712_v31 }
 0x153   : > { %1262 = vmatpush.xpose.msk.msrb.mxu3 %vm622_vm1, %v710_v20 }
 0x154   : > { %v890_v11 = vpop.permute.xlu2 %889 }
 0x15c   : > { %v649_v32 = vpop.f32.mrf.mxu2 }
 0x15d   : > { %v653_v33 = vsel %vm652_vm2, %v649_v32, -inf }
 0x15e   : > { %654 = vmax.xlane.f32.xlu0 %v653_v33 }
 0x1d1   : > { %v655_v34 = vpop.xlane.xlu0 %654 }
 0x1d2   : > { %v656_v35 = vsub.f32 %v649_v32, %v655_v34 }
 0x1d4   : > { %v657_v36 = vmul.f32 1.442695, %v656_v35 }
 0x1d6   : > { %1451 = vpow2.f32 %v657_v36 }
 0x1dc   : > { %v1452_v37 = vpop.eup %1451 }
 0x1dd   : > { %v659_v38 = vsel %vm652_vm2, %v1452_v37, 0.0 }
 0x1de   : > { %660 = vadd.xlane.f32.xlu0 %v659_v38 }
 0x251   : > { %v661_v39 = vpop.xlane.xlu0 %660 }
 0x252   : > { %1453 = vrcp.f32 %v661_v39  ;;  %v673_v43 = vand.u32 2147483648, %v661_v39  ;;  %v671_v45 = vand.u32 2147483647, %v661_v39  ;;  %vm667_vm4 = vweird.f32 %v661_v39 }
 0x254   : > { %v674_v47 = vor.u32 1.1754944e-38, %v673_v43  ;;  %vm672_vm6 = vcmp.eq.f32.partialorder %v671_v45, 8.507059e+37 }
 0x258   : > { %v1454_v40 = vpop.eup %1453 }
 0x259   : > { %v663_v41 = vmul.f32 %v1454_v40, %v661_v39  ;;  %vm668_vm3 = vweird.f32 %v1454_v40 }
 0x25a   : > { %vm669_vm5 = vmor %vm667_vm4, %vm668_vm3 }
 0x25b   : > { %v664_v42 = vsub.f32 1.0, %v663_v41 }
 0x25d   : > { %v665_v44 = vmul.f32 %v1454_v40, %v664_v42 }
 0x25f   : > { %v666_v46 = vadd.f32 %v1454_v40, %v665_v44 }
 0x261   : > { %v670_v48 = vsel %vm669_vm5, %v1454_v40, %v666_v46 }
 0x262   : > { %v675_v49 = vsel %vm672_vm6, %v674_v47, %v670_v48  ;;  %vm887_vm6 = vcmask 195712  }
 0x263   : > { %v676_v50 = vmul.f32 %v1452_v37, %v675_v49 }
 0x265   : > { %1260 = vmatmul.msk.f32.vlgmr.msra.gmra.mxu3 %vm652_vm2, %v676_v50 }
 0x26d   : > { %1263 = vmatmul.msk.f32.vlgmr.msrb.gmra.mxu3 %vm622_vm1, %v708_v21 }
 0x2e8   : > { %v703_v51 = vpop.f32.mrf.mxu3 }
 0x2e9   : > { %706 = vst.msk [vmem:[#allocation2] sm:$0xff] %vm622_vm1, %v703_v51 }
 0x2f0   : > { %v736_v52 = vpop.f32.mrf.mxu3 }
 0x2f1   : > { %v739_v53 = vsel %vm652_vm2, %v736_v52, -inf }
 0x2f2   : > { %740 = vmax.xlane.f32.xlu0 %v739_v53 }
 0x306   : > { %800 = vrot.lane.b32.xlu0 %v2064_v13, %s1821_s27 }
 0x30e   : > { %891 = vrot.lane.b32.xlu0 %v2064_v13, %s1823_s25 }
 0x365   : > { %v741_v54 = vpop.xlane.xlu0 %740 }
 0x366   : > { %v742_v55 = vsub.f32 %v736_v52, %v741_v54 }
 0x368   : > { %v743_v56 = vmul.f32 1.442695, %v742_v55 }
 0x36a   : > { %1455 = vpow2.f32 %v743_v56 }
 0x370   : > { %v1456_v57 = vpop.eup %1455 }
 0x371   : > { %v745_v58 = vsel %vm652_vm2, %v1456_v57, 0.0 }
 0x372   : > { %746 = vadd.xlane.f32.xlu1 %v745_v58 }
 0x378   : > { %v801_v59 = vpop.permute.xlu0 %800 }
 0x379   : > { %1266 = vmatpush.xpose.msk.msrb.mxu2 %vm622_vm1, %v801_v59  ;;  %v984_v59 = vld [vmem:[#allocation11 + $0x18] sm:$0xff] }
 0x37c   : > { %1267 = vmatmul.msk.f32.vlgmr.msrb.gmra.mxu2 %vm622_vm1, %v799_v23 }
 0x37d   : > { %1004 = vmatpush.msra.mxu2 %v984_v59 }
 0x380   : > { %v892_v60 = vpop.permute.xlu0 %891 }
 0x381   : > { %1270 = vmatpush.xpose.msk.msra.mxu0 %vm622_vm1, %v892_v60  ;;  %v983_v60 = vld [vmem:[#allocation11 + $0x10] sm:$0xff] }
 0x382   : > { %1005 = vmatpush.msra.mxu2 %v983_v60 }
 0x3e5   : > { %v747_v61 = vpop.xlane.xlu1 %746 }
 0x3e6   : > { %1457 = vrcp.f32 %v747_v61  ;;  %v759_v1 = vand.u32 2147483648, %v747_v61  ;;  %v757_v3 = vand.u32 2147483647, %v747_v61  ;;  %vm753_vm8 = vweird.f32 %v747_v61 }
 0x3e8   : > { %v760_v5 = vor.u32 1.1754944e-38, %v759_v1  ;;  %vm758_vm10 = vcmp.eq.f32.partialorder %v757_v3, 8.507059e+37 }
 0x3ec   : > { %v1458_v62 = vpop.eup %1457 }
 0x3ed   : > { %v749_v63 = vmul.f32 %v1458_v62, %v747_v61  ;;  %vm754_vm7 = vweird.f32 %v1458_v62  ;;  %v982_v61 = vld [vmem:[#allocation11 + $0x8] sm:$0xff] }
 0x3ee   : > { %vm755_vm9 = vmor %vm753_vm8, %vm754_vm7  ;;  %1006 = vmatpush.msra.mxu2 %v982_v61  ;;  %vm978_vm7 = vcmask 261312  }
 0x3ef   : > { %v750_v0 = vsub.f32 1.0, %v749_v63 }
 0x3f1   : > { %v751_v2 = vmul.f32 %v1458_v62, %v750_v0 }
 0x3f3   : > { %v752_v4 = vadd.f32 %v1458_v62, %v751_v2  ;;  %v1448_v2 = vld [vmem:[#allocation13] ss:$0 sm:$0xff] }
 0x3f5   : > { %v756_v6 = vsel %vm755_vm9, %v1458_v62, %v752_v4  ;;  %v981_v62 = vld [vmem:[#allocation11] sm:$0xff] }
 0x3f6   : > { %v761_v7 = vsel %vm758_vm10, %v760_v5, %v756_v6  ;;  %1007 = vmatpush.msra.mxu2 %v981_v62 }
 0x3f7   : > { %v762_v8 = vmul.f32 %v1456_v57, %v761_v7  ;;  %v1829_v7 = vmov 32.0  }
 0x3f9   : > { %1264 = vmatmul.msk.f32.vlgmr.msrb.gmra.mxu0 %vm652_vm2, %v762_v8 }
 0x3ff   : > { %v827_v10 = vpop.f32.mrf.mxu2 }
 0x400   : > { %v830_v12 = vsel %vm652_vm2, %v827_v10, -inf }
 0x401   : > { %831 = vmax.xlane.f32.xlu0 %v830_v12  ;;  %1271 = vmatmul.msk.f32.vlgmr.msra.gmra.mxu0 %vm622_vm1, %v890_v11 }
 0x415   : > { %1442 = vrot.lane.b32.xlu0 %v2069_v19, %s1824_s6 }
 0x474   : > { %v832_v13 = vpop.xlane.xlu0 %831 }
 0x475   : > { %v833_v14 = vsub.f32 %v827_v10, %v832_v13 }
 0x476   : > { %v789_v15 = vpop.f32.mrf.mxu0 }
 0x477   : > { %v834_v16 = vmul.f32 1.442695, %v833_v14 }
 0x479   : > { %1459 = vpow2.f32 %v834_v16 }
 0x47e   : > { %v918_v17 = vpop.f32.mrf.mxu0 }
 0x47f   : > { %v1460_v18 = vpop.eup %1459  ;;  %v921_v20 = vsel %vm652_vm2, %v918_v17, -inf }
 0x480   : > { %922 = vmax.xlane.f32.xlu2 %v921_v20  ;;  %v836_v21 = vsel %vm652_vm2, %v1460_v18, 0.0 }
 0x481   : > { %837 = vadd.xlane.f32.xlu1 %v836_v21 }
 0x487   : > { %v1443_v22 = vpop.permute.xlu0 %1442 }
 0x488   : > { %v1444_v23 = vunpack.i.l.bf16 %v1443_v22  ;;  %v1445_v24 = vunpack.i.h.bf16 %v1443_v22 }
 0x48a   : > { %968 = vmatpush.msrb.mxu1 %v1444_v23 }
 0x48c   : > { %969 = vmatpush.msrb.mxu1 %v1445_v24 }
 0x498   : > { %793 = vrot.lane.b32.xlu2 %v789_v15, %s1825_s30 }
 0x4f3   : > { %v923_v25 = vpop.xlane.xlu2 %922 }
 0x4f4   : > { %v924_v26 = vsub.f32 %v918_v17, %v923_v25  ;;  %v838_v31 = vpop.xlane.xlu1 %837 }
 0x4f5   : > { %v850_v48 = vand.u32 2147483648, %v838_v31  ;;  %vm844_vm3 = vweird.f32 %v838_v31  ;;  %v848_v49 = vand.u32 2147483647, %v838_v31 }
 0x4f6   : > { %v925_v27 = vmul.f32 1.442695, %v924_v26 }
 0x4f7   : > { %v851_v51 = vor.u32 1.1754944e-38, %v850_v48  ;;  %vm849_vm5 = vcmp.eq.f32.partialorder %v848_v49, 8.507059e+37 }
 0x4f8   : > { %1461 = vpow2.f32 %v925_v27 }
 0x4f9   : > { %1463 = vrcp.f32 %v838_v31 }
 0x4fb   : > { %v794_v28 = vpop.permute.xlu2 %793 }
 0x4fc   : > { %797 = vst.msk [vmem:[#allocation2] sm:$0xff] %vm796_vm11, %v794_v28 }
 0x4fe   : > { %v1462_v29 = vpop.eup %1461 }
 0x4ff   : > { %v927_v30 = vsel %vm652_vm2, %v1462_v29, 0.0  ;;  %v1464_v33 = vpop.eup %1463 }
 0x500   : > { %928 = vadd.xlane.f32.xlu1 %v927_v30  ;;  %v840_v34 = vmul.f32 %v1464_v33, %v838_v31  ;;  %vm845_vm1 = vweird.f32 %v1464_v33  ;;  %v1450_v31 = vld [vmem:[#allocation16] ss:$0 sm:$0xff] }
 0x501   : > { %vm846_vm4 = vmor %vm844_vm3, %vm845_vm1 }
 0x502   : > { %v841_v37 = vsub.f32 1.0, %v840_v34 }
 0x504   : > { %v842_v42 = vmul.f32 %v1464_v33, %v841_v37 }
 0x506   : > { %v843_v46 = vadd.f32 %v1464_v33, %v842_v42 }
 0x508   : > { %v847_v50 = vsel %vm846_vm4, %v1464_v33, %v843_v46 }
 0x509   : > { %v852_v53 = vsel %vm849_vm5, %v851_v51, %v847_v50 }
 0x50a   : > { %v853_v56 = vmul.f32 %v1460_v18, %v852_v53 }
 0x519   : > { %1437 = vrot.lane.b32.xlu1 %v2069_v19, %s1826_s21 }
 0x573   : > { %v929_v32 = vpop.xlane.xlu1 %928 }
 0x574   : > { %1465 = vrcp.f32 %v929_v32  ;;  %v941_v39 = vand.u32 2147483648, %v929_v32  ;;  %v939_v41 = vand.u32 2147483647, %v929_v32  ;;  %vm935_vm13 = vweird.f32 %v929_v32 }
 0x575   : > { %1467 = vrcp.f32 %v1829_v7 }
 0x576   : > { %v942_v44 = vor.u32 1.1754944e-38, %v941_v39  ;;  %vm940_vm15 = vcmp.eq.f32.partialorder %v939_v41, 8.507059e+37 }
 0x57a   : > { %v1466_v35 = vpop.eup %1465 }
 0x57b   : > { %v931_v36 = vmul.f32 %v1466_v35, %v929_v32  ;;  %vm936_vm12 = vweird.f32 %v1466_v35  ;;  %v1468_v8 = vpop.eup %1467 }
 0x57c   : > { %vm937_vm14 = vmor %vm935_vm13, %vm936_vm12  ;;  %v1019_v10 = vmul.f32 32.0, %v1468_v8 }
 0x57d   : > { %v932_v38 = vsub.f32 1.0, %v931_v36 }
 0x57e   : > { %v1020_v11 = vsub.f32 1.0, %v1019_v10 }
 0x57f   : > { %v933_v40 = vmul.f32 %v1466_v35, %v932_v38 }
 0x580   : > { %v1021_v12 = vmul.f32 %v1468_v8, %v1020_v11 }
 0x581   : > { %v934_v43 = vadd.f32 %v1466_v35, %v933_v40 }
 0x582   : > { %v1022_v13 = vadd.f32 %v1468_v8, %v1021_v12 }
 0x583   : > { %v938_v19 = vsel %vm937_vm14, %v1466_v35, %v934_v43 }
 0x584   : > { %v943_v45 = vsel %vm940_vm15, %v942_v44, %v938_v19 }
 0x585   : > { %v944_v47 = vmul.f32 %v1462_v29, %v943_v45  ;;  %v1449_v29 = vld [vmem:[#allocation14] ss:$0 sm:$0xff] }
 0x587   : > { %1272 = vmatmul.msk.f32.vlgmr.msrb.gmra.mxu1 %vm652_vm2, %v944_v47 }
 0x58b   : > { %v1438_v52 = vpop.permute.xlu1 %1437 }
 0x58c   : > { %v1439_v54 = vunpack.i.l.bf16 %v1438_v52  ;;  %v1440_v55 = vunpack.i.h.bf16 %v1438_v52 }
 0x58e   : > { %877 = vmatpush.msra.mxu3 %v1439_v54 }
 0x590   : > { %878 = vmatpush.msra.mxu3 %v1440_v55 }
 0x591   : > { %1268 = vmatmul.msk.f32.vlgmr.msra.gmra.mxu3 %vm652_vm2, %v853_v56  ;;  %vm1023_vm2 = vweird.f32 %v1468_v8 }
 0x592   : > { %v1024_v14 = vsel %vm1023_vm2, %v1468_v8, %v1022_v13 }
 0x604   : > { %v971_v58 = vpop.f32.mrf.mxu1 }
 0x614   : > { %v880_v57 = vpop.f32.mrf.mxu3 }
 0x615   : > { %884 = vrot.lane.b32.xlu1 %v880_v57, %s1827_s10 }
 0x61d   : > { %975 = vrot.lane.b32.xlu1 %v971_v58, %s1828_s29 }
 0x687   : > { %v885_v63 = vpop.permute.xlu1 %884 }
 0x688   : > { %888 = vst.msk [vmem:[#allocation2] sm:$0xff] %vm887_vm6, %v885_v63 }
 0x68f   : > { %v976_v0 = vpop.permute.xlu1 %975 }
 0x690   : > { %979 = vst.msk [vmem:[#allocation2] sm:$0xff] %vm978_vm7, %v976_v0 }
 0x697   : > { %v980_v1 = vld [vmem:[#allocation2] sm:$0xff] }
 0x698   : > { %1273 = vmatmul.msk.f32.vlgmr.msra.gmra.mxu2 %vm561_vm0, %v980_v1 }
 0x71b   : > { %v1009_v3 = vpop.f32.mrf.mxu2 }
 0x71c   : > { %v1010_v4 = vadd.f32 %v1448_v2, %v1009_v3 }
 0x71e   : > { %v1012_v5 = vadd.f32 %v1010_v4, %v2056_v9 }
 0x720   : > { %v1015_v6 = vsel %vm561_vm0, %v1012_v5, 0.0 }
 0x721   : > { %1016 = vadd.xlane.f32.xlu0 %v1015_v6 }
 0x794   : > { %v1017_v15 = vpop.xlane.xlu0 %1016 }
 0x795   : > { %v1025_v16 = vmul.f32 %v1024_v14, %v1017_v15 }
 0x797   : > { %v1026_v17 = vsub.f32 %v1012_v5, %v1025_v16 }
 0x799   : > { %v1027_v18 = vmul.f32 %v1026_v17, %v1026_v17 }
 0x79b   : > { %v1028_v20 = vsel %vm561_vm0, %v1027_v18, 0.0 }
 0x79c   : > { %1029 = vadd.xlane.f32.xlu1 %v1028_v20 }
 0x80f   : > { %v1030_v9 = vpop.xlane.xlu1 %1029 }
 0x810   : > { %v1031_v21 = vmul.f32 %v1030_v9, %v1024_v14 }
 0x812   : > { %v1032_v22 = vadd.f32 1e-05, %v1031_v21 }
 0x814   : > { %1469 = vrsqrt.f32 %v1032_v22  ;;  %vm1039_vm9 = vweird.f32 %v1032_v22 }
 0x81a   : > { %v1470_v23 = vpop.eup %1469 }
 0x81b   : > { %v1034_v24 = vmul.f32 %v1470_v23, %v1032_v22  ;;  %vm1040_vm8 = vweird.f32 %v1470_v23 }
 0x81c   : > { %vm1041_vm10 = vmor %vm1039_vm9, %vm1040_vm8 }
 0x81d   : > { %v1035_v25 = vmul.f32 %v1470_v23, %v1034_v24 }
 0x81f   : > { %v1036_v26 = vmul.f32 0.5, %v1035_v25 }
 0x821   : > { %v1037_v27 = vsub.f32 1.5, %v1036_v26 }
 0x823   : > { %v1038_v28 = vmul.f32 %v1470_v23, %v1037_v27 }
 0x825   : > { %v1042_v30 = vsel %vm1041_vm10, %v1470_v23, %v1038_v28 }
 0x826   : > { %v1043_v32 = vmul.f32 %v1042_v30, %v1026_v17 }
 0x828   : > { %v1047_v33 = vmul.f32 %v1449_v29, %v1043_v32 }
 0x82a   : > { %v1051_v34 = vadd.f32 %v1450_v31, %v1047_v33 }
 0x82c   : > { %1052 = vst.msk [vmem:[%s549_s13] sm:$0xff] %vm561_vm0, %v1051_v34 }
 0x82d PF: > { %s27_s18 = sadd.s32 1, %s1807_s18   ;;  %s2164_s13 = smov %s1791_s14 }
 0x82e   : > { %p24_p1 = scmp.ge.s32.totalorder %s27_s18, 4   ;;  %s2165_s14 = smov %s1795_s15 }
 0x82f   : > { %s2166_s15 = smov %s2007_s19  ;;  %s2167_s16 = smov %s1803_s17 }
 0x830   : > { %s2168_s17 = smov %s2170_s28  ;;  %26 = sbr.rel (!%p24_p1) target bundleno = 14 (0xe), region = 135 }
 0x835   :  { %1078 = vsyncpa [#allocation4], 1 }
 0x836   :  { %1080 = vsyncpa [#allocation4 + $0x1], 1 }
 0x837   :  { %1081 = vsyncpa [#allocation6], 1 }
 0x838   :  { %1082 = vsyncpa [#allocation9], 1 }
 0x839   :  { %1083 = vsyncpa [#allocation12], 1 }
 0x83a   :  { %1084 = vsyncpa [#allocation15], 1 }

// kernel: decoder_forward.10
= control target key start
LH: loop header
LB: loop body
LE: loop exit
PB: predicated region body
PF: predicated region fallthrough
CT: control target
= control target key end

     0   :  { %14 = vsyncpa [#allocation4], 0  ;;  %s1369_s0 = inlined_call_operand.vmem [shape: f32[2,8,32], index: 0, kind: input, shape index: {}]   ;;  %s1370_s1 = inlined_call_operand.vmem [shape: f32[32,32], index: 1, kind: input, shape index: {}]   ;;  %s1371_s2 = inlined_call_operand.vmem [shape: f32[1,32], index: 2, kind: input, shape index: {}]   ;;  %s1372_s3 = inlined_call_operand.vmem [shape: f32[32,64], index: 3, kind: input, shape index: {}]   ;;  %s1373_s4 = inlined_call_operand.vmem [shape: f32[1,64], index: 4, kind: input, shape index: {}]   ;;  %s1374_s5 = inlined_call_operand.hbm [shape: f32[32,32], index: 5, kind: input, shape index: {}]   ;;  %s1375_s6 = inlined_call_operand.vmem [shape: f32[1,32], index: 6, kind: input, shape index: {}]   ;;  %s1376_s7 = inlined_call_operand.vmem [shape: f32[1,32], index: 7, kind: input, shape index: {}]   ;;  %s1377_s8 = inlined_call_operand.hbm [shape: f32[1,32], index: 8, kind: input, shape index: {}]   ;;  %s1378_s9 = inlined_call_operand.vmem [shape: f32[2,8,32], index: 9, kind: output, shape index: {}]  }
   0x1   :  { %15 = vsyncpa [#allocation6], 0  ;;  %s1214_s30 = smov 0   ;;  %s1216_s10 = smov 0  }
   0x2   :  { %s1218_s11 = smov 0  }
   0x3 LB: > { %s946_s12 = sadd.s32 4294967295, %s1147_s11   ;;  %s33_s13 = sadd.s32 1, %s1143_s10  ;;  %s1147_s11 = sphi %s1218_s11, %s21_s11   ;;  %s1143_s10 = sphi %s1216_s10, %s1382_s10   ;;  %s1139_s30 = sphi %s1214_s30, %s1381_s30  }
   0x4   : > { %p35_p0 = scmp.ge.s32.totalorder %s33_s13, 2  ;;  %p948_p1 = scmp.ge.s32.totalorder %s1147_s11, 1 }
   0x5   : > { %p260_p2 = scmp.lt.s32.totalorder %s1147_s11, 3  ;;  %p1239_p4 = scmp.eq.s32.totalorder %s946_s12, 0 }
   0x6   : > { %s1384_s13 = smov (%p35_p0, %s33_s13), 0  ;;  %s283_s18 = sshll.u32 %s1374_s5, 4  ;;  %s284_s18 = int_to_ptr.hbm [resolvable:$true] %s283_s18 }
   0x7   : > { %p1235_p3 = pnand %p948_p1, %p260_p2  ;;  %s1149_s19 = smov [#allocation3]  }
   0x8   : > { %s285_s20 = sshll.u32 %s1149_s19, 4  ;;  %s304_s23 = sshll.u32 %s1377_s8, 4  ;;  %s286_s20 = int_to_ptr.vmem [resolvable:$true] %s285_s20  ;;  %s305_s23 = int_to_ptr.hbm [resolvable:$true] %s304_s23 }
   0x9   : > { %p982_p5 = pneg %p1235_p3  ;;  %s1150_s24 = smov 128  }
   0xa   : > { %s1151_s25 = smov 8   ;;  %s1152_s26 = smov [#allocation5]  }
   0xb   : > { %p983_p6 = pnand %p1239_p4, %p982_p5  ;;  %s306_s27 = sshll.u32 %s1152_s26, 4  ;;  %s307_s27 = int_to_ptr.vmem [resolvable:$true] %s306_s27 }
   0xc   : > { %326 = sbr.rel (%p1235_p3) target bundleno = 1630 (0x65e), region = 56 }
   0xd   : > { %985 = dma.hbm_to_vmem [thread:$0]  (!%p983_p6), %s284_s18, 512, %s286_s20, [#allocation4], %s1150_s24, %s1150_s24, %s1151_s25  }
   0xe   : > { %988 = dma.hbm_to_vmem [thread:$0]  (!%p983_p6), %s305_s23, 16, %s307_s27, [#allocation6]  }
  0x11   : > { %1130 = dma.done.wait (%p1239_p4), [#allocation4], 512  }
  0x12   : > { %1132 = vsyncadd (%p1239_p4), [#allocation4], 4294966784 }
  0x13   : > { %1134 = dma.done.wait (%p1239_p4), [#allocation6], 16  }
  0x14   : > { %1136 = vsyncadd (%p1239_p4), [#allocation6], 4294967280  ;;  %p369_p7 = scmp.lt.s32.totalorder %s1139_s30, 1  ;;  %v387_v0 = vld [vmem:[%s1370_s1 + $0x18] sm:$0xff]  ;;  %v386_v2 = vld [vmem:[%s1370_s1 + $0x10] sm:$0xff]  ;;  %vm392_vm0 = vcmask 261120  }
  0x15   : > { %v419_v1 = vld [vmem:[%s1372_s3 + $0x18] sm:$0xff]  ;;  %408 = vmatpush.msra.mxu0 %v387_v0  ;;  %v418_v3 = vld [vmem:[%s1372_s3 + $0x10] sm:$0xff]  ;;  %v385_v4 = vld [vmem:[%s1370_s1 + $0x8] sm:$0xff]  ;;  %vm447_vm1 = vcmask 64512   ;;  %s1153_s19 = smov 120   ;;  %s1154_s20 = smov 96  }
  0x16   : > { %s1386_s30 = smov (!%p369_p7, %s1139_s30), 1  ;;  %439 = vmatpush.msra.mxu1 %v419_v1  ;;  %v417_v5 = vld [vmem:[%s1372_s3 + $0x8] sm:$0xff]  ;;  %v384_v6 = vld [vmem:[%s1370_s1] sm:$0xff]  ;;  %s1155_s21 = smov 104  }
  0x17   : > { %s955_s28 = sshll.u32 %s1386_s30, 3  ;;  %409 = vmatpush.msra.mxu0 %v386_v2  ;;  %v416_v7 = vld [vmem:[%s1372_s3] sm:$0xff]  ;;  %s1156_s22 = smov 112  }
  0x18   : > { %s372_s29 = scalar_lea.vmem %s1369_s0, %s955_s28  ;;  %440 = vmatpush.msra.mxu1 %v418_v3  ;;  %v1032_v9 = vld [vmem:[%s1371_s2] ss:$0 sm:$0xff]  ;;  %s1157_s23 = smov 72  }
  0x19   : > { %410 = vmatpush.msra.mxu0 %v385_v4  ;;  %v1297_v8 = vld [vmem:[%s372_s29] sm:$0xff]  ;;  %s1158_s24 = smov 80   ;;  %s1159_s25 = smov 88  }
  0x1a   : > { %441 = vmatpush.msra.mxu1 %v417_v5  ;;  %v1033_v10 = vld [vmem:[%s1373_s4] ss:$0 sm:$0xff]  ;;  %s1160_s26 = smov 16   ;;  %s1161_s27 = smov 8  }
  0x1b   : > { %411 = vmatpush.msra.mxu0 %v384_v6  ;;  %s1162_s29 = smov 24  }
  0x1c   : > { %442 = vmatpush.msra.mxu1 %v416_v7  ;;  %957 = vmatmul.msk.f32.vlgmr.msra.gmra.mxu0 %vm392_vm0, %v1297_v8 }
  0x1d   : > { %958 = vmatmul.msk.f32.vlgmr.msra.gmra.mxu1 %vm392_vm0, %v1297_v8 }
  0x99   : > { %v413_v11 = vpop.f32.mrf.mxu0 }
  0x9a   : > { %v444_v12 = vpop.f32.mrf.mxu1  ;;  %v414_v13 = vadd.f32 %v1032_v9, %v413_v11 }
  0x9b   : > { %v1309_v14 = vadd.f32 %v1033_v10, %v444_v12 }
  0x9c   : > { %525 = vrot.lane.b32.xlu2 %v414_v13, %s1153_s19 }
  0x9d   : > { %498 = vrot.lane.b32.xlu1 %v1309_v14, %s1154_s20  ;;  %959 = vmatpush.xpose.msk.msra.mxu2 %vm447_vm1, %v1309_v14 }
  0xa0   : > { %960 = vmatmul.msk.f32.vlgmr.msra.gmra.mxu2 %vm447_vm1, %v414_v13 }
  0xa4   : > { %695 = vrot.lane.b32.xlu2 %v1309_v14, %s1155_s21 }
  0xa5   : > { %527 = vrot.lane.b32.xlu1 %v1309_v14, %s1153_s19  ;;  %s379_s19 = scalar_lea.vmem %s1378_s9, %s955_s28 }
  0xac   : > { %609 = vrot.lane.b32.xlu2 %v414_v13, %s1156_s22 }
  0xad   : > { %611 = vrot.lane.b32.xlu1 %v1309_v14, %s1156_s22 }
  0xf6   : > { %v526_v15 = vpop.permute.xlu2 %525 }
  0xfe   : > { %v696_v18 = vpop.permute.xlu2 %695 }
 0x106   : > { %v610_v20 = vpop.permute.xlu2 %609 }
 0x10f   : > { %v499_v16 = vpop.permute.xlu1 %498 }
 0x110   : > { %519 = vmatpush.msra.mxu3 %v499_v16 }
 0x117   : > { %v528_v17 = vpop.permute.xlu1 %527 }
 0x118   : > { %962 = vmatpush.xpose.msk.msrb.mxu3 %vm447_vm1, %v528_v17 }
 0x11f   : > { %v612_v19 = vpop.permute.xlu1 %611 }
 0x120   : > { %965 = vmatpush.xpose.msk.msrb.mxu0 %vm447_vm1, %v612_v19 }
 0x123   : > { %966 = vmatmul.msk.f32.vlgmr.msrb.gmra.mxu0 %vm447_vm1, %v610_v20  ;;  %v471_v21 = vpop.f32.mrf.mxu2 }
 0x124   : > { %v474_v22 = vsel %vm447_vm1, %v471_v21, -inf }
 0x125   : > { %475 = vmax.xlane.f32.xlu0 %v474_v22 }
 0x198   : > { %v476_v23 = vpop.xlane.xlu0 %475 }
 0x199   : > { %v477_v24 = vsub.f32 %v471_v21, %v476_v23 }
 0x19b   : > { %v478_v25 = vmul.f32 1.442695, %v477_v24 }
 0x19d   : > { %1037 = vpow2.f32 %v478_v25 }
 0x1a0   : > { %v634_v28 = vpop.f32.mrf.mxu0 }
 0x1a1   : > { %v637_v29 = vsel %vm447_vm1, %v634_v28, -inf }
 0x1a3   : > { %v1038_v26 = vpop.eup %1037 }
 0x1a4   : > { %v480_v27 = vsel %vm447_vm1, %v1038_v26, 0.0 }
 0x1a5   : > { %481 = vadd.xlane.f32.xlu0 %v480_v27 }
 0x1b9   : > { %693 = vrot.lane.b32.xlu0 %v414_v13, %s1155_s21 }
 0x1e3   : > { %638 = vmax.xlane.f32.xlu0 %v637_v29 }
 0x1f7   : > { %745 = vrot.lane.b32.xlu0 %v1309_v14, %s1157_s23 }
 0x218   : > { %v482_v30 = vpop.xlane.xlu0 %481 }
 0x219   : > { %1039 = vrcp.f32 %v482_v30  ;;  %v494_v34 = vand.u32 2147483648, %v482_v30  ;;  %v492_v36 = vand.u32 2147483647, %v482_v30  ;;  %vm488_vm3 = vweird.f32 %v482_v30 }
 0x21b   : > { %v495_v38 = vor.u32 1.1754944e-38, %v494_v34  ;;  %vm493_vm5 = vcmp.eq.f32.partialorder %v492_v36, 8.507059e+37 }
 0x21f   : > { %v1040_v31 = vpop.eup %1039 }
 0x220   : > { %v484_v32 = vmul.f32 %v1040_v31, %v482_v30  ;;  %vm489_vm2 = vweird.f32 %v1040_v31 }
 0x221   : > { %vm490_vm4 = vmor %vm488_vm3, %vm489_vm2 }
 0x222   : > { %v485_v33 = vsub.f32 1.0, %v484_v32 }
 0x224   : > { %v486_v35 = vmul.f32 %v1040_v31, %v485_v33 }
 0x226   : > { %v487_v37 = vadd.f32 %v1040_v31, %v486_v35 }
 0x228   : > { %v491_v39 = vsel %vm490_vm4, %v1040_v31, %v487_v37  ;;  %vm607_vm4 = vcmask 130112  }
 0x229   : > { %v496_v40 = vsel %vm493_vm5, %v495_v38, %v491_v39  ;;  %vm691_vm5 = vcmask 195712  }
 0x22a   : > { %v497_v41 = vmul.f32 %v1038_v26, %v496_v40 }
 0x22b   : > { %v694_v42 = vpop.permute.xlu0 %693 }
 0x22c   : > { %961 = vmatmul.msk.f32.vlgmr.msra.gmra.mxu3 %vm447_vm1, %v497_v41 }
 0x22d   : > { %968 = vmatpush.xpose.msk.msra.mxu3 %vm447_vm1, %v696_v18 }
 0x234   : > { %963 = vmatmul.msk.f32.vlgmr.msrb.gmra.mxu3 %vm447_vm1, %v526_v15 }
 0x23c   : > { %969 = vmatmul.msk.f32.vlgmr.msra.gmra.mxu3 %vm447_vm1, %v694_v42  ;;  %v781_v42 = vld [vmem:[#allocation3 + $0x18] sm:$0xff] }
 0x23d   : > { %801 = vmatpush.msra.mxu0 %v781_v42 }
 0x256   : > { %v639_v44 = vpop.xlane.xlu0 %638 }
 0x257   : > { %v640_v45 = vsub.f32 %v634_v28, %v639_v44  ;;  %v779_v44 = vld [vmem:[#allocation3 + $0x8] sm:$0xff] }
 0x259   : > { %v641_v48 = vmul.f32 1.442695, %v640_v45  ;;  %v778_v45 = vld [vmem:[#allocation3] sm:$0xff] }
 0x25b   : > { %1041 = vpow2.f32 %v641_v48 }
 0x261   : > { %v1042_v51 = vpop.eup %1041 }
 0x262   : > { %v643_v52 = vsel %vm447_vm1, %v1042_v51, 0.0 }
 0x269   : > { %v746_v34 = vpop.permute.xlu0 %745 }
 0x2af   : > { %v521_v43 = vpop.f32.mrf.mxu3 }
 0x2b0   : > { %524 = vst.msk [vmem:[#allocation2] sm:$0xff] %vm447_vm1, %v521_v43  ;;  %v780_v43 = vld [vmem:[#allocation3 + $0x10] sm:$0xff] }
 0x2b1   : > { %802 = vmatpush.msra.mxu0 %v780_v43 }
 0x2b3   : > { %803 = vmatpush.msra.mxu0 %v779_v44 }
 0x2b5   : > { %804 = vmatpush.msra.mxu0 %v778_v45 }
 0x2b7   : > { %v550_v46 = vpop.f32.mrf.mxu3 }
 0x2b8   : > { %v553_v47 = vsel %vm447_vm1, %v550_v46, -inf }
 0x2b9   : > { %554 = vmax.xlane.f32.xlu1 %v553_v47 }
 0x2bf   : > { %v718_v49 = vpop.f32.mrf.mxu3 }
 0x2c0   : > { %v721_v50 = vsel %vm447_vm1, %v718_v49, -inf }
 0x2c1   : > { %722 = vmax.xlane.f32.xlu2 %v721_v50  ;;  %v1034_v50 = vld [vmem:[%s1375_s6] ss:$0 sm:$0xff] }
 0x2c9   : > { %644 = vadd.xlane.f32.xlu2 %v643_v52 }
 0x32c   : > { %v555_v53 = vpop.xlane.xlu1 %554 }
 0x32d   : > { %v556_v54 = vsub.f32 %v550_v46, %v555_v53 }
 0x32f   : > { %v557_v55 = vmul.f32 1.442695, %v556_v54 }
 0x331   : > { %1043 = vpow2.f32 %v557_v55  ;;  %v1163_v55 = vmov 32.0  }
 0x334   : > { %v723_v56 = vpop.xlane.xlu2 %722 }
 0x335   : > { %v724_v57 = vsub.f32 %v718_v49, %v723_v56 }
 0x337   : > { %v1044_v58 = vpop.eup %1043  ;;  %v725_v59 = vmul.f32 1.442695, %v724_v57 }
 0x338   : > { %v559_v60 = vsel %vm447_vm1, %v1044_v58, 0.0 }
 0x339   : > { %1045 = vpow2.f32 %v725_v59  ;;  %560 = vadd.xlane.f32.xlu2 %v559_v60 }
 0x33c   : > { %v645_v63 = vpop.xlane.xlu2 %644 }
 0x33d   : > { %1047 = vrcp.f32 %v645_v63  ;;  %v657_v5 = vand.u32 2147483648, %v645_v63  ;;  %vm651_vm7 = vweird.f32 %v645_v63  ;;  %v655_v6 = vand.u32 2147483647, %v645_v63 }
 0x33f   : > { %v1334_v61 = vpop.eup %1045  ;;  %v658_v10 = vor.u32 1.1754944e-38, %v657_v5  ;;  %vm656_vm9 = vcmp.eq.f32.partialorder %v655_v6, 8.507059e+37 }
 0x340   : > { %v727_v62 = vsel %vm447_vm1, %v1334_v61, 0.0 }
 0x341   : > { %728 = vadd.xlane.f32.xlu1 %v727_v62 }
 0x343   : > { %v1048_v0 = vpop.eup %1047 }
 0x344   : > { %v647_v1 = vmul.f32 %v1048_v0, %v645_v63  ;;  %vm652_vm6 = vweird.f32 %v1048_v0 }
 0x345   : > { %vm653_vm8 = vmor %vm651_vm7, %vm652_vm6 }
 0x346   : > { %v648_v2 = vsub.f32 1.0, %v647_v1 }
 0x348   : > { %v649_v3 = vmul.f32 %v1048_v0, %v648_v2 }
 0x34a   : > { %v650_v4 = vadd.f32 %v1048_v0, %v649_v3 }
 0x34c   : > { %v654_v9 = vsel %vm653_vm8, %v1048_v0, %v650_v4 }
 0x34d   : > { %v659_v11 = vsel %vm656_vm9, %v658_v10, %v654_v9 }
 0x34e   : > { %v660_v15 = vmul.f32 %v1042_v51, %v659_v11 }
 0x351   : > { %661 = vrot.lane.b32.xlu2 %v1309_v14, %s1158_s24 }
 0x35a   : > { %577 = vrot.lane.b32.xlu1 %v1309_v14, %s1159_s25 }
 0x3ac   : > { %v561_v7 = vpop.xlane.xlu2 %560 }
 0x3ad   : > { %1049 = vrcp.f32 %v561_v7  ;;  %v573_v23 = vand.u32 2147483648, %v561_v7  ;;  %vm567_vm11 = vweird.f32 %v561_v7  ;;  %v571_v24 = vand.u32 2147483647, %v561_v7 }
 0x3af   : > { %v574_v27 = vor.u32 1.1754944e-38, %v573_v23  ;;  %vm572_vm13 = vcmp.eq.f32.partialorder %v571_v24, 8.507059e+37 }
 0x3b3   : > { %v1050_v12 = vpop.eup %1049 }
 0x3b4   : > { %v729_v13 = vpop.xlane.xlu1 %728  ;;  %v662_v14 = vpop.permute.xlu2 %661  ;;  %v563_v16 = vmul.f32 %v1050_v12, %v561_v7  ;;  %vm568_vm10 = vweird.f32 %v1050_v12 }
 0x3b5   : > { %1051 = vrcp.f32 %v729_v13  ;;  %682 = vmatpush.msrb.mxu1 %v662_v14  ;;  %vm569_vm12 = vmor %vm567_vm11, %vm568_vm10  ;;  %v741_v30 = vand.u32 2147483648, %v729_v13  ;;  %vm735_vm15 = vweird.f32 %v729_v13  ;;  %v739_v31 = vand.u32 2147483647, %v729_v13  ;;  %v1036_v14 = vld [vmem:[#allocation5] ss:$0 sm:$0xff] }
 0x3b6   : > { %967 = vmatmul.msk.f32.vlgmr.msrb.gmra.mxu1 %vm447_vm1, %v660_v15  ;;  %v564_v17 = vsub.f32 1.0, %v563_v16  ;;  %1053 = vrcp.f32 %v1163_v55 }
 0x3b7   : > { %v742_v36 = vor.u32 1.1754944e-38, %v741_v30  ;;  %vm740_vm3 = vcmp.eq.f32.partialorder %v739_v31, 8.507059e+37 }
 0x3b8   : > { %v565_v19 = vmul.f32 %v1050_v12, %v564_v17 }
 0x3ba   : > { %v566_v21 = vadd.f32 %v1050_v12, %v565_v19 }
 0x3bb   : > { %v1052_v18 = vpop.eup %1051 }
 0x3bc   : > { %v731_v20 = vmul.f32 %v1052_v18, %v729_v13  ;;  %v570_v26 = vsel %vm569_vm12, %v1050_v12, %v566_v21  ;;  %vm736_vm14 = vweird.f32 %v1052_v18  ;;  %v1054_v56 = vpop.eup %1053  ;;  %v1035_v12 = vld [vmem:[%s1376_s7] ss:$0 sm:$0xff] }
 0x3bd   : > { %v575_v28 = vsel %vm572_vm13, %v574_v27, %v570_v26  ;;  %vm737_vm2 = vmor %vm735_vm15, %vm736_vm14  ;;  %v816_v57 = vmul.f32 32.0, %v1054_v56  ;;  %vm820_vm6 = vweird.f32 %v1054_v56 }
 0x3be   : > { %v732_v22 = vsub.f32 1.0, %v731_v20  ;;  %v576_v33 = vmul.f32 %v1044_v58, %v575_v28 }
 0x3bf   : > { %v817_v58 = vsub.f32 1.0, %v816_v57 }
 0x3c0   : > { %v733_v25 = vmul.f32 %v1052_v18, %v732_v22 }
 0x3c1   : > { %v818_v59 = vmul.f32 %v1054_v56, %v817_v58 }
 0x3c2   : > { %v734_v29 = vadd.f32 %v1052_v18, %v733_v25 }
 0x3c3   : > { %v819_v60 = vadd.f32 %v1054_v56, %v818_v59 }
 0x3c4   : > { %v738_v35 = vsel %vm737_vm2, %v1052_v18, %v734_v29 }
 0x3c5   : > { %v743_v37 = vsel %vm740_vm3, %v742_v36, %v738_v35 }
 0x3c6   : > { %v744_v38 = vmul.f32 %v1334_v61, %v743_v37  ;;  %v821_v61 = vsel %vm820_vm6, %v1054_v56, %v819_v60 }
 0x3cc   : > { %v578_v32 = vpop.permute.xlu1 %577 }
 0x3cd   : > { %598 = vmatpush.msrb.mxu2 %v578_v32 }
 0x3ce   : > { %964 = vmatmul.msk.f32.vlgmr.msrb.gmra.mxu2 %vm447_vm1, %v576_v33 }
 0x3cf   : > { %766 = vmatpush.msra.mxu2 %v746_v34 }
 0x3d6   : > { %970 = vmatmul.msk.f32.vlgmr.msra.gmra.mxu2 %vm447_vm1, %v744_v38  ;;  %vm775_vm1 = vcmask 261312  }
 0x433   : > { %v684_v39 = vpop.f32.mrf.mxu1 }
 0x434   : > { %688 = vrot.lane.b32.xlu1 %v684_v39, %s1160_s26 }
 0x451   : > { %v600_v40 = vpop.f32.mrf.mxu2 }
 0x452   : > { %604 = vrot.lane.b32.xlu0 %v600_v40, %s1161_s27 }
 0x459   : > { %v768_v41 = vpop.f32.mrf.mxu2 }
 0x45a   : > { %772 = vrot.lane.b32.xlu2 %v768_v41, %s1162_s29 }
 0x4a6   : > { %v689_v47 = vpop.permute.xlu1 %688 }
 0x4b4   : > { %v773_v48 = vpop.permute.xlu2 %772 }
 0x4c4   : > { %v605_v46 = vpop.permute.xlu0 %604 }
 0x4c5   : > { %608 = vst.msk [vmem:[#allocation2] sm:$0xff] %vm607_vm4, %v605_v46 }
 0x4c6   : > { %692 = vst.msk [vmem:[#allocation2] sm:$0xff] %vm691_vm5, %v689_v47 }
 0x4c7   : > { %776 = vst.msk [vmem:[#allocation2] sm:$0xff] %vm775_vm1, %v773_v48 }
 0x4ce   : > { %v777_v49 = vld [vmem:[#allocation2] sm:$0xff] }
 0x4cf   : > { %971 = vmatmul.msk.f32.vlgmr.msra.gmra.mxu0 %vm392_vm0, %v777_v49 }
 0x54c   : > { %v806_v51 = vpop.f32.mrf.mxu0 }
 0x54d   : > { %v807_v52 = vadd.f32 %v1034_v50, %v806_v51 }
 0x54f   : > { %v809_v53 = vadd.f32 %v807_v52, %v1297_v8 }
 0x551   : > { %v812_v54 = vsel %vm392_vm0, %v809_v53, 0.0 }
 0x552   : > { %813 = vadd.xlane.f32.xlu0 %v812_v54 }
 0x5c5   : > { %v814_v62 = vpop.xlane.xlu0 %813 }
 0x5c6   : > { %v822_v63 = vmul.f32 %v821_v61, %v814_v62 }
 0x5c8   : > { %v823_v0 = vsub.f32 %v809_v53, %v822_v63 }
 0x5ca   : > { %v824_v1 = vmul.f32 %v823_v0, %v823_v0 }
 0x5cc   : > { %v825_v2 = vsel %vm392_vm0, %v824_v1, 0.0 }
 0x5cd   : > { %826 = vadd.xlane.f32.xlu1 %v825_v2 }
 0x640   : > { %v827_v8 = vpop.xlane.xlu1 %826 }
 0x641   : > { %v828_v3 = vmul.f32 %v827_v8, %v821_v61 }
 0x643   : > { %v829_v4 = vadd.f32 1e-05, %v828_v3 }
 0x645   : > { %1055 = vrsqrt.f32 %v829_v4  ;;  %vm836_vm8 = vweird.f32 %v829_v4 }
 0x64b   : > { %v1056_v5 = vpop.eup %1055 }
 0x64c   : > { %v831_v6 = vmul.f32 %v1056_v5, %v829_v4  ;;  %vm837_vm7 = vweird.f32 %v1056_v5 }
 0x64d   : > { %vm838_vm9 = vmor %vm836_vm8, %vm837_vm7 }
 0x64e   : > { %v832_v7 = vmul.f32 %v1056_v5, %v831_v6 }
 0x650   : > { %v833_v9 = vmul.f32 0.5, %v832_v7 }
 0x652   : > { %v834_v10 = vsub.f32 1.5, %v833_v9 }
 0x654   : > { %v835_v11 = vmul.f32 %v1056_v5, %v834_v10 }
 0x656   : > { %v839_v13 = vsel %vm838_vm9, %v1056_v5, %v835_v11 }
 0x657   : > { %v840_v15 = vmul.f32 %v839_v13, %v823_v0 }
 0x659   : > { %v844_v16 = vmul.f32 %v1035_v12, %v840_v15 }
 0x65b   : > { %v848_v17 = vadd.f32 %v1036_v14, %v844_v16 }
 0x65d   : > { %849 = vst.msk [vmem:[%s379_s19] sm:$0xff] %vm392_vm0, %v848_v17 }
 0x65e PF: > { %s21_s11 = sadd.s32 1, %s1147_s11   ;;  %s1381_s30 = smov %s1143_s10 }
 0x65f   : > { %p18_p8 = scmp.ge.s32.totalorder %s21_s11, 4   ;;  %s1382_s10 = smov %s1384_s13 }
 0x661   :  { %20 = sbr.rel (!%p18_p8) target bundleno = 3 (0x3), region = 96 }
 0x666   :  { %875 = vsyncpa [#allocation4], 1 }
 0x667   :  { %877 = vsyncpa [#allocation4 + $0x1], 1 }
 0x668   :  { %878 = vsyncpa [#allocation6], 1 }

// kernel: decoder_forward.12
= control target key start
LH: loop header
LB: loop body
LE: loop exit
PB: predicated region body
PF: predicated region fallthrough
CT: control target
= control target key end

     0   :  { %vm36_vm0 = vcmask 261120   ;;  %vm76_vm1 = vcmask 523264   ;;  %v210_v30 = vmov 32.0   ;;  %s319_s1 = inlined_call_operand.vmem [shape: f32[32,64], index: 1, kind: input, shape index: {}]   ;;  %s320_s3 = inlined_call_operand.vmem [shape: f32[64,32], index: 3, kind: input, shape index: {}]   ;;  %s321_s0 = inlined_call_operand.vmem [shape: f32[16,32], index: 0, kind: input, shape index: {}]   ;;  %s322_s2 = inlined_call_operand.vmem [shape: f32[1,64], index: 2, kind: input, shape index: {}]   ;;  %s323_s4 = inlined_call_operand.vmem [shape: f32[1,32], index: 4, kind: input, shape index: {}]   ;;  %s324_s5 = inlined_call_operand.vmem [shape: f32[1,32], index: 5, kind: input, shape index: {}]   ;;  %s325_s6 = inlined_call_operand.vmem [shape: f32[1,32], index: 6, kind: input, shape index: {}]   ;;  %s326_s7 = inlined_call_operand.vmem [shape: f32[16,32], index: 7, kind: output, shape index: {}]  }
   0x1   :  { %v31_v0 = vld [vmem:[%s319_s1 + $0x18] sm:$0xff]  ;;  %v30_v1 = vld [vmem:[%s319_s1 + $0x10] sm:$0xff]  ;;  %v29_v2 = vld [vmem:[%s319_s1 + $0x8] sm:$0xff]  ;;  %204 = vrcp.f32 %v210_v30 }
   0x2   :  { %55 = vmatpush.msra.mxu0 %v31_v0  ;;  %187 = vmatpush.msra.mxu3 %v31_v0  ;;  %v75_v3 = vld [vmem:[%s320_s3 + $0x38] sm:$0xff]  ;;  %v74_v4 = vld [vmem:[%s320_s3 + $0x30] sm:$0xff]  ;;  %v28_v5 = vld [vmem:[%s319_s1] sm:$0xff] }
   0x3   :  { %91 = vmatpush.msra.mxu1 %v75_v3  ;;  %191 = vmatpush.msra.mxu2 %v75_v3  ;;  %v26_v6 = vld [vmem:[%s321_s0] sm:$0xff]  ;;  %v27_v7 = vld [vmem:[%s321_s0 + $0x8] sm:$0xff]  ;;  %v71_v10 = vld [vmem:[%s320_s3 + $0x18] sm:$0xff] }
   0x4   :  { %56 = vmatpush.msra.mxu0 %v30_v1  ;;  %188 = vmatpush.msra.mxu3 %v30_v1  ;;  %v73_v8 = vld [vmem:[%s320_s3 + $0x28] sm:$0xff]  ;;  %v72_v9 = vld [vmem:[%s320_s3 + $0x20] sm:$0xff]  ;;  %v70_v11 = vld [vmem:[%s320_s3 + $0x10] sm:$0xff] }
   0x5   :  { %92 = vmatpush.msra.mxu1 %v74_v4  ;;  %192 = vmatpush.msra.mxu2 %v74_v4  ;;  %v69_v12 = vld [vmem:[%s320_s3 + $0x8] sm:$0xff]  ;;  %v68_v13 = vld [vmem:[%s320_s3] sm:$0xff] }
   0x6   :  { %57 = vmatpush.msra.mxu0 %v29_v2  ;;  %189 = vmatpush.msra.mxu3 %v29_v2  ;;  %v200_v14 = vld [vmem:[%s322_s2] ss:$0 sm:$0xff] }
   0x7   :  { %93 = vmatpush.msra.mxu1 %v73_v8  ;;  %193 = vmatpush.msra.mxu2 %v73_v8  ;;  %v201_v21 = vld [vmem:[%s323_s4] ss:$0 sm:$0xff]  ;;  %v205_v31 = vpop.eup %204 }
   0x8   :  { %58 = vmatpush.msra.mxu0 %v28_v5  ;;  %190 = vmatpush.msra.mxu3 %v28_v5  ;;  %v123_v32 = vmul.f32 32.0, %v205_v31  ;;  %vm127_vm2 = vweird.f32 %v205_v31  ;;  %v202_v59 = vld [vmem:[%s324_s5] ss:$0 sm:$0xff] }
   0x9   :  { %183 = vmatmul.msk.f32.vlgmr.msra.gmra.mxu0 %vm36_vm0, %v26_v6  ;;  %184 = vmatmul.msk.f32.vlgmr.msra.gmra.mxu3 %vm36_vm0, %v27_v7  ;;  %v203_v62 = vld [vmem:[%s325_s6] ss:$0 sm:$0xff] }
   0xa   :  { %94 = vmatpush.msra.mxu1 %v72_v9  ;;  %194 = vmatpush.msra.mxu2 %v72_v9  ;;  %v124_v33 = vsub.f32 1.0, %v123_v32 }
   0xc   :  { %95 = vmatpush.msra.mxu1 %v71_v10  ;;  %195 = vmatpush.msra.mxu2 %v71_v10  ;;  %v125_v34 = vmul.f32 %v205_v31, %v124_v33 }
   0xe   :  { %96 = vmatpush.msra.mxu1 %v70_v11  ;;  %196 = vmatpush.msra.mxu2 %v70_v11  ;;  %v126_v35 = vadd.f32 %v205_v31, %v125_v34 }
  0x10   :  { %97 = vmatpush.msra.mxu1 %v69_v12  ;;  %197 = vmatpush.msra.mxu2 %v69_v12  ;;  %v128_v36 = vsel %vm127_vm2, %v205_v31, %v126_v35 }
  0x12   :  { %98 = vmatpush.msra.mxu1 %v68_v13  ;;  %198 = vmatpush.msra.mxu2 %v68_v13 }
  0x86   :  { %v60_v15 = vpop.f32.mrf.mxu0 }
  0x87   :  { %v61_v16 = vadd.f32 %v200_v14, %v60_v15 }
  0x89   :  { %v66_v17 = vmax.f32 %v61_v16, 0.0 }
  0x8b   :  { %185 = vmatmul.msk.f32.vlgmr.msra.gmra.mxu1 %vm76_vm1, %v66_v17 }
  0x8c   :  { %v63_v18 = vpop.f32.mrf.mxu3 }
  0x8d   :  { %v64_v19 = vadd.f32 %v200_v14, %v63_v18 }
  0x8f   :  { %v67_v20 = vmax.f32 %v64_v19, 0.0 }
  0x91   :  { %186 = vmatmul.msk.f32.vlgmr.msra.gmra.mxu2 %vm76_vm1, %v67_v20 }
 0x108   :  { %v100_v22 = vpop.f32.mrf.mxu1 }
 0x109   :  { %v106_v23 = vadd.f32 %v100_v22, %v26_v6 }
 0x10b   :  { %v112_v24 = vadd.f32 %v201_v21, %v106_v23 }
 0x10d   :  { %v116_v25 = vsel %vm36_vm0, %v112_v24, 0.0 }
 0x10e   :  { %117 = vadd.xlane.f32.xlu0 %v116_v25 }
 0x114   :  { %v103_v26 = vpop.f32.mrf.mxu2 }
 0x115   :  { %v107_v27 = vadd.f32 %v103_v26, %v27_v7 }
 0x117   :  { %v113_v28 = vadd.f32 %v201_v21, %v107_v27 }
 0x119   :  { %v119_v29 = vsel %vm36_vm0, %v113_v28, 0.0 }
 0x11a   :  { %120 = vadd.xlane.f32.xlu0 %v119_v29 }
 0x181   :  { %v118_v37 = vpop.xlane.xlu0 %117 }
 0x182   :  { %v129_v38 = vmul.f32 %v128_v36, %v118_v37 }
 0x184   :  { %v131_v39 = vsub.f32 %v112_v24, %v129_v38 }
 0x186   :  { %v133_v40 = vmul.f32 %v131_v39, %v131_v39 }
 0x188   :  { %v135_v41 = vsel %vm36_vm0, %v133_v40, 0.0 }
 0x189   :  { %136 = vadd.xlane.f32.xlu1 %v135_v41 }
 0x18d   :  { %v121_v42 = vpop.xlane.xlu0 %120 }
 0x18e   :  { %v130_v43 = vmul.f32 %v128_v36, %v121_v42 }
 0x190   :  { %v132_v44 = vsub.f32 %v113_v28, %v130_v43 }
 0x192   :  { %v134_v45 = vmul.f32 %v132_v44, %v132_v44 }
 0x194   :  { %v138_v46 = vsel %vm36_vm0, %v134_v45, 0.0 }
 0x195   :  { %139 = vadd.xlane.f32.xlu1 %v138_v46 }
 0x1fc   :  { %v137_v47 = vpop.xlane.xlu1 %136 }
 0x1fd   :  { %v141_v48 = vmul.f32 %v137_v47, %v128_v36 }
 0x1ff   :  { %v143_v49 = vadd.f32 1e-05, %v141_v48 }
 0x201   :  { %206 = vrsqrt.f32 %v143_v49  ;;  %vm151_vm4 = vweird.f32 %v143_v49 }
 0x207   :  { %v207_v50 = vpop.eup %206 }
 0x208   :  { %v146_v51 = vmul.f32 %v207_v50, %v143_v49  ;;  %v140_v52 = vpop.xlane.xlu1 %139  ;;  %vm152_vm3 = vweird.f32 %v207_v50 }
 0x209   :  { %v142_v53 = vmul.f32 %v140_v52, %v128_v36  ;;  %vm153_vm5 = vmor %vm151_vm4, %vm152_vm3 }
 0x20a   :  { %v147_v54 = vmul.f32 %v207_v50, %v146_v51 }
 0x20b   :  { %v144_v55 = vadd.f32 1e-05, %v142_v53 }
 0x20c   :  { %v148_v56 = vmul.f32 0.5, %v147_v54 }
 0x20d   :  { %208 = vrsqrt.f32 %v144_v55  ;;  %vm161_vm7 = vweird.f32 %v144_v55 }
 0x20e   :  { %v149_v57 = vsub.f32 1.5, %v148_v56 }
 0x210   :  { %v150_v58 = vmul.f32 %v207_v50, %v149_v57 }
 0x212   :  { %v154_v60 = vsel %vm153_vm5, %v207_v50, %v150_v58 }
 0x213   :  { %v209_v61 = vpop.eup %208  ;;  %v165_v63 = vmul.f32 %v154_v60, %v131_v39 }
 0x214   :  { %v156_v0 = vmul.f32 %v209_v61, %v144_v55  ;;  %vm162_vm6 = vweird.f32 %v209_v61 }
 0x215   :  { %v170_v1 = vmul.f32 %v202_v59, %v165_v63  ;;  %vm163_vm8 = vmor %vm161_vm7, %vm162_vm6 }
 0x216   :  { %v157_v2 = vmul.f32 %v209_v61, %v156_v0 }
 0x217   :  { %v175_v3 = vadd.f32 %v203_v62, %v170_v1 }
 0x218   :  { %v158_v4 = vmul.f32 0.5, %v157_v2 }
 0x219   :  { %177 = vst.msk [vmem:[%s326_s7] sm:$0xff] %vm36_vm0, %v175_v3 }
 0x21a   :  { %v159_v5 = vsub.f32 1.5, %v158_v4 }
 0x21c   :  { %v160_v6 = vmul.f32 %v209_v61, %v159_v5 }
 0x21e   :  { %v164_v7 = vsel %vm163_vm8, %v209_v61, %v160_v6 }
 0x21f   :  { %v166_v8 = vmul.f32 %v164_v7, %v132_v44 }
 0x221   :  { %v171_v9 = vmul.f32 %v202_v59, %v166_v8 }
 0x223   :  { %v176_v10 = vadd.f32 %v203_v62, %v171_v9 }
 0x225   :  { %178 = vst.msk [vmem:[%s326_s7 + $0x8] sm:$0xff] %vm36_vm0, %v176_v10 }

// kernel: decoder_forward.11
= control target key start
LH: loop header
LB: loop body
LE: loop exit
PB: predicated region body
PF: predicated region fallthrough
CT: control target
= control target key end

     0   :  { %s1990_s0 = inlined_call_operand.vmem [shape: f32[2,8,32], index: 0, kind: input, shape index: {}]   ;;  %s1991_s1 = inlined_call_operand.hbm [shape: f32[2,16,32], index: 1, kind: input, shape index: {}]   ;;  %s1992_s2 = inlined_call_operand.hbm [shape: f32[32,32], index: 2, kind: input, shape index: {}]   ;;  %s1993_s3 = inlined_call_operand.vmem [shape: f32[1,32], index: 3, kind: input, shape index: {}]   ;;  %s1994_s4 = inlined_call_operand.hbm [shape: f32[32,64], index: 4, kind: input, shape index: {}]   ;;  %s1995_s5 = inlined_call_operand.hbm [shape: f32[1,64], index: 5, kind: input, shape index: {}]   ;;  %s1996_s6 = inlined_call_operand.hbm [shape: f32[32,32], index: 6, kind: input, shape index: {}]   ;;  %s1997_s7 = inlined_call_operand.hbm [shape: f32[1,32], index: 7, kind: input, shape index: {}]   ;;  %s1998_s8 = inlined_call_operand.vmem [shape: f32[1,32], index: 8, kind: input, shape index: {}]   ;;  %s1999_s9 = inlined_call_operand.hbm [shape: f32[1,32], index: 9, kind: input, shape index: {}]   ;;  %s2000_s10 = inlined_call_operand.vmem [shape: f32[2,8,32], index: 10, kind: output, shape index: {}]  }
   0x1   :  { %2002 = sst [smem:[#allocation18_spill]] %s1992_s2 }
   0x2   :  { %2003 = sst [smem:[#allocation19_spill]] %s1994_s4 }
   0x3   :  { %2004 = sst [smem:[#allocation20_spill]] %s1995_s5 }
   0x4   :  { %2005 = sst [smem:[#allocation21_spill]] %s1998_s8 }
   0x5   :  { %2006 = sst [smem:[#allocation22_spill]] %s2000_s10 }
   0x6   :  { %15 = vsyncpa [#allocation4], 0 }
   0x7   :  { %17 = vsyncpa [#allocation4 + $0x1], 0 }
   0x8   :  { %18 = vsyncpa [#allocation6], 0 }
   0x9   :  { %19 = vsyncpa [#allocation9], 0 }
   0xa   :  { %20 = vsyncpa [#allocation12], 0  ;;  %s1747_s13 = smov 0   ;;  %s1749_s14 = smov 0  }
   0xb   :  { %s1751_s15 = smov 0   ;;  %s1753_s16 = smov 0  }
   0xc   :  { %s1755_s17 = smov 0   ;;  %s1757_s18 = smov 0  }
   0xd LB: > { %s1179_s19 = sadd.s32 4294967295, %s1671_s18   ;;  %p1181_p0 = scmp.ge.s32.totalorder %s1671_s18, 1  ;;  %s1671_s18 = sphi %s1757_s18, %s26_s18   ;;  %s1667_s17 = sphi %s1755_s17, %s2022_s17   ;;  %s1663_s16 = sphi %s1753_s16, %s2021_s16   ;;  %s1659_s15 = sphi %s1751_s15, %s2020_s15   ;;  %s1655_s14 = sphi %s1749_s14, %s2019_s14   ;;  %s1651_s13 = sphi %s1747_s13, %s2018_s13  }
   0xe   : > { %p1779_p1 = scmp.eq.s32.totalorder %s1179_s19, 0  ;;  %p293_p2 = scmp.lt.s32.totalorder %s1671_s18, 3 }
   0xf   : > { %s2008_s2 = sld [smem:[#allocation18_spill]]  ;;  %s1673_s25 = smov [#allocation5]  }
  0x10   : > { %p1787_p3 = pnand %p1181_p0, %p293_p2  ;;  %s306_s26 = sshll.u32 %s1673_s25, 4  ;;  %s307_s26 = int_to_ptr.vmem [resolvable:$true] %s306_s26 }
  0x11   : > { %s2011_s5 = sld [smem:[#allocation20_spill]]  ;;  %s2001_s11 = smov 128  }
  0x12   : > { %p1251_p4 = pneg %p1787_p3  ;;  %s1675_s12 = smov 8  }
  0x13   : > { %s1676_s19 = smov [#allocation8]   ;;  %s2012_s4 = sld [smem:[#allocation19_spill]] }
  0x14   : > { %p1795_p5 = pnand %p1251_p4, %p1779_p1  ;;  %s338_s21 = sshll.u32 %s1676_s19, 4  ;;  %s339_s21 = int_to_ptr.vmem [resolvable:$true] %s338_s21 }
  0x15   : > { %s304_s23 = sshll.u32 %s2008_s2, 4  ;;  %s362_s2 = sshll.u32 %s1997_s7, 4  ;;  %s305_s23 = int_to_ptr.hbm [resolvable:$true] %s304_s23  ;;  %s363_s2 = int_to_ptr.hbm [resolvable:$true] %s362_s2 }
  0x16   : > { %1254 = dma.hbm_to_vmem [thread:$0]  (!%p1795_p5), %s305_s23, 512, %s307_s26, [#allocation6], %s2001_s11, %s2001_s11, %s1675_s12  }
  0x17   : > { %s336_s30 = sshll.u32 %s2011_s5, 4  ;;  %s1677_s10 = smov [#allocation11]   ;;  %s337_s30 = int_to_ptr.hbm [resolvable:$true] %s336_s30 }
  0x18   : > { %1260 = dma.hbm_to_vmem [thread:$0]  (!%p1795_p5), %s337_s30, 16, %s339_s21, [#allocation9]  }
  0x19   : > { %s321_s5 = sshll.u32 %s2012_s4, 4  ;;  %s364_s8 = sshll.u32 %s1677_s10, 4  ;;  %s322_s5 = int_to_ptr.hbm [resolvable:$true] %s321_s5  ;;  %s365_s8 = int_to_ptr.vmem [resolvable:$true] %s364_s8 }
  0x1a   : > { %1266 = dma.hbm_to_vmem [thread:$0]  (!%p1795_p5), %s363_s2, 16, %s365_s8, [#allocation12]  }
  0x1b   : > { %s1678_s23 = smov [#allocation7]   ;;  %s347_s30 = sshll.u32 %s1996_s6, 4  ;;  %s348_s30 = int_to_ptr.hbm [resolvable:$true] %s347_s30 }
  0x1c   : > { %s323_s26 = sshll.u32 %s1678_s23, 4  ;;  %s377_s10 = sshll.u32 %s1999_s9, 4  ;;  %s324_s26 = int_to_ptr.vmem [resolvable:$true] %s323_s26  ;;  %s378_s10 = int_to_ptr.hbm [resolvable:$true] %s377_s10 }
  0x1d   : > { %1257 = dma.hbm_to_vmem [thread:$0]  (!%p1795_p5), %s322_s5, 512, %s324_s26, [#allocation6], %s2001_s11, %s2001_s11, %s1675_s12  }
  0x1e   : > { %s1679_s21 = smov [#allocation10]   ;;  %s1680_s28 = smov [#allocation13]  }
  0x1f   : > { %s349_s25 = sshll.u32 %s1679_s21, 4  ;;  %s379_s5 = sshll.u32 %s1680_s28, 4  ;;  %s350_s25 = int_to_ptr.vmem [resolvable:$true] %s349_s25  ;;  %s380_s5 = int_to_ptr.vmem [resolvable:$true] %s379_s5 }
  0x20   : > { %1263 = dma.hbm_to_vmem [thread:$0]  (!%p1795_p5), %s348_s30, 512, %s350_s25, [#allocation9], %s2001_s11, %s2001_s11, %s1675_s12  }
  0x21   : > { %1269 = dma.hbm_to_vmem [thread:$0]  (!%p1795_p5), %s378_s10, 16, %s380_s5, [#allocation12]  }
  0x22   : > { %s38_s29 = sadd.s32 1, %s1667_s17  ;;  %s73_s23 = sadd.s32 1, %s1659_s15 }
  0x23   : > { %p40_p6 = scmp.ge.s32.totalorder %s38_s29, 2  ;;  %p80_p7 = scmp.ne.s32.totalorder %s1659_s15, %s1655_s14 }
  0x24   : > { %p81_p8 = scmp.eq.s32.totalorder %s1671_s18, 0  ;;  %p86_p9 = scmp.ne.s32.totalorder %s1655_s14, %s1651_s13 }
  0x25   : > { %s2024_s29 = smov (%p40_p6, %s38_s29), 0  ;;  %p1280_p12 = scmp.lt.s32.totalorder %s1671_s18, 2 }
  0x26   : > { %p1844_p10 = por %p81_p8, %p80_p7  ;;  %p1850_p11 = por %p1779_p1, %p86_p9 }
  0x27   : > { %s70_s19 = ssub.s32 %s1667_s17, %s2024_s29  ;;  %s400_s22 = sand.u32 1, %s1659_s15  }
  0x28   : > { %p71_p13 = scmp.eq.s32.totalorder %s70_s19, 0  ;;  %s1189_s30 = sshll.u32 %s400_s22, 4 }
  0x29   : > { %s1224_s13 = sshll.u32 %s1667_s17, 4  ;;  %s404_s25 = scalar_lea.vmem [#allocation3], %s1189_s30 }
  0x2a   : > { %s1859_s2 = scalar_select %p71_p13, %s1659_s15, %s73_s23  }
  0x2b   : > { %s409_s21 = scalar_lea.hbm %s1991_s1, %s1224_s13  ;;  %s412_s28 = sshll.u32 %s404_s25, 4  ;;  %s413_s28 = int_to_ptr.vmem [resolvable:$true] %s412_s28 }
  0x2c   : > { %s410_s5 = sshll.u32 %s409_s21, 4  ;;  %p1271_p0 = pnand %p1280_p12, %p1844_p10  ;;  %s411_s5 = int_to_ptr.hbm [resolvable:$true] %s410_s5 }
  0x2d   : > { %s401_s11 = scalar_lea.sflag [#allocation4], %s400_s22  ;;  %s2015_s4 = smov 128  }
  0x2e   : > { %1273 = dma.hbm_to_vmem [thread:$0]  (!%p1271_p0), %s411_s5, 256, %s413_s28, %s401_s11, %s2015_s4, %s2015_s4, %s1675_s12  }
  0x2f   : > { %424 = sbr.rel (%p1787_p3) target bundleno = 2086 (0x826), region = 60  ;;  %s426_s23 = sand.u32 (!%p1787_p3), 1, %s1655_s14  }
  0x30   : > { %s1873_s19 = sshll.u32 (!%p1787_p3), %s426_s23, 4  ;;  %s427_s30 = scalar_lea.sflag (!%p1787_p3), [#allocation4], %s426_s23 }
  0x31   : > { %s430_s13 = scalar_lea.vmem (!%p1787_p3), [#allocation3], %s1873_s19 }
  0x34   : > { %1634 = dma.done.wait (%p1850_p11), %s427_s30, 256  }
  0x35   : > { %1636 = vsyncadd (%p1850_p11), %s427_s30, 4294967040 }
  0x36   : > { %1638 = dma.done.wait (%p1779_p1), [#allocation6], 1024  }
  0x37   : > { %1640 = vsyncadd (%p1779_p1), [#allocation6], 4294966272 }
  0x38   : > { %1642 = dma.done.wait (%p1779_p1), [#allocation9], 528  }
  0x39   : > { %1644 = vsyncadd (%p1779_p1), [#allocation9], 4294966768 }
  0x3a   : > { %1646 = dma.done.wait (%p1779_p1), [#allocation12], 32  }
  0x3b   : > { %1648 = vsyncadd (%p1779_p1), [#allocation12], 4294967264  ;;  %p507_p2 = scmp.lt.s32.totalorder %s1663_s16, 1  ;;  %v559_v0 = vld [vmem:[#allocation7 + $0x18] sm:$0xff]  ;;  %v558_v1 = vld [vmem:[#allocation7 + $0x10] sm:$0xff]  ;;  %vm532_vm0 = vcmask 261120  }
  0x3c   : > { %582 = vmatpush.msra.mxu1 %v559_v0  ;;  %v527_v2 = vld [vmem:[#allocation5 + $0x18] sm:$0xff]  ;;  %v557_v3 = vld [vmem:[#allocation7 + $0x8] sm:$0xff]  ;;  %v526_v4 = vld [vmem:[#allocation5 + $0x10] sm:$0xff]  ;;  %s1681_s12 = smov 120   ;;  %vm593_vm1 = vcmask 64512   ;;  %s1682_s22 = smov 96  }
  0x3d   : > { %s2026_s16 = smov (!%p507_p2, %s1663_s16), 1  ;;  %548 = vmatpush.msra.mxu0 %v527_v2  ;;  %v556_v5 = vld [vmem:[#allocation7] sm:$0xff]  ;;  %v525_v6 = vld [vmem:[#allocation5 + $0x8] sm:$0xff]  ;;  %v1375_v14 = vld [vmem:[%s1993_s3] ss:$0 sm:$0xff]  ;;  %s1683_s8 = smov 112  }
  0x3e   : > { %s1200_s4 = sshll.u32 %s2026_s16, 3  ;;  %583 = vmatpush.msra.mxu1 %v558_v1  ;;  %v522_v7 = vld [vmem:[%s430_s13] sm:$0xff]  ;;  %v523_v10 = vld [vmem:[%s430_s13 + $0x8] sm:$0xff]  ;;  %s1684_s10 = smov 88   ;;  %vm623_vm2 = vcmask 130048   ;;  %vm767_vm11 = vcmask 130112  }
  0x3f   : > { %s513_s11 = scalar_lea.vmem %s1990_s0, %s1200_s4  ;;  %549 = vmatpush.msra.mxu0 %v526_v4  ;;  %v524_v8 = vld [vmem:[#allocation5] sm:$0xff]  ;;  %s1685_s21 = smov 104  }
  0x40   : > { %584 = vmatpush.msra.mxu1 %v557_v3  ;;  %v1904_v9 = vld [vmem:[%s513_s11] sm:$0xff]  ;;  %v1374_v11 = vld [vmem:[#allocation8] ss:$0 sm:$0xff]  ;;  %s1686_s25 = smov 72   ;;  %s1687_s28 = smov 8  }
  0x41   : > { %550 = vmatpush.msra.mxu0 %v525_v6  ;;  %s1688_s5 = smov 80   ;;  %s1689_s23 = smov 16  }
  0x42   : > { %585 = vmatpush.msra.mxu1 %v556_v5  ;;  %s1690_s19 = smov 24   ;;  %s2016_s20 = sld [smem:[#allocation21_spill]] }
  0x43   : > { %1203 = vmatmul.msk.f32.vlgmr.msra.gmra.mxu1 %vm532_vm0, %v522_v7  ;;  %551 = vmatpush.msra.mxu0 %v524_v8 }
  0x44   : > { %1202 = vmatmul.msk.f32.vlgmr.msra.gmra.mxu0 %vm532_vm0, %v1904_v9 }
  0x4b   : > { %1204 = vmatmul.msk.f32.gmra.mxu1 %vm532_vm0, %v523_v10 }
  0xc0   : > { %v587_v12 = vpop.f32.mrf.mxu1 }
  0xc1   : > { %v1912_v13 = vadd.f32 %v1374_v11, %v587_v12  ;;  %v553_v15 = vpop.f32.mrf.mxu0 }
  0xc2   : > { %v554_v16 = vadd.f32 %v1375_v14, %v553_v15 }
  0xc3   : > { %680 = vrot.lane.b32.xlu2 %v1912_v13, %s1681_s12 }
  0xc8   : > { %v590_v17 = vpop.f32.mrf.mxu1 }
  0xc9   : > { %v591_v18 = vadd.f32 %v1374_v11, %v590_v17 }
  0xcb   : > { %1205 = vmatpush.xpose.msk.msra.mxu2 %vm593_vm1, %v591_v18  ;;  %678 = vrot.lane.b32.xlu2 %v554_v16, %s1681_s12  ;;  %v1920_v19 = vpack.i.bf16 %v1912_v13, %v591_v18 }
  0xcd   : > { %1355 = vrot.lane.b32.xlu1 %v1920_v19, %s1682_s22 }
  0xcf   : > { %1206 = vmatpush.xpose.msk.msra.mxu2 %vm593_vm1, %v1912_v13 }
  0xd2   : > { %1207 = vmatmul.msk.f32.vlgmr.msra.gmra.mxu2 %vm593_vm1, %v554_v16 }
  0xd3   : > { %773 = vrot.lane.b32.xlu2 %v591_v18, %s1683_s8 }
  0xd5   : > { %682 = vrot.lane.b32.xlu1 %v591_v18, %s1681_s12  ;;  %s2017_s12 = sld [smem:[#allocation22_spill]] }
  0xdb   : > { %769 = vrot.lane.b32.xlu2 %v554_v16, %s1683_s8  ;;  %s520_s26 = scalar_lea.vmem %s2017_s12, %s1200_s4 }
  0xe3   : > { %1360 = vrot.lane.b32.xlu2 %v1920_v19, %s1684_s10 }
  0xeb   : > { %864 = vrot.lane.b32.xlu2 %v591_v18, %s1685_s21 }
  0xf3   : > { %860 = vrot.lane.b32.xlu2 %v554_v16, %s1685_s21 }
 0x11d   : > { %v681_v20 = vpop.permute.xlu2 %680 }
 0x125   : > { %v679_v21 = vpop.permute.xlu2 %678 }
 0x12d   : > { %v774_v22 = vpop.permute.xlu2 %773 }
 0x12e   : > { %1213 = vmatpush.xpose.msk.msrb.mxu2 %vm593_vm1, %v774_v22 }
 0x135   : > { %v770_v23 = vpop.permute.xlu2 %769 }
 0x13d   : > { %v1361_v24 = vpop.permute.xlu2 %1360 }
 0x13e   : > { %v1362_v25 = vunpack.i.l.bf16 %v1361_v24  ;;  %v1363_v28 = vunpack.i.h.bf16 %v1361_v24 }
 0x13f   : > { %v1356_v26 = vpop.permute.xlu1 %1355 }
 0x140   : > { %757 = vmatpush.msrb.mxu0 %v1362_v25  ;;  %v1357_v27 = vunpack.i.l.bf16 %v1356_v26  ;;  %v1358_v29 = vunpack.i.h.bf16 %v1356_v26 }
 0x142   : > { %671 = vmatpush.msra.mxu3 %v1357_v27  ;;  %758 = vmatpush.msrb.mxu0 %v1363_v28 }
 0x144   : > { %672 = vmatpush.msra.mxu3 %v1358_v29 }
 0x145   : > { %v865_v30 = vpop.permute.xlu2 %864 }
 0x146   : > { %1217 = vmatpush.xpose.msk.msra.mxu0 %vm593_vm1, %v865_v30 }
 0x147   : > { %v683_v31 = vpop.permute.xlu1 %682 }
 0x148   : > { %1209 = vmatpush.xpose.msk.msrb.mxu3 %vm593_vm1, %v683_v31 }
 0x14c   : > { %1210 = vmatpush.xpose.msk.msrb.mxu3 %vm593_vm1, %v681_v20 }
 0x14d   : > { %v861_v11 = vpop.permute.xlu2 %860 }
 0x155   : > { %v620_v32 = vpop.f32.mrf.mxu2 }
 0x156   : > { %v624_v33 = vsel %vm623_vm2, %v620_v32, -inf }
 0x157   : > { %625 = vmax.xlane.f32.xlu0 %v624_v33 }
 0x1ca   : > { %v626_v34 = vpop.xlane.xlu0 %625 }
 0x1cb   : > { %v627_v35 = vsub.f32 %v620_v32, %v626_v34 }
 0x1cd   : > { %v628_v36 = vmul.f32 1.442695, %v627_v35 }
 0x1cf   : > { %1379 = vpow2.f32 %v628_v36 }
 0x1d5   : > { %v1380_v37 = vpop.eup %1379 }
 0x1d6   : > { %v630_v38 = vsel %vm623_vm2, %v1380_v37, 0.0 }
 0x1d7   : > { %631 = vadd.xlane.f32.xlu0 %v630_v38 }
 0x24a   : > { %v632_v39 = vpop.xlane.xlu0 %631 }
 0x24b   : > { %1381 = vrcp.f32 %v632_v39  ;;  %v644_v43 = vand.u32 2147483648, %v632_v39  ;;  %v642_v45 = vand.u32 2147483647, %v632_v39  ;;  %vm638_vm4 = vweird.f32 %v632_v39 }
 0x24d   : > { %v645_v47 = vor.u32 1.1754944e-38, %v644_v43  ;;  %vm643_vm6 = vcmp.eq.f32.partialorder %v642_v45, 8.507059e+37 }
 0x251   : > { %v1382_v40 = vpop.eup %1381 }
 0x252   : > { %v634_v41 = vmul.f32 %v1382_v40, %v632_v39  ;;  %vm639_vm3 = vweird.f32 %v1382_v40 }
 0x253   : > { %vm640_vm5 = vmor %vm638_vm4, %vm639_vm3 }
 0x254   : > { %v635_v42 = vsub.f32 1.0, %v634_v41 }
 0x256   : > { %v636_v44 = vmul.f32 %v1382_v40, %v635_v42 }
 0x258   : > { %v637_v46 = vadd.f32 %v1382_v40, %v636_v44 }
 0x25a   : > { %v641_v48 = vsel %vm640_vm5, %v1382_v40, %v637_v46 }
 0x25b   : > { %v646_v49 = vsel %vm643_vm6, %v645_v47, %v641_v48  ;;  %vm858_vm6 = vcmask 195712  }
 0x25c   : > { %v647_v50 = vmul.f32 %v1380_v37, %v646_v49 }
 0x25e   : > { %1208 = vmatmul.msk.f32.vlgmr.msra.gmra.mxu3 %vm623_vm2, %v647_v50 }
 0x266   : > { %1211 = vmatmul.msk.f32.vlgmr.msrb.gmra.mxu3 %vm593_vm1, %v679_v21 }
 0x2e1   : > { %v674_v51 = vpop.f32.mrf.mxu3 }
 0x2e2   : > { %677 = vst.msk [vmem:[#allocation2] sm:$0xff] %vm593_vm1, %v674_v51 }
 0x2e9   : > { %v707_v52 = vpop.f32.mrf.mxu3 }
 0x2ea   : > { %v710_v53 = vsel %vm623_vm2, %v707_v52, -inf }
 0x2eb   : > { %711 = vmax.xlane.f32.xlu0 %v710_v53 }
 0x2ff   : > { %771 = vrot.lane.b32.xlu0 %v1912_v13, %s1683_s8 }
 0x307   : > { %862 = vrot.lane.b32.xlu0 %v1912_v13, %s1685_s21 }
 0x35e   : > { %v712_v54 = vpop.xlane.xlu0 %711 }
 0x35f   : > { %v713_v55 = vsub.f32 %v707_v52, %v712_v54 }
 0x361   : > { %v714_v56 = vmul.f32 1.442695, %v713_v55 }
 0x363   : > { %1383 = vpow2.f32 %v714_v56 }
 0x369   : > { %v1384_v57 = vpop.eup %1383 }
 0x36a   : > { %v716_v58 = vsel %vm623_vm2, %v1384_v57, 0.0 }
 0x36b   : > { %717 = vadd.xlane.f32.xlu1 %v716_v58 }
 0x371   : > { %v772_v59 = vpop.permute.xlu0 %771 }
 0x372   : > { %1214 = vmatpush.xpose.msk.msrb.mxu2 %vm593_vm1, %v772_v59  ;;  %v955_v59 = vld [vmem:[#allocation10 + $0x18] sm:$0xff] }
 0x375   : > { %1215 = vmatmul.msk.f32.vlgmr.msrb.gmra.mxu2 %vm593_vm1, %v770_v23 }
 0x376   : > { %975 = vmatpush.msra.mxu2 %v955_v59 }
 0x379   : > { %v863_v60 = vpop.permute.xlu0 %862 }
 0x37a   : > { %1218 = vmatpush.xpose.msk.msra.mxu0 %vm593_vm1, %v863_v60  ;;  %v954_v60 = vld [vmem:[#allocation10 + $0x10] sm:$0xff] }
 0x37b   : > { %976 = vmatpush.msra.mxu2 %v954_v60 }
 0x3de   : > { %v718_v61 = vpop.xlane.xlu1 %717 }
 0x3df   : > { %1385 = vrcp.f32 %v718_v61  ;;  %v730_v1 = vand.u32 2147483648, %v718_v61  ;;  %v728_v3 = vand.u32 2147483647, %v718_v61  ;;  %vm724_vm8 = vweird.f32 %v718_v61 }
 0x3e1   : > { %v731_v5 = vor.u32 1.1754944e-38, %v730_v1  ;;  %vm729_vm10 = vcmp.eq.f32.partialorder %v728_v3, 8.507059e+37 }
 0x3e5   : > { %v1386_v62 = vpop.eup %1385 }
 0x3e6   : > { %v720_v63 = vmul.f32 %v1386_v62, %v718_v61  ;;  %vm725_vm7 = vweird.f32 %v1386_v62  ;;  %v953_v61 = vld [vmem:[#allocation10 + $0x8] sm:$0xff] }
 0x3e7   : > { %vm726_vm9 = vmor %vm724_vm8, %vm725_vm7  ;;  %977 = vmatpush.msra.mxu2 %v953_v61  ;;  %vm949_vm7 = vcmask 261312  }
 0x3e8   : > { %v721_v0 = vsub.f32 1.0, %v720_v63 }
 0x3ea   : > { %v722_v2 = vmul.f32 %v1386_v62, %v721_v0 }
 0x3ec   : > { %v723_v4 = vadd.f32 %v1386_v62, %v722_v2  ;;  %v1376_v2 = vld [vmem:[#allocation11] ss:$0 sm:$0xff] }
 0x3ee   : > { %v727_v6 = vsel %vm726_vm9, %v1386_v62, %v723_v4  ;;  %v952_v62 = vld [vmem:[#allocation10] sm:$0xff] }
 0x3ef   : > { %v732_v7 = vsel %vm729_vm10, %v731_v5, %v727_v6  ;;  %978 = vmatpush.msra.mxu2 %v952_v62 }
 0x3f0   : > { %v733_v8 = vmul.f32 %v1384_v57, %v732_v7  ;;  %v1691_v7 = vmov 32.0  }
 0x3f2   : > { %1212 = vmatmul.msk.f32.vlgmr.msrb.gmra.mxu0 %vm623_vm2, %v733_v8 }
 0x3f8   : > { %v798_v10 = vpop.f32.mrf.mxu2 }
 0x3f9   : > { %v801_v12 = vsel %vm623_vm2, %v798_v10, -inf }
 0x3fa   : > { %802 = vmax.xlane.f32.xlu0 %v801_v12  ;;  %1219 = vmatmul.msk.f32.vlgmr.msra.gmra.mxu0 %vm593_vm1, %v861_v11 }
 0x40e   : > { %1370 = vrot.lane.b32.xlu0 %v1920_v19, %s1686_s25 }
 0x46d   : > { %v803_v13 = vpop.xlane.xlu0 %802 }
 0x46e   : > { %v804_v14 = vsub.f32 %v798_v10, %v803_v13 }
 0x46f   : > { %v760_v15 = vpop.f32.mrf.mxu0 }
 0x470   : > { %v805_v16 = vmul.f32 1.442695, %v804_v14 }
 0x472   : > { %1387 = vpow2.f32 %v805_v16 }
 0x477   : > { %v889_v17 = vpop.f32.mrf.mxu0 }
 0x478   : > { %v1388_v18 = vpop.eup %1387  ;;  %v892_v20 = vsel %vm623_vm2, %v889_v17, -inf }
 0x479   : > { %893 = vmax.xlane.f32.xlu2 %v892_v20  ;;  %v807_v21 = vsel %vm623_vm2, %v1388_v18, 0.0 }
 0x47a   : > { %808 = vadd.xlane.f32.xlu1 %v807_v21 }
 0x480   : > { %v1371_v22 = vpop.permute.xlu0 %1370 }
 0x481   : > { %v1372_v23 = vunpack.i.l.bf16 %v1371_v22  ;;  %v1373_v24 = vunpack.i.h.bf16 %v1371_v22 }
 0x483   : > { %939 = vmatpush.msrb.mxu1 %v1372_v23 }
 0x485   : > { %940 = vmatpush.msrb.mxu1 %v1373_v24 }
 0x491   : > { %764 = vrot.lane.b32.xlu2 %v760_v15, %s1687_s28 }
 0x4ec   : > { %v894_v25 = vpop.xlane.xlu2 %893 }
 0x4ed   : > { %v895_v26 = vsub.f32 %v889_v17, %v894_v25  ;;  %v809_v31 = vpop.xlane.xlu1 %808 }
 0x4ee   : > { %v821_v48 = vand.u32 2147483648, %v809_v31  ;;  %vm815_vm3 = vweird.f32 %v809_v31  ;;  %v819_v49 = vand.u32 2147483647, %v809_v31 }
 0x4ef   : > { %v896_v27 = vmul.f32 1.442695, %v895_v26 }
 0x4f0   : > { %v822_v51 = vor.u32 1.1754944e-38, %v821_v48  ;;  %vm820_vm5 = vcmp.eq.f32.partialorder %v819_v49, 8.507059e+37 }
 0x4f1   : > { %1389 = vpow2.f32 %v896_v27 }
 0x4f2   : > { %1391 = vrcp.f32 %v809_v31 }
 0x4f4   : > { %v765_v28 = vpop.permute.xlu2 %764 }
 0x4f5   : > { %768 = vst.msk [vmem:[#allocation2] sm:$0xff] %vm767_vm11, %v765_v28 }
 0x4f7   : > { %v1390_v29 = vpop.eup %1389 }
 0x4f8   : > { %v898_v30 = vsel %vm623_vm2, %v1390_v29, 0.0  ;;  %v1392_v33 = vpop.eup %1391 }
 0x4f9   : > { %899 = vadd.xlane.f32.xlu1 %v898_v30  ;;  %v811_v34 = vmul.f32 %v1392_v33, %v809_v31  ;;  %vm816_vm1 = vweird.f32 %v1392_v33  ;;  %v1378_v31 = vld [vmem:[#allocation13] ss:$0 sm:$0xff] }
 0x4fa   : > { %vm817_vm4 = vmor %vm815_vm3, %vm816_vm1 }
 0x4fb   : > { %v812_v37 = vsub.f32 1.0, %v811_v34 }
 0x4fd   : > { %v813_v42 = vmul.f32 %v1392_v33, %v812_v37 }
 0x4ff   : > { %v814_v46 = vadd.f32 %v1392_v33, %v813_v42 }
 0x501   : > { %v818_v50 = vsel %vm817_vm4, %v1392_v33, %v814_v46 }
 0x502   : > { %v823_v53 = vsel %vm820_vm5, %v822_v51, %v818_v50 }
 0x503   : > { %v824_v56 = vmul.f32 %v1388_v18, %v823_v53 }
 0x512   : > { %1365 = vrot.lane.b32.xlu1 %v1920_v19, %s1688_s5 }
 0x56c   : > { %v900_v32 = vpop.xlane.xlu1 %899 }
 0x56d   : > { %1393 = vrcp.f32 %v900_v32  ;;  %v912_v39 = vand.u32 2147483648, %v900_v32  ;;  %v910_v41 = vand.u32 2147483647, %v900_v32  ;;  %vm906_vm13 = vweird.f32 %v900_v32 }
 0x56e   : > { %1395 = vrcp.f32 %v1691_v7 }
 0x56f   : > { %v913_v44 = vor.u32 1.1754944e-38, %v912_v39  ;;  %vm911_vm15 = vcmp.eq.f32.partialorder %v910_v41, 8.507059e+37 }
 0x573   : > { %v1394_v35 = vpop.eup %1393 }
 0x574   : > { %v902_v36 = vmul.f32 %v1394_v35, %v900_v32  ;;  %vm907_vm12 = vweird.f32 %v1394_v35  ;;  %v1396_v8 = vpop.eup %1395 }
 0x575   : > { %vm908_vm14 = vmor %vm906_vm13, %vm907_vm12  ;;  %v990_v10 = vmul.f32 32.0, %v1396_v8 }
 0x576   : > { %v903_v38 = vsub.f32 1.0, %v902_v36 }
 0x577   : > { %v991_v11 = vsub.f32 1.0, %v990_v10 }
 0x578   : > { %v904_v40 = vmul.f32 %v1394_v35, %v903_v38 }
 0x579   : > { %v992_v12 = vmul.f32 %v1396_v8, %v991_v11 }
 0x57a   : > { %v905_v43 = vadd.f32 %v1394_v35, %v904_v40 }
 0x57b   : > { %v993_v13 = vadd.f32 %v1396_v8, %v992_v12 }
 0x57c   : > { %v909_v19 = vsel %vm908_vm14, %v1394_v35, %v905_v43 }
 0x57d   : > { %v914_v45 = vsel %vm911_vm15, %v913_v44, %v909_v19 }
 0x57e   : > { %v915_v47 = vmul.f32 %v1390_v29, %v914_v45  ;;  %v1377_v29 = vld [vmem:[%s2016_s20] ss:$0 sm:$0xff] }
 0x580   : > { %1220 = vmatmul.msk.f32.vlgmr.msrb.gmra.mxu1 %vm623_vm2, %v915_v47 }
 0x584   : > { %v1366_v52 = vpop.permute.xlu1 %1365 }
 0x585   : > { %v1367_v54 = vunpack.i.l.bf16 %v1366_v52  ;;  %v1368_v55 = vunpack.i.h.bf16 %v1366_v52 }
 0x587   : > { %848 = vmatpush.msra.mxu3 %v1367_v54 }
 0x589   : > { %849 = vmatpush.msra.mxu3 %v1368_v55 }
 0x58a   : > { %1216 = vmatmul.msk.f32.vlgmr.msra.gmra.mxu3 %vm623_vm2, %v824_v56  ;;  %vm994_vm2 = vweird.f32 %v1396_v8 }
 0x58b   : > { %v995_v14 = vsel %vm994_vm2, %v1396_v8, %v993_v13 }
 0x5fd   : > { %v942_v58 = vpop.f32.mrf.mxu1 }
 0x60d   : > { %v851_v57 = vpop.f32.mrf.mxu3 }
 0x60e   : > { %855 = vrot.lane.b32.xlu1 %v851_v57, %s1689_s23 }
 0x616   : > { %946 = vrot.lane.b32.xlu1 %v942_v58, %s1690_s19 }
 0x680   : > { %v856_v63 = vpop.permute.xlu1 %855 }
 0x681   : > { %859 = vst.msk [vmem:[#allocation2] sm:$0xff] %vm858_vm6, %v856_v63 }
 0x688   : > { %v947_v0 = vpop.permute.xlu1 %946 }
 0x689   : > { %950 = vst.msk [vmem:[#allocation2] sm:$0xff] %vm949_vm7, %v947_v0 }
 0x690   : > { %v951_v1 = vld [vmem:[#allocation2] sm:$0xff] }
 0x691   : > { %1221 = vmatmul.msk.f32.vlgmr.msra.gmra.mxu2 %vm532_vm0, %v951_v1 }
 0x714   : > { %v980_v3 = vpop.f32.mrf.mxu2 }
 0x715   : > { %v981_v4 = vadd.f32 %v1376_v2, %v980_v3 }
 0x717   : > { %v983_v5 = vadd.f32 %v981_v4, %v1904_v9 }
 0x719   : > { %v986_v6 = vsel %vm532_vm0, %v983_v5, 0.0 }
 0x71a   : > { %987 = vadd.xlane.f32.xlu0 %v986_v6 }
 0x78d   : > { %v988_v15 = vpop.xlane.xlu0 %987 }
 0x78e   : > { %v996_v16 = vmul.f32 %v995_v14, %v988_v15 }
 0x790   : > { %v997_v17 = vsub.f32 %v983_v5, %v996_v16 }
 0x792   : > { %v998_v18 = vmul.f32 %v997_v17, %v997_v17 }
 0x794   : > { %v999_v20 = vsel %vm532_vm0, %v998_v18, 0.0 }
 0x795   : > { %1000 = vadd.xlane.f32.xlu1 %v999_v20 }
 0x808   : > { %v1001_v9 = vpop.xlane.xlu1 %1000 }
 0x809   : > { %v1002_v21 = vmul.f32 %v1001_v9, %v995_v14 }
 0x80b   : > { %v1003_v22 = vadd.f32 1e-05, %v1002_v21 }
 0x80d   : > { %1397 = vrsqrt.f32 %v1003_v22  ;;  %vm1010_vm9 = vweird.f32 %v1003_v22 }
 0x813   : > { %v1398_v23 = vpop.eup %1397 }
 0x814   : > { %v1005_v24 = vmul.f32 %v1398_v23, %v1003_v22  ;;  %vm1011_vm8 = vweird.f32 %v1398_v23 }
 0x815   : > { %vm1012_vm10 = vmor %vm1010_vm9, %vm1011_vm8 }
 0x816   : > { %v1006_v25 = vmul.f32 %v1398_v23, %v1005_v24 }
 0x818   : > { %v1007_v26 = vmul.f32 0.5, %v1006_v25 }
 0x81a   : > { %v1008_v27 = vsub.f32 1.5, %v1007_v26 }
 0x81c   : > { %v1009_v28 = vmul.f32 %v1398_v23, %v1008_v27 }
 0x81e   : > { %v1013_v30 = vsel %vm1012_vm10, %v1398_v23, %v1009_v28 }
 0x81f   : > { %v1014_v32 = vmul.f32 %v1013_v30, %v997_v17 }
 0x821   : > { %v1018_v33 = vmul.f32 %v1377_v29, %v1014_v32 }
 0x823   : > { %v1022_v34 = vadd.f32 %v1378_v31, %v1018_v33 }
 0x825   : > { %1023 = vst.msk [vmem:[%s520_s26] sm:$0xff] %vm532_vm0, %v1022_v34 }
 0x826 PF: > { %s26_s18 = sadd.s32 1, %s1671_s18   ;;  %s2018_s13 = smov %s1655_s14 }
 0x827   : > { %p23_p1 = scmp.ge.s32.totalorder %s26_s18, 4   ;;  %s2019_s14 = smov %s1659_s15 }
 0x828   : > { %s2020_s15 = smov %s1859_s2  ;;  %s2021_s16 = smov %s1667_s17 }
 0x829   : > { %s2022_s17 = smov %s2024_s29  ;;  %25 = sbr.rel (!%p23_p1) target bundleno = 13 (0xd), region = 127 }
 0x82e   :  { %1049 = vsyncpa [#allocation4], 1 }
 0x82f   :  { %1051 = vsyncpa [#allocation4 + $0x1], 1 }
 0x830   :  { %1052 = vsyncpa [#allocation6], 1 }
 0x831   :  { %1053 = vsyncpa [#allocation9], 1 }
 0x832   :  { %1054 = vsyncpa [#allocation12], 1 }

// kernel: decoder_forward.13
= control target key start
LH: loop header
LB: loop body
LE: loop exit
PB: predicated region body
PF: predicated region fallthrough
CT: control target
= control target key end

     0   :  { %vm16_vm0 = vcmask 261120   ;;  %v125_v4 = vmov 32.0   ;;  %s179_s0 = inlined_call_operand.vmem [shape: f32[16,32], index: 0, kind: input, shape index: {}]   ;;  %s180_s2 = inlined_call_operand.vmem [shape: f32[1,128], index: 2, kind: input, shape index: {}]   ;;  %s181_s1 = inlined_call_operand.vmem [shape: f32[32,128], index: 1, kind: input, shape index: {}]   ;;  %s182_s3 = inlined_call_operand.vmem [shape: f32[16,128], index: 3, kind: output, shape index: {}]  }
   0x1   :  { %v14_v0 = vld [vmem:[%s179_s0] sm:$0xff]  ;;  %v15_v2 = vld [vmem:[%s179_s0 + $0x8] sm:$0xff]  ;;  %119 = vrcp.f32 %v125_v4  ;;  %v71_v21 = vld [vmem:[%s181_s1 + $0x18] sm:$0xff] }
   0x2   :  { %v17_v1 = vsel %vm16_vm0, %v14_v0, 0.0  ;;  %v20_v3 = vsel %vm16_vm0, %v15_v2, 0.0  ;;  %94 = vmatpush.msra.mxu0 %v71_v21  ;;  %113 = vmatpush.msra.mxu1 %v71_v21  ;;  %v70_v22 = vld [vmem:[%s181_s1 + $0x10] sm:$0xff]  ;;  %v69_v23 = vld [vmem:[%s181_s1 + $0x8] sm:$0xff]  ;;  %v68_v24 = vld [vmem:[%s181_s1] sm:$0xff] }
   0x3   :  { %18 = vadd.xlane.f32.xlu0 %v17_v1  ;;  %v118_v47 = vld [vmem:[%s180_s2] ss:$0 sm:$0xff] }
   0x4   :  { %95 = vmatpush.msra.mxu0 %v70_v22  ;;  %114 = vmatpush.msra.mxu1 %v70_v22 }
   0x6   :  { %96 = vmatpush.msra.mxu0 %v69_v23  ;;  %115 = vmatpush.msra.mxu1 %v69_v23 }
   0x7   :  { %v120_v5 = vpop.eup %119 }
   0x8   :  { %v24_v6 = vmul.f32 32.0, %v120_v5  ;;  %vm28_vm1 = vweird.f32 %v120_v5  ;;  %97 = vmatpush.msra.mxu0 %v68_v24  ;;  %116 = vmatpush.msra.mxu1 %v68_v24 }
   0xa   :  { %v25_v7 = vsub.f32 1.0, %v24_v6 }
   0xb   :  { %21 = vadd.xlane.f32.xlu0 %v20_v3 }
   0xc   :  { %v26_v8 = vmul.f32 %v120_v5, %v25_v7 }
   0xe   :  { %v27_v9 = vadd.f32 %v120_v5, %v26_v8 }
  0x10   :  { %v29_v10 = vsel %vm28_vm1, %v120_v5, %v27_v9 }
  0x76   :  { %v19_v11 = vpop.xlane.xlu0 %18 }
  0x77   :  { %v30_v12 = vmul.f32 %v29_v10, %v19_v11 }
  0x79   :  { %v32_v13 = vsub.f32 %v14_v0, %v30_v12 }
  0x7b   :  { %v34_v14 = vmul.f32 %v32_v13, %v32_v13 }
  0x7d   :  { %v36_v15 = vsel %vm16_vm0, %v34_v14, 0.0 }
  0x7e   :  { %37 = vadd.xlane.f32.xlu1 %v36_v15  ;;  %v22_v16 = vpop.xlane.xlu0 %21 }
  0x7f   :  { %v31_v17 = vmul.f32 %v29_v10, %v22_v16 }
  0x81   :  { %v33_v18 = vsub.f32 %v15_v2, %v31_v17 }
  0x83   :  { %v35_v19 = vmul.f32 %v33_v18, %v33_v18 }
  0x85   :  { %v39_v20 = vsel %vm16_vm0, %v35_v19, 0.0 }
  0x86   :  { %40 = vadd.xlane.f32.xlu1 %v39_v20 }
  0xf1   :  { %v38_v25 = vpop.xlane.xlu1 %37 }
  0xf2   :  { %v42_v26 = vmul.f32 %v38_v25, %v29_v10 }
  0xf4   :  { %v44_v27 = vadd.f32 1e-05, %v42_v26 }
  0xf6   :  { %121 = vrsqrt.f32 %v44_v27  ;;  %vm52_vm3 = vweird.f32 %v44_v27 }
  0xf9   :  { %v41_v28 = vpop.xlane.xlu1 %40 }
  0xfa   :  { %v43_v29 = vmul.f32 %v41_v28, %v29_v10 }
  0xfc   :  { %v122_v30 = vpop.eup %121  ;;  %v45_v31 = vadd.f32 1e-05, %v43_v29 }
  0xfd   :  { %v47_v32 = vmul.f32 %v122_v30, %v44_v27  ;;  %vm53_vm2 = vweird.f32 %v122_v30 }
  0xfe   :  { %123 = vrsqrt.f32 %v45_v31  ;;  %vm54_vm4 = vmor %vm52_vm3, %vm53_vm2  ;;  %vm62_vm6 = vweird.f32 %v45_v31 }
  0xff   :  { %v48_v33 = vmul.f32 %v122_v30, %v47_v32 }
 0x101   :  { %v49_v34 = vmul.f32 0.5, %v48_v33 }
 0x103   :  { %v50_v35 = vsub.f32 1.5, %v49_v34 }
 0x104   :  { %v124_v36 = vpop.eup %123 }
 0x105   :  { %v57_v37 = vmul.f32 %v124_v36, %v45_v31  ;;  %v51_v38 = vmul.f32 %v122_v30, %v50_v35  ;;  %vm63_vm5 = vweird.f32 %v124_v36 }
 0x106   :  { %vm64_vm7 = vmor %vm62_vm6, %vm63_vm5 }
 0x107   :  { %v58_v39 = vmul.f32 %v124_v36, %v57_v37  ;;  %v55_v40 = vsel %vm54_vm4, %v122_v30, %v51_v38 }
 0x108   :  { %v66_v41 = vmul.f32 %v55_v40, %v32_v13 }
 0x109   :  { %v59_v42 = vmul.f32 0.5, %v58_v39 }
 0x10a   :  { %111 = vmatmul.msk.f32.vlgmr.msra.gmra.mxu0 %vm16_vm0, %v66_v41 }
 0x10b   :  { %v60_v43 = vsub.f32 1.5, %v59_v42 }
 0x10d   :  { %v61_v44 = vmul.f32 %v124_v36, %v60_v43 }
 0x10f   :  { %v65_v45 = vsel %vm64_vm7, %v124_v36, %v61_v44 }
 0x110   :  { %v67_v46 = vmul.f32 %v65_v45, %v33_v18 }
 0x112   :  { %112 = vmatmul.msk.f32.vlgmr.msra.gmra.mxu1 %vm16_vm0, %v67_v46 }
 0x187   :  { %v99_v48 = vpop.f32.mrf.mxu0 }
 0x188   :  { %v100_v49 = vadd.f32 %v118_v47, %v99_v48 }
 0x18a   :  { %105 = vst [vmem:[%s182_s3] sm:$0xff] %v100_v49 }
 0x18f   :  { %v102_v50 = vpop.f32.mrf.mxu1 }
 0x190   :  { %v103_v51 = vadd.f32 %v118_v47, %v102_v50 }
 0x192   :  { %106 = vst [vmem:[%s182_s3 + $0x8] sm:$0xff] %v103_v51 }

</bundles_post_ra>
